<compile_context>
chip_gen: v7x
topology: tpu7x:2x2x1
jax: 0.10.0
libtpu: 0.0.40
codegen_flags: <defaults>
</compile_context>

<pallas_src>
import jax
import jax.numpy as jnp
from jax.experimental import pallas as pl
from jax.experimental.pallas import tpu as pltpu

IN_DIM, H1, H2, OUT_DIM = 2048, 1024, 512, 11
OUT_PAD = 128          # lane-dense padded logits width (multiple of 128)
MAX_TB = 512           # keeps VMEM well inside the 32 MiB scoped limit (v7x)
BN_EPS = 1e-5


def _round_up(n, m):
    return (n + m - 1) // m * m


def mlp_kernel(x_ref,
               w1_ref, s1_ref, c1_ref,
               w2_ref, s2_ref, c2_ref,
               w3_ref, s3_ref, c3_ref,
               o_ref):
    # x arrives as f32; cast to bf16 on the VPU (hidden under the MXU work).
    x = x_ref[...].astype(jnp.bfloat16)

    # Layer 1: int8 weights -> bf16, MXU matmul with f32 accumulation, then
    # per-column dequant scale + (BN-folded) bias + ReLU in f32.
    acc1 = jnp.dot(x, w1_ref[...].astype(jnp.bfloat16),
                   preferred_element_type=jnp.float32)
    h1 = jnp.maximum(acc1 * s1_ref[...] + c1_ref[...], 0.0)

    # Layer 2.
    acc2 = jnp.dot(h1.astype(jnp.bfloat16), w2_ref[...].astype(jnp.bfloat16),
                   preferred_element_type=jnp.float32)
    h2 = jnp.maximum(acc2 * s2_ref[...] + c2_ref[...], 0.0)

    # Layer 3: logits (lane-padded to OUT_PAD), stored as bf16.
    acc3 = jnp.dot(h2.astype(jnp.bfloat16), w3_ref[...].astype(jnp.bfloat16),
                   preferred_element_type=jnp.float32)
    o_ref[...] = (acc3 * s3_ref[...] + c3_ref[...]).astype(o_ref.dtype)


def _quantize_cols(w):
    """Symmetric int8 quantization with one f32 scale per output column."""
    amax = jnp.max(jnp.abs(w), axis=0, keepdims=True)              # (1, out)
    scale = jnp.where(amax > 0.0, amax / 127.0, 1.0).astype(jnp.float32)
    w_q = jnp.clip(jnp.round(w / scale), -127.0, 127.0).astype(jnp.int8)
    return w_q, scale


def fold_params(params):
    """Fold BatchNorm affine into the Linear weights; int8-quantize weights."""
    (w1, b1, s1, t1, w2, b2, s2, t2, w3, b3) = params
    w1f = w1 * s1                                 # scale each output column
    c1 = (b1 * s1 + t1).astype(jnp.float32)
    w2f = w2 * s2
    c2 = (b2 * s2 + t2).astype(jnp.float32)
    w3p = jnp.zeros((H2, OUT_PAD), jnp.float32).at[:, :OUT_DIM].set(w3)
    c3p = jnp.zeros((1, OUT_PAD), jnp.float32).at[:, :OUT_DIM].set(b3)

    w1q, sc1 = _quantize_cols(w1f)
    w2q, sc2 = _quantize_cols(w2f)
    w3q, sc3 = _quantize_cols(w3p)                # zero columns stay exactly 0
    return (w1q, sc1, c1, w2q, sc2, c2, w3q, sc3, c3p)


def cnn_clsf_forward(x, folded, *, tb=None):
    """x: [B, 2048] float32.  Returns logits [B, 11] float32."""
    B = x.shape[0]
    if tb is None:
        # Spread B as evenly as possible over ceil(B / MAX_TB) tiles so the
        # last tile isn't mostly padding; round to 16 (bf16 sublane packing).
        n_steps = max(1, -(-B // MAX_TB))
        tb = min(MAX_TB, _round_up(-(-B // n_steps), 16))
    Bp = _round_up(B, tb)

    x = x.astype(jnp.float32)          # kernel casts to bf16 internally
    if Bp != B:
        x = jnp.pad(x, ((0, Bp - B), (0, 0)))

    (w1q, sc1, c1, w2q, sc2, c2, w3q, sc3, c3) = folded
    weight_args = (w1q, sc1, c1, w2q, sc2, c2, w3q, sc3, c3)

    def const_spec(shape):
        nd = len(shape)
        # Grid-invariant operands: fetched once, single VMEM buffer.
        return pl.BlockSpec(shape, lambda i: (0,) * nd,
                            pipeline_mode=pl.Buffered(1))

    grid_steps = Bp // tb
    # Small grids are weight-DMA bound: don't let v7x megacore duplicate the
    # weight fetch into both TCs' private VMEM.
    semantics = ("parallel",) if grid_steps > 4 else ("arbitrary",)

    flops = 2 * Bp * (IN_DIM * H1 + H1 * H2 + H2 * OUT_PAD)
    bytes_accessed = int(
        x.size * x.dtype.itemsize
        + sum(a.size * a.dtype.itemsize for a in weight_args)
        + Bp * OUT_PAD * 2)

    out = pl.pallas_call(
        mlp_kernel,
        out_shape=jax.ShapeDtypeStruct((Bp, OUT_PAD), jnp.bfloat16),
        grid_spec=pltpu.PrefetchScalarGridSpec(
            num_scalar_prefetch=0,
            grid=(grid_steps,),
            in_specs=[
                pl.BlockSpec((tb, IN_DIM), lambda i: (i, 0)),   # x tile (f32)
                const_spec((IN_DIM, H1)),                       # W1 int8
                const_spec((1, H1)),                            # scale1 f32
                const_spec((1, H1)),                            # c1 f32
                const_spec((H1, H2)),                           # W2 int8
                const_spec((1, H2)),                            # scale2 f32
                const_spec((1, H2)),                            # c2 f32
                const_spec((H2, OUT_PAD)),                      # W3 int8 (padded)
                const_spec((1, OUT_PAD)),                       # scale3 f32
                const_spec((1, OUT_PAD)),                       # c3 f32
            ],
            out_specs=pl.BlockSpec((tb, OUT_PAD), lambda i: (i, 0)),
        ),
        compiler_params=pltpu.CompilerParams(
            dimension_semantics=semantics,
            vmem_limit_bytes=32 << 20,
        ),
        cost_estimate=pl.CostEstimate(
            flops=flops, transcendentals=0, bytes_accessed=bytes_accessed),
    )(x, *weight_args)

    return out[:B, :OUT_DIM].astype(jnp.float32)


def init_params(key):
    """Deterministic synthetic parameters matching the nn.Module shapes."""
    ks = jax.random.split(key, 12)

    def lin(kw, kb, fan_in, fan_out):
        bound = 1.0 / jnp.sqrt(fan_in)
        w = jax.random.uniform(kw, (fan_in, fan_out), jnp.float32, -bound, bound)
        b = jax.random.uniform(kb, (1, fan_out), jnp.float32, -bound, bound)
        return w, b

    w1, b1 = lin(ks[0], ks[1], IN_DIM, H1)
    w2, b2 = lin(ks[2], ks[3], H1, H2)
    w3, b3 = lin(ks[4], ks[5], H2, OUT_DIM)

    def bn_fold(kg, kb, km, kv, n):
        gamma = 1.0 + 0.1 * jax.random.normal(kg, (1, n), jnp.float32)
        beta = 0.1 * jax.random.normal(kb, (1, n), jnp.float32)
        run_mean = 0.1 * jax.random.normal(km, (1, n), jnp.float32)
        run_var = jnp.abs(1.0 + 0.1 * jax.random.normal(kv, (1, n), jnp.float32))
        scale = gamma / jnp.sqrt(run_var + BN_EPS)
        shift = beta - run_mean * scale
        return scale, shift

    s1, t1 = bn_fold(ks[6], ks[7], ks[8], ks[9], H1)
    s2, t2 = bn_fold(ks[10], ks[11], ks[6], ks[7], H2)

    return (w1, b1, s1, t1, w2, b2, s2, t2, w3, b3)


def reference_forward(x, folded):
    """Pure-JAX reference mirroring the kernel's quantized bf16/f32 path."""
    (w1q, sc1, c1, w2q, sc2, c2, w3q, sc3, c3) = folded

    def bf(a):
        return a.astype(jnp.bfloat16).astype(jnp.float32)

    h = jnp.maximum(bf(x) @ w1q.astype(jnp.float32) * sc1 + c1, 0.0)
    h = jnp.maximum(bf(h) @ w2q.astype(jnp.float32) * sc2 + c2, 0.0)
    return bf(h) @ w3q.astype(jnp.float32) * sc3 + c3


if __name__ == "__main__":
    key = jax.random.PRNGKey(0)
    kx, kp = jax.random.split(key)

    B = 16  # small batch -> single grid step, "arbitrary" semantics
    x = jax.random.normal(kx, (B, IN_DIM), jnp.float32)
    params = init_params(kp)
    folded = fold_params(params)

    out = cnn_clsf_forward(x, folded)
    out = jax.block_until_ready(out)

    ref = reference_forward(x, folded)[:, :OUT_DIM]
    assert out.shape == (B, OUT_DIM)
    assert jnp.allclose(out, ref, atol=2e-2, rtol=2e-2), (
        float(jnp.max(jnp.abs(out - ref))))

    print("KERNEL_OK")
</pallas_src>

<mosaic_0001>
module attributes {stable_mosaic.version = 11 : i64} {
  func.func @mlp_kernel(%arg0: i32, %arg1: memref<16x2048xf32, #tpu.memory_space<vmem>>, %arg2: memref<2048x1024xi8, #tpu.memory_space<vmem>>, %arg3: memref<1x1024xf32, #tpu.memory_space<vmem>>, %arg4: memref<1x1024xf32, #tpu.memory_space<vmem>>, %arg5: memref<1024x512xi8, #tpu.memory_space<vmem>>, %arg6: memref<1x512xf32, #tpu.memory_space<vmem>>, %arg7: memref<1x512xf32, #tpu.memory_space<vmem>>, %arg8: memref<512x128xi8, #tpu.memory_space<vmem>>, %arg9: memref<1x128xf32, #tpu.memory_space<vmem>>, %arg10: memref<1x128xf32, #tpu.memory_space<vmem>>, %arg11: memref<16x128xbf16, #tpu.memory_space<vmem>>) attributes {dimension_semantics = [#tpu.dimension_semantics<arbitrary>], iteration_bounds = array<i64: 1>, scalar_prefetch = 0 : i64, scratch_operands = 0 : i64, tpu.core_type = #tpu.core_type<tc>, window_params = [{transform_indices = @transform_0, window_bounds = array<i64: 16, 2048>}, {pipeline_mode = #tpu.pipeline_mode<synchronous>, transform_indices = @transform_1, window_bounds = array<i64: 2048, 1024>}, {pipeline_mode = #tpu.pipeline_mode<synchronous>, transform_indices = @transform_2, window_bounds = array<i64: 1, 1024>}, {pipeline_mode = #tpu.pipeline_mode<synchronous>, transform_indices = @transform_3, window_bounds = array<i64: 1, 1024>}, {pipeline_mode = #tpu.pipeline_mode<synchronous>, transform_indices = @transform_4, window_bounds = array<i64: 1024, 512>}, {pipeline_mode = #tpu.pipeline_mode<synchronous>, transform_indices = @transform_5, window_bounds = array<i64: 1, 512>}, {pipeline_mode = #tpu.pipeline_mode<synchronous>, transform_indices = @transform_6, window_bounds = array<i64: 1, 512>}, {pipeline_mode = #tpu.pipeline_mode<synchronous>, transform_indices = @transform_7, window_bounds = array<i64: 512, 128>}, {pipeline_mode = #tpu.pipeline_mode<synchronous>, transform_indices = @transform_8, window_bounds = array<i64: 1, 128>}, {pipeline_mode = #tpu.pipeline_mode<synchronous>, transform_indices = @transform_9, window_bounds = array<i64: 1, 128>}, {transform_indices = @transform_10, window_bounds = array<i64: 16, 128>}]} {
    %c0 = arith.constant 0 : index
    %c0_0 = arith.constant 0 : index
    %0 = vector.load %arg1[%c0, %c0_0] : memref<16x2048xf32, #tpu.memory_space<vmem>>, vector<16x2048xf32>
    %1 = arith.truncf %0 : vector<16x2048xf32> to vector<16x2048xbf16>
    %c0_1 = arith.constant 0 : index
    %c0_2 = arith.constant 0 : index
    %2 = vector.load %arg2[%c0_1, %c0_2] : memref<2048x1024xi8, #tpu.memory_space<vmem>>, vector<2048x1024xi8>
    %3 = arith.sitofp %2 : vector<2048x1024xi8> to vector<2048x1024xbf16>
    %cst = arith.constant dense<0.000000e+00> : vector<16x1024xf32>
    %4 = tpu.matmul %1, %3, %cst {dimension_numbers = #tpu.dot_dimension_numbers<[1], [0], [0], [1], [0, 0, 1, 1], [], []>} : vector<16x2048xbf16>, vector<2048x1024xbf16>, vector<16x1024xf32> -> vector<16x1024xf32>
    %c0_3 = arith.constant 0 : index
    %c0_4 = arith.constant 0 : index
    %5 = vector.load %arg3[%c0_3, %c0_4] : memref<1x1024xf32, #tpu.memory_space<vmem>>, vector<1x1024xf32>
    %6 = vector.broadcast %5 : vector<1x1024xf32> to vector<16x1024xf32>
    %7 = arith.mulf %4, %6 : vector<16x1024xf32>
    %c0_5 = arith.constant 0 : index
    %c0_6 = arith.constant 0 : index
    %8 = vector.load %arg4[%c0_5, %c0_6] : memref<1x1024xf32, #tpu.memory_space<vmem>>, vector<1x1024xf32>
    %9 = vector.broadcast %8 : vector<1x1024xf32> to vector<16x1024xf32>
    %10 = arith.addf %7, %9 : vector<16x1024xf32>
    %cst_7 = arith.constant 0.000000e+00 : f32
    %11 = vector.broadcast %cst_7 : f32 to vector<16x1024xf32>
    %12 = arith.maximumf %10, %11 : vector<16x1024xf32>
    %13 = arith.truncf %12 : vector<16x1024xf32> to vector<16x1024xbf16>
    %c0_8 = arith.constant 0 : index
    %c0_9 = arith.constant 0 : index
    %14 = vector.load %arg5[%c0_8, %c0_9] : memref<1024x512xi8, #tpu.memory_space<vmem>>, vector<1024x512xi8>
    %15 = arith.sitofp %14 : vector<1024x512xi8> to vector<1024x512xbf16>
    %cst_10 = arith.constant dense<0.000000e+00> : vector<16x512xf32>
    %16 = tpu.matmul %13, %15, %cst_10 {dimension_numbers = #tpu.dot_dimension_numbers<[1], [0], [0], [1], [0, 0, 1, 1], [], []>} : vector<16x1024xbf16>, vector<1024x512xbf16>, vector<16x512xf32> -> vector<16x512xf32>
    %c0_11 = arith.constant 0 : index
    %c0_12 = arith.constant 0 : index
    %17 = vector.load %arg6[%c0_11, %c0_12] : memref<1x512xf32, #tpu.memory_space<vmem>>, vector<1x512xf32>
    %18 = vector.broadcast %17 : vector<1x512xf32> to vector<16x512xf32>
    %19 = arith.mulf %16, %18 : vector<16x512xf32>
    %c0_13 = arith.constant 0 : index
    %c0_14 = arith.constant 0 : index
    %20 = vector.load %arg7[%c0_13, %c0_14] : memref<1x512xf32, #tpu.memory_space<vmem>>, vector<1x512xf32>
    %21 = vector.broadcast %20 : vector<1x512xf32> to vector<16x512xf32>
    %22 = arith.addf %19, %21 : vector<16x512xf32>
    %cst_15 = arith.constant 0.000000e+00 : f32
    %23 = vector.broadcast %cst_15 : f32 to vector<16x512xf32>
    %24 = arith.maximumf %22, %23 : vector<16x512xf32>
    %25 = arith.truncf %24 : vector<16x512xf32> to vector<16x512xbf16>
    %c0_16 = arith.constant 0 : index
    %c0_17 = arith.constant 0 : index
    %26 = vector.load %arg8[%c0_16, %c0_17] : memref<512x128xi8, #tpu.memory_space<vmem>>, vector<512x128xi8>
    %27 = arith.sitofp %26 : vector<512x128xi8> to vector<512x128xbf16>
    %cst_18 = arith.constant dense<0.000000e+00> : vector<16x128xf32>
    %28 = tpu.matmul %25, %27, %cst_18 {dimension_numbers = #tpu.dot_dimension_numbers<[1], [0], [0], [1], [0, 0, 1, 1], [], []>} : vector<16x512xbf16>, vector<512x128xbf16>, vector<16x128xf32> -> vector<16x128xf32>
    %c0_19 = arith.constant 0 : index
    %c0_20 = arith.constant 0 : index
    %29 = vector.load %arg9[%c0_19, %c0_20] : memref<1x128xf32, #tpu.memory_space<vmem>>, vector<1x128xf32>
    %30 = vector.broadcast %29 : vector<1x128xf32> to vector<16x128xf32>
    %31 = arith.mulf %28, %30 : vector<16x128xf32>
    %c0_21 = arith.constant 0 : index
    %c0_22 = arith.constant 0 : index
    %32 = vector.load %arg10[%c0_21, %c0_22] : memref<1x128xf32, #tpu.memory_space<vmem>>, vector<1x128xf32>
    %33 = vector.broadcast %32 : vector<1x128xf32> to vector<16x128xf32>
    %34 = arith.addf %31, %33 : vector<16x128xf32>
    %35 = arith.truncf %34 : vector<16x128xf32> to vector<16x128xbf16>
    %c0_23 = arith.constant 0 : index
    %c0_24 = arith.constant 0 : index
    %36 = vector.load %arg11[%c0_23, %c0_24] : memref<16x128xbf16, #tpu.memory_space<vmem>>, vector<16x128xbf16>
    tpu.vector_store %arg11[%c0_23, %c0_24], %35 {strides = array<i32>} : memref<16x128xbf16, #tpu.memory_space<vmem>>, vector<16x128xbf16>,
    return
  }
  func.func @transform_0(%arg0: i32) -> (i32, i32) {
    %c0_i32 = arith.constant 0 : i32
    %c0_i32_0 = arith.constant 0 : i32
    return %arg0, %c0_i32 : i32, i32
  }
  func.func @transform_1(%arg0: i32) -> (i32, i32) {
    %c0_i32 = arith.constant 0 : i32
    %c0_i32_0 = arith.constant 0 : i32
    %c0_i32_1 = arith.constant 0 : i32
    return %c0_i32, %c0_i32_0 : i32, i32
  }
  func.func @transform_2(%arg0: i32) -> (i32, i32) {
    %c0_i32 = arith.constant 0 : i32
    %c0_i32_0 = arith.constant 0 : i32
    %c0_i32_1 = arith.constant 0 : i32
    return %c0_i32, %c0_i32_0 : i32, i32
  }
  func.func @transform_3(%arg0: i32) -> (i32, i32) {
    %c0_i32 = arith.constant 0 : i32
    %c0_i32_0 = arith.constant 0 : i32
    %c0_i32_1 = arith.constant 0 : i32
    return %c0_i32, %c0_i32_0 : i32, i32
  }
  func.func @transform_4(%arg0: i32) -> (i32, i32) {
    %c0_i32 = arith.constant 0 : i32
    %c0_i32_0 = arith.constant 0 : i32
    %c0_i32_1 = arith.constant 0 : i32
    return %c0_i32, %c0_i32_0 : i32, i32
  }
  func.func @transform_5(%arg0: i32) -> (i32, i32) {
    %c0_i32 = arith.constant 0 : i32
    %c0_i32_0 = arith.constant 0 : i32
    %c0_i32_1 = arith.constant 0 : i32
    return %c0_i32, %c0_i32_0 : i32, i32
  }
  func.func @transform_6(%arg0: i32) -> (i32, i32) {
    %c0_i32 = arith.constant 0 : i32
    %c0_i32_0 = arith.constant 0 : i32
    %c0_i32_1 = arith.constant 0 : i32
    return %c0_i32, %c0_i32_0 : i32, i32
  }
  func.func @transform_7(%arg0: i32) -> (i32, i32) {
    %c0_i32 = arith.constant 0 : i32
    %c0_i32_0 = arith.constant 0 : i32
    %c0_i32_1 = arith.constant 0 : i32
    return %c0_i32, %c0_i32_0 : i32, i32
  }
  func.func @transform_8(%arg0: i32) -> (i32, i32) {
    %c0_i32 = arith.constant 0 : i32
    %c0_i32_0 = arith.constant 0 : i32
    %c0_i32_1 = arith.constant 0 : i32
    return %c0_i32, %c0_i32_0 : i32, i32
  }
  func.func @transform_9(%arg0: i32) -> (i32, i32) {
    %c0_i32 = arith.constant 0 : i32
    %c0_i32_0 = arith.constant 0 : i32
    %c0_i32_1 = arith.constant 0 : i32
    return %c0_i32, %c0_i32_0 : i32, i32
  }
  func.func @transform_10(%arg0: i32) -> (i32, i32) {
    %c0_i32 = arith.constant 0 : i32
    %c0_i32_0 = arith.constant 0 : i32
    return %arg0, %c0_i32 : i32, i32
  }
}

</mosaic_0001>

<bundles_post_ra>
// kernel: tpu_custom_call.1
= control target key start
LH: loop header
LB: loop body
LE: loop exit
PB: predicated region body
PF: predicated region fallthrough
CT: control target
= control target key end

     0   :  { %15 = vsyncpa [#allocation3], 0  ;;  %s5095_s0 = inlined_call_operand.hbm [shape: f32[16,2048], index: 0, kind: input, shape index: {}]   ;;  %s5096_s1 = inlined_call_operand.hbm [shape: s8[2048,1024], index: 1, kind: input, shape index: {}]   ;;  %s5097_s2 = inlined_call_operand.hbm [shape: f32[1,1024], index: 2, kind: input, shape index: {}]   ;;  %s5098_s3 = inlined_call_operand.hbm [shape: f32[1,1024], index: 3, kind: input, shape index: {}]   ;;  %s5099_s4 = inlined_call_operand.hbm [shape: s8[1024,512], index: 4, kind: input, shape index: {}]   ;;  %s5100_s5 = inlined_call_operand.hbm [shape: f32[1,512], index: 5, kind: input, shape index: {}]   ;;  %s5101_s6 = inlined_call_operand.hbm [shape: f32[1,512], index: 6, kind: input, shape index: {}]   ;;  %s5102_s7 = inlined_call_operand.hbm [shape: s8[512,128], index: 7, kind: input, shape index: {}]   ;;  %s5103_s8 = inlined_call_operand.hbm [shape: f32[1,128], index: 8, kind: input, shape index: {}]   ;;  %s5104_s9 = inlined_call_operand.hbm [shape: f32[1,128], index: 9, kind: input, shape index: {}]   ;;  %s5105_s10 = inlined_call_operand.hbm [shape: bf16[16,128], index: 10, kind: output, shape index: {}]  }
   0x1   :  { %16 = vsyncpa [#allocation6], 0 }
   0x2   :  { %17 = vsyncpa [#allocation9], 0 }
   0x3   :  { %18 = vsyncpa [#allocation12], 0 }
   0x4   :  { %19 = vsyncpa [#allocation15], 0 }
   0x5   :  { %20 = vsyncpa [#allocation18], 0 }
   0x6   :  { %21 = vsyncpa [#allocation4], 0  ;;  %s4709_s13 = smov [#allocation5]   ;;  %s4453_s17 = scalar_lea.hbm %s5096_s1, 65536 }
   0x7   :  { %s39_s14 = sshll.u32 %s4709_s13, 4  ;;  %p4454_p0 = scmp.ne.s32.totalorder %s5096_s1, %s4453_s17  ;;  %s40_s14 = int_to_ptr.vmem [resolvable:$true] %s39_s14 }
   0x8   :  { %p4457_p1 = scmp.lt.u32.totalorder %s4453_s17, %s5096_s1 }
   0xa   :  { %p4459_p2 = pnand %p4457_p1, %p4454_p0 }
   0xc   :  { %4462 = shalt.err (!%p4459_p2)
}
   0xd   :  { %s4463_s22 = scalar_lea.vmem %s40_s14, 65536  ;;  %p4468_p4 = scmp.lt.s32.totalorder %s40_s14, %s40_s14 }
   0xe   :  { %p4464_p3 = scmp.ne.s32.totalorder %s40_s14, %s4463_s22  ;;  %p4469_p5 = scmp.lt.s32.totalorder %s4463_s22, %s4463_s22 }
  0x10   :  { %p4470_p6 = por %p4469_p5, %p4468_p4 }
  0x12   :  { %p4471_p7 = pnand %p4470_p6, %p4464_p3 }
  0x14   :  { %4474 = shalt.err (!%p4471_p7)
}
  0x15   :  { %s4710_s23 = smov 1024   ;;  %s4711_s24 = smov 64  }
  0x16   :  { %45 = dma.hbm_to_vmem [thread:$0]  %s5096_s1, 65536, %s40_s14, [#allocation6], %s4710_s23, %s4710_s23, %s4711_s24  }
  0x17   :  { %s4712_s27 = smov [#allocation8]   ;;  %s4713_s29 = smov [#allocation11]  }
  0x18   :  { %s62_s28 = sshll.u32 %s4712_s27, 4  ;;  %s84_s30 = sshll.u32 %s4713_s29, 4  ;;  %s63_s28 = int_to_ptr.vmem [resolvable:$true] %s62_s28  ;;  %s85_s30 = int_to_ptr.vmem [resolvable:$true] %s84_s30 }
  0x19   :  { %s4475_s13 = scalar_lea.hbm %s5098_s3, 128 }
  0x1a   :  { %p4476_p8 = scmp.ne.s32.totalorder %s5098_s3, %s4475_s13  ;;  %p4479_p9 = scmp.lt.u32.totalorder %s4475_s13, %s5098_s3 }
  0x1c   :  { %p4481_p10 = pnand %p4479_p9, %p4476_p8 }
  0x1e   :  { %4484 = shalt.err (!%p4481_p10)
}
  0x1f   :  { %s4485_s1 = scalar_lea.vmem %s63_s28, 128  ;;  %p4490_p12 = scmp.lt.s32.totalorder %s63_s28, %s63_s28 }
  0x20   :  { %p4486_p11 = scmp.ne.s32.totalorder %s63_s28, %s4485_s1  ;;  %p4491_p13 = scmp.lt.s32.totalorder %s4485_s1, %s4485_s1 }
  0x22   :  { %p4492_p0 = por %p4491_p13, %p4490_p12 }
  0x24   :  { %p4493_p1 = pnand %p4492_p0, %p4486_p11 }
  0x26   :  { %4496 = shalt.err (!%p4493_p1)
}
  0x27   :  { %65 = dma.hbm_to_vmem [thread:$0]  %s5098_s3, 128, %s63_s28, [#allocation9]  }
  0x28   :  { %s4497_s22 = scalar_lea.hbm %s5100_s5, 64 }
  0x29   :  { %p4498_p2 = scmp.ne.s32.totalorder %s5100_s5, %s4497_s22  ;;  %p4501_p3 = scmp.lt.u32.totalorder %s4497_s22, %s5100_s5 }
  0x2b   :  { %p4503_p4 = pnand %p4501_p3, %p4498_p2 }
  0x2d   :  { %4506 = shalt.err (!%p4503_p4)
}
  0x2e   :  { %s4507_s29 = scalar_lea.vmem %s85_s30, 64  ;;  %p4512_p6 = scmp.lt.s32.totalorder %s85_s30, %s85_s30 }
  0x2f   :  { %p4508_p5 = scmp.ne.s32.totalorder %s85_s30, %s4507_s29  ;;  %p4513_p7 = scmp.lt.s32.totalorder %s4507_s29, %s4507_s29 }
  0x31   :  { %p4514_p8 = por %p4513_p7, %p4512_p6 }
  0x33   :  { %p4515_p9 = pnand %p4514_p8, %p4508_p5 }
  0x35   :  { %4518 = shalt.err (!%p4515_p9)
}
  0x36   :  { %87 = dma.hbm_to_vmem [thread:$0]  %s5100_s5, 64, %s85_s30, [#allocation12]  }
  0x37   :  { %s4714_s11 = smov [#allocation14]   ;;  %s4715_s13 = smov [#allocation2]  }
  0x38   :  { %s103_s12 = sshll.u32 %s4714_s11, 4  ;;  %s27_s15 = sshll.u32 %s4715_s13, 4  ;;  %s104_s12 = int_to_ptr.vmem [resolvable:$true] %s103_s12  ;;  %s28_s15 = int_to_ptr.vmem [resolvable:$true] %s27_s15 }
  0x39   :  { %s4519_s18 = scalar_lea.hbm %s5102_s7, 2048 }
  0x3a   :  { %p4520_p10 = scmp.ne.s32.totalorder %s5102_s7, %s4519_s18  ;;  %p4523_p11 = scmp.lt.u32.totalorder %s4519_s18, %s5102_s7 }
  0x3c   :  { %p4525_p12 = pnand %p4523_p11, %p4520_p10 }
  0x3e   :  { %4528 = shalt.err (!%p4525_p12)
}
  0x3f   :  { %s4529_s5 = scalar_lea.vmem %s104_s12, 2048  ;;  %p4534_p0 = scmp.lt.s32.totalorder %s104_s12, %s104_s12 }
  0x40   :  { %p4530_p13 = scmp.ne.s32.totalorder %s104_s12, %s4529_s5  ;;  %p4535_p1 = scmp.lt.s32.totalorder %s4529_s5, %s4529_s5 }
  0x42   :  { %p4536_p2 = por %p4535_p1, %p4534_p0 }
  0x44   :  { %p4537_p3 = pnand %p4536_p2, %p4530_p13 }
  0x46   :  { %4540 = shalt.err (!%p4537_p3)
}
  0x47   :  { %s4716_s30 = smov 128   ;;  %s4717_s21 = smov 8  }
  0x48   :  { %109 = dma.hbm_to_vmem [thread:$0]  %s5102_s7, 2048, %s104_s12, [#allocation15], %s4716_s30, %s4716_s30, %s4717_s21  }
  0x49   :  { %s4541_s27 = scalar_lea.hbm %s5095_s0, 4096 }
  0x4a   :  { %p4542_p4 = scmp.ne.s32.totalorder %s5095_s0, %s4541_s27  ;;  %p4545_p5 = scmp.lt.u32.totalorder %s4541_s27, %s5095_s0 }
  0x4c   :  { %p4547_p6 = pnand %p4545_p5, %p4542_p4 }
  0x4e   :  { %4550 = shalt.err (!%p4547_p6)
}
  0x4f   :  { %s4551_s13 = scalar_lea.vmem %s28_s15, 4096  ;;  %p4556_p8 = scmp.lt.s32.totalorder %s28_s15, %s28_s15 }
  0x50   :  { %p4552_p7 = scmp.ne.s32.totalorder %s28_s15, %s4551_s13  ;;  %p4557_p9 = scmp.lt.s32.totalorder %s4551_s13, %s4551_s13 }
  0x52   :  { %p4558_p10 = por %p4557_p9, %p4556_p8 }
  0x54   :  { %p4559_p11 = pnand %p4558_p10, %p4552_p7 }
  0x56   :  { %4562 = shalt.err (!%p4559_p11)
}
  0x57   :  { %s4718_s7 = smov 2048   ;;  %s4719_s17 = smov [#allocation7]  }
  0x58   :  { %33 = dma.hbm_to_vmem [thread:$0]  %s5095_s0, 4096, %s28_s15, [#allocation3], %s4718_s7, %s4718_s7, %s4716_s30  }
  0x59   :  { %s52_s18 = sshll.u32 %s4719_s17, 4  ;;  %s4720_s1 = smov [#allocation10]   ;;  %s53_s18 = int_to_ptr.vmem [resolvable:$true] %s52_s18 }
  0x5a   :  { %s71_s14 = sshll.u32 %s4720_s1, 4  ;;  %s4563_s5 = scalar_lea.hbm %s5097_s2, 128  ;;  %s4844_s14 = int_to_ptr.vmem [resolvable:$true] %s71_s14 }
  0x5b   :  { %p4564_p12 = scmp.ne.s32.totalorder %s5097_s2, %s4563_s5  ;;  %p4567_p13 = scmp.lt.u32.totalorder %s4563_s5, %s5097_s2 }
  0x5d   :  { %p4569_p0 = pnand %p4567_p13, %p4564_p12 }
  0x5f   :  { %4572 = shalt.err (!%p4569_p0)
}
  0x60   :  { %s4573_s0 = scalar_lea.vmem %s53_s18, 128  ;;  %p4578_p2 = scmp.lt.s32.totalorder %s53_s18, %s53_s18 }
  0x61   :  { %p4574_p1 = scmp.ne.s32.totalorder %s53_s18, %s4573_s0  ;;  %p4579_p3 = scmp.lt.s32.totalorder %s4573_s0, %s4573_s0 }
  0x63   :  { %p4580_p4 = por %p4579_p3, %p4578_p2 }
  0x65   :  { %p4581_p5 = pnand %p4580_p4, %p4574_p1 }
  0x67   :  { %4584 = shalt.err (!%p4581_p5)
}
  0x68   :  { %55 = dma.hbm_to_vmem [thread:$0]  %s5097_s2, 128, %s53_s18, [#allocation6]  }
  0x69   :  { %s4585_s29 = scalar_lea.hbm %s5099_s4, 16384 }
  0x6a   :  { %p4586_p6 = scmp.ne.s32.totalorder %s5099_s4, %s4585_s29  ;;  %p4589_p7 = scmp.lt.u32.totalorder %s4585_s29, %s5099_s4 }
  0x6c   :  { %p4591_p8 = pnand %p4589_p7, %p4586_p6 }
  0x6e   :  { %4594 = shalt.err (!%p4591_p8)
}
  0x6f   :  { %s4595_s7 = scalar_lea.vmem %s4844_s14, 16384  ;;  %p4600_p10 = scmp.lt.s32.totalorder %s4844_s14, %s4844_s14 }
  0x70   :  { %p4596_p9 = scmp.ne.s32.totalorder %s4844_s14, %s4595_s7  ;;  %p4601_p11 = scmp.lt.s32.totalorder %s4595_s7, %s4595_s7 }
  0x72   :  { %p4602_p12 = por %p4601_p11, %p4600_p10 }
  0x74   :  { %p4603_p13 = pnand %p4602_p12, %p4596_p9 }
  0x76   :  { %4606 = shalt.err (!%p4603_p13)
}
  0x77   :  { %s4721_s2 = smov 512   ;;  %s4722_s12 = smov 32  }
  0x78   :  { %77 = dma.hbm_to_vmem [thread:$0]  %s5099_s4, 16384, %s4844_s14, [#allocation9], %s4721_s2, %s4721_s2, %s4722_s12  }
  0x79   :  { %s4723_s18 = smov [#allocation13]   ;;  %s4724_s19 = smov [#allocation16]  }
  0x7a   :  { %s94_s1 = sshll.u32 %s4723_s18, 4  ;;  %s116_s20 = sshll.u32 %s4724_s19, 4  ;;  %s95_s1 = int_to_ptr.vmem [resolvable:$true] %s94_s1  ;;  %s117_s20 = int_to_ptr.vmem [resolvable:$true] %s116_s20 }
  0x7b   :  { %s4607_s22 = scalar_lea.hbm %s5101_s6, 64 }
  0x7c   :  { %p4608_p0 = scmp.ne.s32.totalorder %s5101_s6, %s4607_s22  ;;  %p4611_p1 = scmp.lt.u32.totalorder %s4607_s22, %s5101_s6 }
  0x7e   :  { %p4613_p2 = pnand %p4611_p1, %p4608_p0 }
  0x80   :  { %4616 = shalt.err (!%p4613_p2)
}
  0x81   :  { %s4617_s4 = scalar_lea.vmem %s95_s1, 64  ;;  %p4622_p4 = scmp.lt.s32.totalorder %s95_s1, %s95_s1 }
  0x82   :  { %p4618_p3 = scmp.ne.s32.totalorder %s95_s1, %s4617_s4  ;;  %p4623_p5 = scmp.lt.s32.totalorder %s4617_s4, %s4617_s4 }
  0x84   :  { %p4624_p6 = por %p4623_p5, %p4622_p4 }
  0x86   :  { %p4625_p7 = pnand %p4624_p6, %p4618_p3 }
  0x88   :  { %4628 = shalt.err (!%p4625_p7)
}
  0x89   :  { %97 = dma.hbm_to_vmem [thread:$0]  %s5101_s6, 64, %s95_s1, [#allocation12]  }
  0x8a   :  { %s4629_s29 = scalar_lea.hbm %s5103_s8, 16 }
  0x8b   :  { %p4630_p8 = scmp.ne.s32.totalorder %s5103_s8, %s4629_s29  ;;  %p4633_p9 = scmp.lt.u32.totalorder %s4629_s29, %s5103_s8 }
  0x8d   :  { %p4635_p10 = pnand %p4633_p9, %p4630_p8 }
  0x8f   :  { %4638 = shalt.err (!%p4635_p10)
}
  0x90   :  { %s4639_s7 = scalar_lea.vmem %s117_s20, 16  ;;  %s4643_s2 = scalar_lea.vmem %s117_s20, 32 }
  0x91   :  { %p4640_p11 = scmp.ne.s32.totalorder %s117_s20, %s4639_s7  ;;  %p4644_p12 = scmp.lt.s32.totalorder %s117_s20, %s117_s20 }
  0x92   :  { %p4645_p13 = scmp.lt.s32.totalorder %s4643_s2, %s4639_s7 }
  0x94   :  { %p4646_p0 = por %p4645_p13, %p4644_p12 }
  0x96   :  { %p4647_p1 = pnand %p4646_p0, %p4640_p11 }
  0x98   :  { %4650 = shalt.err (!%p4647_p1)
}
  0x99   :  { %119 = dma.hbm_to_vmem [thread:$0]  %s5103_s8, 16, %s117_s20, [#allocation15]  }
  0x9a   :  { %s4725_s16 = smov [#allocation17]   ;;  %s4651_s19 = scalar_lea.hbm %s5104_s9, 16 }
  0x9b   :  { %s126_s17 = sshll.u32 %s4725_s16, 4  ;;  %p4652_p2 = scmp.ne.s32.totalorder %s5104_s9, %s4651_s19  ;;  %s127_s17 = int_to_ptr.vmem [resolvable:$true] %s126_s17 }
  0x9c   :  { %p4655_p3 = scmp.lt.u32.totalorder %s4651_s19, %s5104_s9 }
  0x9e   :  { %p4657_p4 = pnand %p4655_p3, %p4652_p2 }
  0xa0   :  { %4660 = shalt.err (!%p4657_p4)
}
  0xa1   :  { %s4661_s25 = scalar_lea.vmem %s127_s17, 16  ;;  %s4665_s8 = scalar_lea.vmem %s127_s17, 32 }
  0xa2   :  { %p4662_p5 = scmp.ne.s32.totalorder %s127_s17, %s4661_s25  ;;  %p4666_p6 = scmp.lt.s32.totalorder %s127_s17, %s127_s17 }
  0xa3   :  { %p4667_p7 = scmp.lt.s32.totalorder %s4665_s8, %s4661_s25 }
  0xa5   :  { %p4668_p8 = por %p4667_p7, %p4666_p6 }
  0xa7   :  { %p4669_p9 = pnand %p4668_p8, %p4662_p5 }
  0xa9   :  { %4672 = shalt.err (!%p4669_p9)
}
  0xaa   :  { %129 = dma.hbm_to_vmem [thread:$0]  %s5104_s9, 16, %s127_s17, [#allocation18]  }
  0xab   :  { %4695 = dma.done.wait [#allocation3], 4096  }
  0xac   :  { %4696 = vsyncadd [#allocation3], 4294963200 }
  0xad   :  { %4697 = dma.done.wait [#allocation6], 65664  }
  0xae   :  { %4698 = vsyncadd [#allocation6], 4294901632 }
  0xaf   :  { %4699 = dma.done.wait [#allocation9], 16512  }
  0xb0   :  { %4700 = vsyncadd [#allocation9], 4294950784 }
  0xb1   :  { %4701 = dma.done.wait [#allocation12], 128  }
  0xb2   :  { %4702 = vsyncadd [#allocation12], 4294967168 }
  0xb3   :  { %4703 = dma.done.wait [#allocation15], 2064  }
  0xb4   :  { %4704 = vsyncadd [#allocation15], 4294965232 }
  0xb5   :  { %4705 = dma.done.wait [#allocation18], 16  }
  0xb6   :  { %4706 = vsyncadd [#allocation18], 4294967280  ;;  %v210_v0 = vld [vmem:[#allocation5 + $0x8] sm:$0xff]  ;;  %v212_v1 = vld [vmem:[#allocation5 + $0x18] sm:$0xff]  ;;  %s4726_s9 = smov [#allocation19]  }
  0xb7   :  { %v209_v2 = vld [vmem:[#allocation5] sm:$0xff]  ;;  %v722_v3 = vunpack.c.l.s8.bf16 %v210_v0  ;;  %v730_v4 = vunpack.c.h.s8.bf16 %v210_v0  ;;  %v724_v5 = vunpack.c.l.s8.bf16 %v212_v1  ;;  %v732_v6 = vunpack.c.h.s8.bf16 %v212_v1  ;;  %v211_v7 = vld [vmem:[#allocation5 + $0x10] sm:$0xff]  ;;  %v218_v10 = vld [vmem:[#allocation5 + $0x48] sm:$0xff]  ;;  %s4224_s15 = sshll.u32 %s4726_s9, 4  ;;  %s4225_s15 = int_to_ptr.vmem [resolvable:$true] %s4224_s15 }
  0xb8   :  { %v721_v8 = vunpack.c.l.s8.bf16 %v209_v2  ;;  %v723_v9 = vunpack.c.l.s8.bf16 %v211_v7  ;;  %v220_v11 = vld [vmem:[#allocation5 + $0x58] sm:$0xff]  ;;  %v729_v12 = vunpack.c.h.s8.bf16 %v209_v2  ;;  %v731_v13 = vunpack.c.h.s8.bf16 %v211_v7  ;;  %v217_v16 = vld [vmem:[#allocation5 + $0x40] sm:$0xff]  ;;  %v219_v17 = vld [vmem:[#allocation5 + $0x50] sm:$0xff]  ;;  %s4673_s4 = scalar_lea.vmem %s4225_s15, 128  ;;  %p4678_p11 = scmp.lt.s32.totalorder %s4225_s15, %s4225_s15 }
  0xb9   :  { %1745 = vmatprep.subr.bf16.mxu0 %v722_v3  ;;  %2089 = vmatprep.subr.bf16.mxu1 %v724_v5  ;;  %v738_v14 = vunpack.c.l.s8.bf16 %v218_v10  ;;  %v740_v15 = vunpack.c.l.s8.bf16 %v220_v11  ;;  %v737_v18 = vunpack.c.l.s8.bf16 %v217_v16  ;;  %v739_v19 = vunpack.c.l.s8.bf16 %v219_v17  ;;  %v226_v22 = vld [vmem:[#allocation5 + $0x88] sm:$0xff]  ;;  %v228_v23 = vld [vmem:[#allocation5 + $0x98] sm:$0xff]  ;;  %v225_v28 = vld [vmem:[#allocation5 + $0x80] sm:$0xff]  ;;  %p4674_p10 = scmp.ne.s32.totalorder %s4225_s15, %s4673_s4  ;;  %p4679_p12 = scmp.lt.s32.totalorder %s4673_s4, %s4673_s4 }
  0xba   :  { %1746 = vmatpush1.bf16.msra.mxu0 %v721_v8  ;;  %2090 = vmatpush1.bf16.msra.mxu1 %v723_v9  ;;  %v746_v20 = vunpack.c.h.s8.bf16 %v218_v10  ;;  %v748_v21 = vunpack.c.h.s8.bf16 %v220_v11  ;;  %v745_v24 = vunpack.c.h.s8.bf16 %v217_v16  ;;  %v747_v25 = vunpack.c.h.s8.bf16 %v219_v17  ;;  %v227_v29 = vld [vmem:[#allocation5 + $0x90] sm:$0xff]  ;;  %v162_v30 = vld [vmem:[#allocation2 + $0x8] sm:$0xff]  ;;  %v236_v38 = vld [vmem:[#allocation5 + $0xd8] sm:$0xff] }
  0xbb   :  { %1747 = vmatprep.subr.bf16.mxu0 %v730_v4  ;;  %2091 = vmatprep.subr.bf16.mxu1 %v732_v6  ;;  %v754_v26 = vunpack.c.l.s8.bf16 %v226_v22  ;;  %v756_v27 = vunpack.c.l.s8.bf16 %v228_v23  ;;  %v178_v31 = vld [vmem:[#allocation2 + $0x88] sm:$0xff]  ;;  %v753_v32 = vunpack.c.l.s8.bf16 %v225_v28  ;;  %v755_v33 = vunpack.c.l.s8.bf16 %v227_v29  ;;  %v233_v43 = vld [vmem:[#allocation5 + $0xc0] sm:$0xff]  ;;  %v235_v44 = vld [vmem:[#allocation5 + $0xd0] sm:$0xff]  ;;  %p4680_p13 = por %p4679_p12, %p4678_p11 }
  0xbc   :  { %v762_v34 = vunpack.c.h.s8.bf16 %v226_v22  ;;  %v764_v35 = vunpack.c.h.s8.bf16 %v228_v23  ;;  %v4911_v36 = vpack.c.bf16 %v178_v31, %v162_v30  ;;  %v234_v37 = vld [vmem:[#allocation5 + $0xc8] sm:$0xff]  ;;  %v761_v39 = vunpack.c.h.s8.bf16 %v225_v28  ;;  %v244_v50 = vld [vmem:[#allocation5 + $0x118] sm:$0xff]  ;;  %v241_v55 = vld [vmem:[#allocation5 + $0x100] sm:$0xff] }
  0xbd   :  { %v763_v40 = vunpack.c.h.s8.bf16 %v227_v29  ;;  %v770_v41 = vunpack.c.l.s8.bf16 %v234_v37  ;;  %v772_v42 = vunpack.c.l.s8.bf16 %v236_v38  ;;  %v769_v45 = vunpack.c.l.s8.bf16 %v233_v43  ;;  %v242_v49 = vld [vmem:[#allocation5 + $0x108] sm:$0xff]  ;;  %v243_v56 = vld [vmem:[#allocation5 + $0x110] sm:$0xff]  ;;  %v252_v62 = vld [vmem:[#allocation5 + $0x158] sm:$0xff]  ;;  %p4681_p0 = pnand %p4680_p13, %p4674_p10 }
  0xbe   :  { %1748 = vmatpush1.bf16.msra.mxu0 %v729_v12  ;;  %2092 = vmatpush1.bf16.msra.mxu1 %v731_v13  ;;  %v771_v46 = vunpack.c.l.s8.bf16 %v235_v44  ;;  %v778_v47 = vunpack.c.h.s8.bf16 %v234_v37  ;;  %v780_v48 = vunpack.c.h.s8.bf16 %v236_v38  ;;  %v777_v51 = vunpack.c.h.s8.bf16 %v233_v43  ;;  %v250_v61 = vld [vmem:[#allocation5 + $0x148] sm:$0xff]  ;;  %v249_v3 = vld [vmem:[#allocation5 + $0x140] sm:$0xff]  ;;  %v251_v4 = vld [vmem:[#allocation5 + $0x150] sm:$0xff] }
  0xbf   :  { %1749 = vmatprep.subr.bf16.mxu0 %v738_v14  ;;  %2093 = vmatprep.subr.bf16.mxu1 %v740_v15  ;;  %v779_v52 = vunpack.c.h.s8.bf16 %v235_v44  ;;  %v786_v53 = vunpack.c.l.s8.bf16 %v242_v49  ;;  %v788_v54 = vunpack.c.l.s8.bf16 %v244_v50  ;;  %v785_v57 = vunpack.c.l.s8.bf16 %v241_v55  ;;  %v258_v9 = vld [vmem:[#allocation5 + $0x188] sm:$0xff]  ;;  %v260_v10 = vld [vmem:[#allocation5 + $0x198] sm:$0xff]  ;;  %v257_v15 = vld [vmem:[#allocation5 + $0x180] sm:$0xff] }
  0xc0   :  { %1777 = vmatprep.mubr.bf16.mxu0 %v4911_v36  ;;  %2121 = vmatprep.mubr.bf16.mxu1 %v4911_v36  ;;  %v787_v58 = vunpack.c.l.s8.bf16 %v243_v56  ;;  %v794_v59 = vunpack.c.h.s8.bf16 %v242_v49  ;;  %v796_v60 = vunpack.c.h.s8.bf16 %v244_v50  ;;  %v793_v63 = vunpack.c.h.s8.bf16 %v241_v55  ;;  %v259_v16 = vld [vmem:[#allocation5 + $0x190] sm:$0xff]  ;;  %v268_v22 = vld [vmem:[#allocation5 + $0x1d8] sm:$0xff]  ;;  %v161_v38 = vld [vmem:[#allocation2] sm:$0xff] }
  0xc1   :  { %v795_v0 = vunpack.c.h.s8.bf16 %v243_v56  ;;  %v802_v1 = vunpack.c.l.s8.bf16 %v250_v61  ;;  %v804_v2 = vunpack.c.l.s8.bf16 %v252_v62  ;;  %v801_v5 = vunpack.c.l.s8.bf16 %v249_v3  ;;  %v267_v28 = vld [vmem:[#allocation5 + $0x1d0] sm:$0xff] }
  0xc2   :  { %1750 = vmatpush1.bf16.msra.mxu0 %v737_v18  ;;  %2094 = vmatpush1.bf16.msra.mxu1 %v739_v19  ;;  %v803_v6 = vunpack.c.l.s8.bf16 %v251_v4  ;;  %v810_v7 = vunpack.c.h.s8.bf16 %v250_v61  ;;  %v812_v8 = vunpack.c.h.s8.bf16 %v252_v62  ;;  %v809_v11 = vunpack.c.h.s8.bf16 %v249_v3  ;;  %v275_v43 = vld [vmem:[#allocation5 + $0x210] sm:$0xff] }
  0xc3   :  { %1751 = vmatprep.subr.bf16.mxu0 %v746_v20  ;;  %2095 = vmatprep.subr.bf16.mxu1 %v748_v21  ;;  %v811_v12 = vunpack.c.h.s8.bf16 %v251_v4  ;;  %v818_v13 = vunpack.c.l.s8.bf16 %v258_v9  ;;  %v820_v14 = vunpack.c.l.s8.bf16 %v260_v10  ;;  %v817_v17 = vunpack.c.l.s8.bf16 %v257_v15  ;;  %v266_v21 = vld [vmem:[#allocation5 + $0x1c8] sm:$0xff] }
  0xc4   :  { %v819_v18 = vunpack.c.l.s8.bf16 %v259_v16  ;;  %v826_v19 = vunpack.c.h.s8.bf16 %v258_v9  ;;  %v828_v20 = vunpack.c.h.s8.bf16 %v260_v10  ;;  %v825_v23 = vunpack.c.h.s8.bf16 %v257_v15 }
  0xc5   :  { %v835_v30 = vunpack.c.l.s8.bf16 %v267_v28  ;;  %v842_v31 = vunpack.c.h.s8.bf16 %v266_v21  ;;  %v843_v37 = vunpack.c.h.s8.bf16 %v267_v28  ;;  %v859_v55 = vunpack.c.h.s8.bf16 %v275_v43 }
  0xc6   :  { %1752 = vmatpush1.bf16.msra.mxu0 %v745_v24  ;;  %2096 = vmatpush1.bf16.msra.mxu1 %v747_v25  ;;  %v827_v24 = vunpack.c.h.s8.bf16 %v259_v16  ;;  %v834_v25 = vunpack.c.l.s8.bf16 %v266_v21 }
  0xc7   :  { %1753 = vmatprep.subr.bf16.mxu0 %v754_v26  ;;  %2097 = vmatprep.subr.bf16.mxu1 %v756_v27  ;;  %v836_v26 = vunpack.c.l.s8.bf16 %v268_v22  ;;  %v265_v27 = vld [vmem:[#allocation5 + $0x1c0] sm:$0xff] }
  0xc8   :  { %v833_v29 = vunpack.c.l.s8.bf16 %v265_v27 }
  0xca   :  { %1754 = vmatpush1.bf16.msra.mxu0 %v753_v32  ;;  %2098 = vmatpush1.bf16.msra.mxu1 %v755_v33  ;;  %v844_v32 = vunpack.c.h.s8.bf16 %v268_v22  ;;  %v274_v33 = vld [vmem:[#allocation5 + $0x208] sm:$0xff] }
  0xcb   :  { %1755 = vmatprep.subr.bf16.mxu0 %v762_v34  ;;  %2099 = vmatprep.subr.bf16.mxu1 %v764_v35  ;;  %v276_v34 = vld [vmem:[#allocation5 + $0x218] sm:$0xff]  ;;  %v841_v35 = vunpack.c.h.s8.bf16 %v265_v27  ;;  %v858_v49 = vunpack.c.h.s8.bf16 %v274_v33 }
  0xcc   :  { %v860_v50 = vunpack.c.h.s8.bf16 %v276_v34 }
  0xce   :  { %1756 = vmatpush1.bf16.msra.mxu0 %v761_v39  ;;  %2100 = vmatpush1.bf16.msra.mxu1 %v763_v40  ;;  %v177_v39 = vld [vmem:[#allocation2 + $0x80] sm:$0xff]  ;;  %v850_v40 = vunpack.c.l.s8.bf16 %v274_v33 }
  0xcf   :  { %1757 = vmatprep.subr.bf16.mxu0 %v770_v41  ;;  %2101 = vmatprep.subr.bf16.mxu1 %v772_v42  ;;  %v852_v41 = vunpack.c.l.s8.bf16 %v276_v34  ;;  %v273_v42 = vld [vmem:[#allocation5 + $0x200] sm:$0xff]  ;;  %v4915_v44 = vpack.c.bf16 %v177_v39, %v161_v38  ;;  %v316_v38 = vld [vmem:[#allocation5 + $0x358] sm:$0xff] }
  0xd2   :  { %1758 = vmatpush1.bf16.msra.mxu0 %v769_v45  ;;  %2102 = vmatpush1.bf16.msra.mxu1 %v771_v46  ;;  %v164_v45 = vld [vmem:[#allocation2 + $0x18] sm:$0xff] }
  0xd3   :  { %1759 = vmatprep.subr.bf16.mxu0 %v778_v47  ;;  %2103 = vmatprep.subr.bf16.mxu1 %v780_v48  ;;  %v180_v46 = vld [vmem:[#allocation2 + $0x98] sm:$0xff]  ;;  %v849_v47 = vunpack.c.l.s8.bf16 %v273_v42  ;;  %v851_v48 = vunpack.c.l.s8.bf16 %v275_v43  ;;  %v313_v43 = vld [vmem:[#allocation5 + $0x340] sm:$0xff] }
  0xd6   :  { %1760 = vmatpush1.bf16.msra.mxu0 %v777_v51  ;;  %2104 = vmatpush1.bf16.msra.mxu1 %v779_v52  ;;  %v282_v51 = vld [vmem:[#allocation5 + $0x248] sm:$0xff]  ;;  %v284_v52 = vld [vmem:[#allocation5 + $0x258] sm:$0xff] }
  0xd7   :  { %1761 = vmatprep.subr.bf16.mxu0 %v786_v53  ;;  %2105 = vmatprep.subr.bf16.mxu1 %v788_v54  ;;  %v4917_v53 = vpack.c.bf16 %v180_v46, %v164_v45  ;;  %v857_v54 = vunpack.c.h.s8.bf16 %v273_v42  ;;  %v866_v56 = vunpack.c.l.s8.bf16 %v282_v51  ;;  %v874_v62 = vunpack.c.h.s8.bf16 %v282_v51  ;;  %v315_v45 = vld [vmem:[#allocation5 + $0x350] sm:$0xff]  ;;  %v324_v51 = vld [vmem:[#allocation5 + $0x398] sm:$0xff] }
  0xd8   :  { %v932_v42 = vunpack.c.l.s8.bf16 %v316_v38  ;;  %v929_v46 = vunpack.c.l.s8.bf16 %v313_v43 }
  0xda   :  { %1762 = vmatpush1.bf16.msra.mxu0 %v785_v57  ;;  %2106 = vmatpush1.bf16.msra.mxu1 %v787_v58  ;;  %v868_v57 = vunpack.c.l.s8.bf16 %v284_v52  ;;  %v281_v58 = vld [vmem:[#allocation5 + $0x240] sm:$0xff] }
  0xdb   :  { %1763 = vmatprep.subr.bf16.mxu0 %v794_v59  ;;  %2107 = vmatprep.subr.bf16.mxu1 %v796_v60  ;;  %v283_v59 = vld [vmem:[#allocation5 + $0x250] sm:$0xff]  ;;  %v865_v60 = vunpack.c.l.s8.bf16 %v281_v58 }
  0xdc   :  { %v867_v61 = vunpack.c.l.s8.bf16 %v283_v59  ;;  %v875_v3 = vunpack.c.h.s8.bf16 %v283_v59 }
  0xde   :  { %1764 = vmatpush1.bf16.msra.mxu0 %v793_v63  ;;  %2108 = vmatpush1.bf16.msra.mxu1 %v795_v0  ;;  %v876_v63 = vunpack.c.h.s8.bf16 %v284_v52  ;;  %v290_v0 = vld [vmem:[#allocation5 + $0x288] sm:$0xff]  ;;  %v937_v52 = vunpack.c.h.s8.bf16 %v313_v43  ;;  %v356_v43 = vld [vmem:[#allocation5 + $0x498] sm:$0xff] }
  0xdf   :  { %1765 = vmatprep.subr.bf16.mxu0 %v802_v1  ;;  %2109 = vmatprep.subr.bf16.mxu1 %v804_v2  ;;  %v292_v1 = vld [vmem:[#allocation5 + $0x298] sm:$0xff]  ;;  %v873_v2 = vunpack.c.h.s8.bf16 %v281_v58  ;;  %v882_v4 = vunpack.c.l.s8.bf16 %v290_v0  ;;  %v890_v10 = vunpack.c.h.s8.bf16 %v290_v0  ;;  %v323_v58 = vld [vmem:[#allocation5 + $0x390] sm:$0xff] }
  0xe0   :  { %v332_v0 = vld [vmem:[#allocation5 + $0x3d8] sm:$0xff] }
  0xe2   :  { %1766 = vmatpush1.bf16.msra.mxu0 %v801_v5  ;;  %2110 = vmatpush1.bf16.msra.mxu1 %v803_v6  ;;  %v884_v5 = vunpack.c.l.s8.bf16 %v292_v1  ;;  %v289_v6 = vld [vmem:[#allocation5 + $0x280] sm:$0xff] }
  0xe3   :  { %1767 = vmatprep.subr.bf16.mxu0 %v810_v7  ;;  %2111 = vmatprep.subr.bf16.mxu1 %v812_v8  ;;  %v291_v7 = vld [vmem:[#allocation5 + $0x290] sm:$0xff]  ;;  %v881_v8 = vunpack.c.l.s8.bf16 %v289_v6 }
  0xe4   :  { %v883_v9 = vunpack.c.l.s8.bf16 %v291_v7  ;;  %v891_v15 = vunpack.c.h.s8.bf16 %v291_v7 }
  0xe6   :  { %1768 = vmatpush1.bf16.msra.mxu0 %v809_v11  ;;  %2112 = vmatpush1.bf16.msra.mxu1 %v811_v12  ;;  %v892_v11 = vunpack.c.h.s8.bf16 %v292_v1  ;;  %v298_v12 = vld [vmem:[#allocation5 + $0x2c8] sm:$0xff] }
  0xe7   :  { %1769 = vmatprep.subr.bf16.mxu0 %v818_v13  ;;  %2113 = vmatprep.subr.bf16.mxu1 %v820_v14  ;;  %v300_v13 = vld [vmem:[#allocation5 + $0x2d8] sm:$0xff]  ;;  %v889_v14 = vunpack.c.h.s8.bf16 %v289_v6  ;;  %v898_v16 = vunpack.c.l.s8.bf16 %v298_v12  ;;  %v906_v22 = vunpack.c.h.s8.bf16 %v298_v12  ;;  %v331_v6 = vld [vmem:[#allocation5 + $0x3d0] sm:$0xff] }
  0xe8   :  { %v340_v12 = vld [vmem:[#allocation5 + $0x418] sm:$0xff] }
  0xea   :  { %1770 = vmatpush1.bf16.msra.mxu0 %v817_v17  ;;  %2114 = vmatpush1.bf16.msra.mxu1 %v819_v18  ;;  %v900_v17 = vunpack.c.l.s8.bf16 %v300_v13  ;;  %v297_v18 = vld [vmem:[#allocation5 + $0x2c0] sm:$0xff] }
  0xeb   :  { %1771 = vmatprep.subr.bf16.mxu0 %v826_v19  ;;  %2115 = vmatprep.subr.bf16.mxu1 %v828_v20  ;;  %v299_v19 = vld [vmem:[#allocation5 + $0x2d0] sm:$0xff]  ;;  %v897_v20 = vunpack.c.l.s8.bf16 %v297_v18 }
  0xec   :  { %v899_v21 = vunpack.c.l.s8.bf16 %v299_v19  ;;  %v907_v27 = vunpack.c.h.s8.bf16 %v299_v19  ;;  %v337_v19 = vld [vmem:[#allocation5 + $0x400] sm:$0xff] }
  0xee   :  { %1772 = vmatpush1.bf16.msra.mxu0 %v825_v23  ;;  %2116 = vmatpush1.bf16.msra.mxu1 %v827_v24  ;;  %v908_v23 = vunpack.c.h.s8.bf16 %v300_v13  ;;  %v306_v24 = vld [vmem:[#allocation5 + $0x308] sm:$0xff] }
  0xef   :  { %1773 = vmatprep.subr.bf16.mxu0 %v834_v25  ;;  %2117 = vmatprep.subr.bf16.mxu1 %v836_v26  ;;  %v308_v25 = vld [vmem:[#allocation5 + $0x318] sm:$0xff]  ;;  %v905_v26 = vunpack.c.h.s8.bf16 %v297_v18  ;;  %v914_v28 = vunpack.c.l.s8.bf16 %v306_v24  ;;  %v922_v34 = vunpack.c.h.s8.bf16 %v306_v24  ;;  %v980_v18 = vunpack.c.l.s8.bf16 %v340_v12 }
  0xf0   :  { %v977_v24 = vunpack.c.l.s8.bf16 %v337_v19 }
  0xf2   :  { %1774 = vmatpush1.bf16.msra.mxu0 %v833_v29  ;;  %2118 = vmatpush1.bf16.msra.mxu1 %v835_v30  ;;  %v916_v29 = vunpack.c.l.s8.bf16 %v308_v25  ;;  %v305_v30 = vld [vmem:[#allocation5 + $0x300] sm:$0xff] }
  0xf3   :  { %1775 = vmatprep.subr.bf16.mxu0 %v842_v31  ;;  %2119 = vmatprep.subr.bf16.mxu1 %v844_v32  ;;  %v307_v31 = vld [vmem:[#allocation5 + $0x310] sm:$0xff]  ;;  %v913_v32 = vunpack.c.l.s8.bf16 %v305_v30  ;;  %v921_v39 = vunpack.c.h.s8.bf16 %v305_v30 }
  0xf4   :  { %v915_v33 = vunpack.c.l.s8.bf16 %v307_v31 }
  0xf6   :  { %1776 = vmatpush1.bf16.msra.mxu0 %v841_v35  ;;  %2120 = vmatpush1.bf16.msra.mxu1 %v843_v37  ;;  %v924_v35 = vunpack.c.h.s8.bf16 %v308_v25  ;;  %v314_v37 = vld [vmem:[#allocation5 + $0x348] sm:$0xff] }
  0xf7   :  { %1788 = vmatprep.subr.bf16.mxu0 %v850_v40  ;;  %2132 = vmatprep.subr.bf16.mxu1 %v852_v41  ;;  %v923_v40 = vunpack.c.h.s8.bf16 %v307_v31  ;;  %v930_v41 = vunpack.c.l.s8.bf16 %v314_v37  ;;  %v985_v31 = vunpack.c.h.s8.bf16 %v337_v19 }
  0xf9   :  { %1778 = vmatmul.mubr.bf16.vlgmr.msra.gmra.mrb[0].mxu0 %v4915_v44  ;;  %2122 = vmatmul.mubr.bf16.vlgmr.msra.gmra.mrb[0].mxu1 %v4915_v44 }
  0xfa   :  { %1789 = vmatpush1.bf16.msra.mxu0 %v849_v47  ;;  %2133 = vmatpush1.bf16.msra.mxu1 %v851_v48  ;;  %v931_v47 = vunpack.c.l.s8.bf16 %v315_v45  ;;  %v938_v48 = vunpack.c.h.s8.bf16 %v314_v37  ;;  %v347_v37 = vld [vmem:[#allocation5 + $0x450] sm:$0xff] }
  0xfb   :  { %1790 = vmatprep.subr.bf16.mxu0 %v858_v49  ;;  %2134 = vmatprep.subr.bf16.mxu1 %v860_v50  ;;  %v940_v49 = vunpack.c.h.s8.bf16 %v316_v38  ;;  %v322_v50 = vld [vmem:[#allocation5 + $0x388] sm:$0xff] }
  0xfc   :  { %1820 = vmatprep.mubr.bf16.mxu0 %v4917_v53  ;;  %2164 = vmatprep.mubr.bf16.mxu1 %v4917_v53 }
  0xfe   :  { %1791 = vmatpush1.bf16.msra.mxu0 %v857_v54  ;;  %2135 = vmatpush1.bf16.msra.mxu1 %v859_v55  ;;  %v939_v54 = vunpack.c.h.s8.bf16 %v315_v45  ;;  %v946_v55 = vunpack.c.l.s8.bf16 %v322_v50 }
  0xff   :  { %1792 = vmatprep.subr.bf16.mxu0 %v866_v56  ;;  %2136 = vmatprep.subr.bf16.mxu1 %v868_v57  ;;  %v948_v56 = vunpack.c.l.s8.bf16 %v324_v51  ;;  %v321_v57 = vld [vmem:[#allocation5 + $0x380] sm:$0xff] }
 0x100   :  { %v945_v59 = vunpack.c.l.s8.bf16 %v321_v57  ;;  %v953_v1 = vunpack.c.h.s8.bf16 %v321_v57  ;;  %v364_v57 = vld [vmem:[#allocation5 + $0x4d8] sm:$0xff] }
 0x102   :  { %1793 = vmatpush1.bf16.msra.mxu0 %v865_v60  ;;  %2137 = vmatpush1.bf16.msra.mxu1 %v867_v61  ;;  %v947_v60 = vunpack.c.l.s8.bf16 %v323_v58  ;;  %v954_v61 = vunpack.c.h.s8.bf16 %v322_v50  ;;  %v355_v50 = vld [vmem:[#allocation5 + $0x490] sm:$0xff] }
 0x103   :  { %1794 = vmatprep.subr.bf16.mxu0 %v874_v62  ;;  %2138 = vmatprep.subr.bf16.mxu1 %v876_v63  ;;  %v956_v62 = vunpack.c.h.s8.bf16 %v324_v51  ;;  %v330_v63 = vld [vmem:[#allocation5 + $0x3c8] sm:$0xff] }
 0x106   :  { %1795 = vmatpush1.bf16.msra.mxu0 %v873_v2  ;;  %2139 = vmatpush1.bf16.msra.mxu1 %v875_v3  ;;  %v955_v2 = vunpack.c.h.s8.bf16 %v323_v58  ;;  %v962_v3 = vunpack.c.l.s8.bf16 %v330_v63 }
 0x107   :  { %1796 = vmatprep.subr.bf16.mxu0 %v882_v4  ;;  %2140 = vmatprep.subr.bf16.mxu1 %v884_v5  ;;  %v964_v4 = vunpack.c.l.s8.bf16 %v332_v0  ;;  %v329_v5 = vld [vmem:[#allocation5 + $0x3c0] sm:$0xff] }
 0x108   :  { %v961_v7 = vunpack.c.l.s8.bf16 %v329_v5  ;;  %v969_v13 = vunpack.c.h.s8.bf16 %v329_v5  ;;  %v372_v5 = vld [vmem:[#allocation5 + $0x518] sm:$0xff] }
 0x10a   :  { %1797 = vmatpush1.bf16.msra.mxu0 %v881_v8  ;;  %2141 = vmatpush1.bf16.msra.mxu1 %v883_v9  ;;  %v963_v8 = vunpack.c.l.s8.bf16 %v331_v6  ;;  %v970_v9 = vunpack.c.h.s8.bf16 %v330_v63  ;;  %v363_v63 = vld [vmem:[#allocation5 + $0x4d0] sm:$0xff] }
 0x10b   :  { %1798 = vmatprep.subr.bf16.mxu0 %v890_v10  ;;  %2142 = vmatprep.subr.bf16.mxu1 %v892_v11  ;;  %v972_v10 = vunpack.c.h.s8.bf16 %v332_v0  ;;  %v338_v11 = vld [vmem:[#allocation5 + $0x408] sm:$0xff] }
 0x10e   :  { %1799 = vmatpush1.bf16.msra.mxu0 %v889_v14  ;;  %2143 = vmatpush1.bf16.msra.mxu1 %v891_v15  ;;  %v971_v14 = vunpack.c.h.s8.bf16 %v331_v6  ;;  %v163_v15 = vld [vmem:[#allocation2 + $0x10] sm:$0xff] }
 0x10f   :  { %1800 = vmatprep.subr.bf16.mxu0 %v898_v16  ;;  %2144 = vmatprep.subr.bf16.mxu1 %v900_v17  ;;  %v179_v16 = vld [vmem:[#allocation2 + $0x90] sm:$0xff]  ;;  %v978_v17 = vunpack.c.l.s8.bf16 %v338_v11 }
 0x112   :  { %1801 = vmatpush1.bf16.msra.mxu0 %v897_v20  ;;  %2145 = vmatpush1.bf16.msra.mxu1 %v899_v21  ;;  %v339_v20 = vld [vmem:[#allocation5 + $0x410] sm:$0xff]  ;;  %v4923_v21 = vpack.c.bf16 %v179_v16, %v163_v15  ;;  %v1052_v15 = vunpack.c.h.s8.bf16 %v372_v5  ;;  %v378_v16 = vld [vmem:[#allocation5 + $0x548] sm:$0xff] }
 0x113   :  { %1802 = vmatprep.subr.bf16.mxu0 %v906_v22  ;;  %2146 = vmatprep.subr.bf16.mxu1 %v908_v23  ;;  %v166_v22 = vld [vmem:[#allocation2 + $0x28] sm:$0xff]  ;;  %v979_v25 = vunpack.c.l.s8.bf16 %v339_v20 }
 0x114   :  { %v182_v23 = vld [vmem:[#allocation2 + $0xa8] sm:$0xff] }
 0x115   :  { %v4925_v30 = vpack.c.bf16 %v182_v23, %v166_v22  ;;  %v377_v23 = vld [vmem:[#allocation5 + $0x540] sm:$0xff] }
 0x116   :  { %1803 = vmatpush1.bf16.msra.mxu0 %v905_v26  ;;  %2147 = vmatpush1.bf16.msra.mxu1 %v907_v27  ;;  %v986_v26 = vunpack.c.h.s8.bf16 %v338_v11  ;;  %v988_v27 = vunpack.c.h.s8.bf16 %v340_v12  ;;  %v371_v11 = vld [vmem:[#allocation5 + $0x510] sm:$0xff] }
 0x117   :  { %1804 = vmatprep.subr.bf16.mxu0 %v914_v28  ;;  %2148 = vmatprep.subr.bf16.mxu1 %v916_v29  ;;  %v346_v28 = vld [vmem:[#allocation5 + $0x448] sm:$0xff]  ;;  %v348_v29 = vld [vmem:[#allocation5 + $0x458] sm:$0xff]  ;;  %v1051_v19 = vunpack.c.h.s8.bf16 %v371_v11 }
 0x11a   :  { %1805 = vmatpush1.bf16.msra.mxu0 %v913_v32  ;;  %2149 = vmatpush1.bf16.msra.mxu1 %v915_v33  ;;  %v987_v32 = vunpack.c.h.s8.bf16 %v339_v20  ;;  %v994_v33 = vunpack.c.l.s8.bf16 %v346_v28  ;;  %v1058_v20 = vunpack.c.l.s8.bf16 %v378_v16 }
 0x11b   :  { %1806 = vmatprep.subr.bf16.mxu0 %v922_v34  ;;  %2150 = vmatprep.subr.bf16.mxu1 %v924_v35  ;;  %v996_v34 = vunpack.c.l.s8.bf16 %v348_v29  ;;  %v345_v35 = vld [vmem:[#allocation5 + $0x440] sm:$0xff] }
 0x11c   :  { %v993_v38 = vunpack.c.l.s8.bf16 %v345_v35  ;;  %v1001_v45 = vunpack.c.h.s8.bf16 %v345_v35 }
 0x11e   :  { %1807 = vmatpush1.bf16.msra.mxu0 %v921_v39  ;;  %2151 = vmatpush1.bf16.msra.mxu1 %v923_v40  ;;  %v995_v39 = vunpack.c.l.s8.bf16 %v347_v37  ;;  %v1002_v40 = vunpack.c.h.s8.bf16 %v346_v28 }
 0x11f   :  { %1808 = vmatprep.subr.bf16.mxu0 %v930_v41  ;;  %2152 = vmatprep.subr.bf16.mxu1 %v932_v42  ;;  %v1004_v41 = vunpack.c.h.s8.bf16 %v348_v29  ;;  %v354_v42 = vld [vmem:[#allocation5 + $0x488] sm:$0xff] }
 0x120   :  { %v386_v29 = vld [vmem:[#allocation5 + $0x588] sm:$0xff] }
 0x122   :  { %1809 = vmatpush1.bf16.msra.mxu0 %v929_v46  ;;  %2153 = vmatpush1.bf16.msra.mxu1 %v931_v47  ;;  %v1003_v46 = vunpack.c.h.s8.bf16 %v347_v37  ;;  %v1010_v47 = vunpack.c.l.s8.bf16 %v354_v42  ;;  %v385_v37 = vld [vmem:[#allocation5 + $0x580] sm:$0xff] }
 0x123   :  { %1810 = vmatprep.subr.bf16.mxu0 %v938_v48  ;;  %2154 = vmatprep.subr.bf16.mxu1 %v940_v49  ;;  %v1012_v48 = vunpack.c.l.s8.bf16 %v356_v43  ;;  %v353_v49 = vld [vmem:[#allocation5 + $0x480] sm:$0xff] }
 0x124   :  { %v1009_v51 = vunpack.c.l.s8.bf16 %v353_v49  ;;  %v1017_v58 = vunpack.c.h.s8.bf16 %v353_v49 }
 0x126   :  { %1811 = vmatpush1.bf16.msra.mxu0 %v937_v52  ;;  %2155 = vmatpush1.bf16.msra.mxu1 %v939_v54  ;;  %v1011_v52 = vunpack.c.l.s8.bf16 %v355_v50  ;;  %v1018_v54 = vunpack.c.h.s8.bf16 %v354_v42 }
 0x127   :  { %1812 = vmatprep.subr.bf16.mxu0 %v946_v55  ;;  %2156 = vmatprep.subr.bf16.mxu1 %v948_v56  ;;  %v1020_v55 = vunpack.c.h.s8.bf16 %v356_v43  ;;  %v362_v56 = vld [vmem:[#allocation5 + $0x4c8] sm:$0xff] }
 0x128   :  { %v394_v43 = vld [vmem:[#allocation5 + $0x5c8] sm:$0xff] }
 0x12a   :  { %1813 = vmatpush1.bf16.msra.mxu0 %v945_v59  ;;  %2157 = vmatpush1.bf16.msra.mxu1 %v947_v60  ;;  %v1019_v59 = vunpack.c.h.s8.bf16 %v355_v50  ;;  %v1026_v60 = vunpack.c.l.s8.bf16 %v362_v56  ;;  %v393_v50 = vld [vmem:[#allocation5 + $0x5c0] sm:$0xff] }
 0x12b   :  { %1814 = vmatprep.subr.bf16.mxu0 %v954_v61  ;;  %2158 = vmatprep.subr.bf16.mxu1 %v956_v62  ;;  %v1028_v61 = vunpack.c.l.s8.bf16 %v364_v57  ;;  %v361_v62 = vld [vmem:[#allocation5 + $0x4c0] sm:$0xff] }
 0x12c   :  { %v1025_v0 = vunpack.c.l.s8.bf16 %v361_v62  ;;  %v1033_v6 = vunpack.c.h.s8.bf16 %v361_v62  ;;  %v181_v62 = vld [vmem:[#allocation2 + $0xa0] sm:$0xff] }
 0x12e   :  { %1815 = vmatpush1.bf16.msra.mxu0 %v953_v1  ;;  %2159 = vmatpush1.bf16.msra.mxu1 %v955_v2  ;;  %v1027_v1 = vunpack.c.l.s8.bf16 %v363_v63  ;;  %v1034_v2 = vunpack.c.h.s8.bf16 %v362_v56 }
 0x12f   :  { %1816 = vmatprep.subr.bf16.mxu0 %v962_v3  ;;  %2160 = vmatprep.subr.bf16.mxu1 %v964_v4  ;;  %v1036_v3 = vunpack.c.h.s8.bf16 %v364_v57  ;;  %v370_v4 = vld [vmem:[#allocation5 + $0x508] sm:$0xff] }
 0x130   :  { %v402_v57 = vld [vmem:[#allocation5 + $0x608] sm:$0xff] }
 0x132   :  { %1817 = vmatpush1.bf16.msra.mxu0 %v961_v7  ;;  %2161 = vmatpush1.bf16.msra.mxu1 %v963_v8  ;;  %v1035_v7 = vunpack.c.h.s8.bf16 %v363_v63  ;;  %v1042_v8 = vunpack.c.l.s8.bf16 %v370_v4  ;;  %v1106_v63 = vunpack.c.l.s8.bf16 %v402_v57 }
 0x133   :  { %1818 = vmatprep.subr.bf16.mxu0 %v970_v9  ;;  %2162 = vmatprep.subr.bf16.mxu1 %v972_v10  ;;  %v1044_v9 = vunpack.c.l.s8.bf16 %v372_v5  ;;  %v369_v10 = vld [vmem:[#allocation5 + $0x500] sm:$0xff]  ;;  %v184_v5 = vld [vmem:[#allocation2 + $0xb8] sm:$0xff] }
 0x134   :  { %v1041_v12 = vunpack.c.l.s8.bf16 %v369_v10 }
 0x136   :  { %1819 = vmatpush1.bf16.msra.mxu0 %v969_v13  ;;  %2163 = vmatpush1.bf16.msra.mxu1 %v971_v14  ;;  %v1043_v13 = vunpack.c.l.s8.bf16 %v371_v11  ;;  %v1050_v14 = vunpack.c.h.s8.bf16 %v370_v4  ;;  %v168_v4 = vld [vmem:[#allocation2 + $0x38] sm:$0xff] }
 0x137   :  { %1831 = vmatprep.subr.bf16.mxu0 %v978_v17  ;;  %2175 = vmatprep.subr.bf16.mxu1 %v980_v18  ;;  %v380_v17 = vld [vmem:[#allocation5 + $0x558] sm:$0xff]  ;;  %v1049_v18 = vunpack.c.h.s8.bf16 %v369_v10  ;;  %v410_v10 = vld [vmem:[#allocation5 + $0x648] sm:$0xff] }
 0x138   :  { %v1060_v22 = vunpack.c.l.s8.bf16 %v380_v17  ;;  %v1068_v28 = vunpack.c.h.s8.bf16 %v380_v17  ;;  %v412_v11 = vld [vmem:[#allocation5 + $0x658] sm:$0xff]  ;;  %v409_v17 = vld [vmem:[#allocation5 + $0x640] sm:$0xff] }
 0x139   :  { %1821 = vmatmul.mubr.bf16.vlgmr.msra.gmra.mrb[0].mxu0 %v4923_v21  ;;  %2165 = vmatmul.mubr.bf16.vlgmr.msra.gmra.mrb[0].mxu1 %v4923_v21 }
 0x13a   :  { %1832 = vmatpush1.bf16.msra.mxu0 %v977_v24  ;;  %2176 = vmatpush1.bf16.msra.mxu1 %v979_v25  ;;  %v379_v24 = vld [vmem:[#allocation5 + $0x550] sm:$0xff]  ;;  %v1057_v25 = vunpack.c.l.s8.bf16 %v377_v23 }
 0x13b   :  { %1833 = vmatprep.subr.bf16.mxu0 %v986_v26  ;;  %2177 = vmatprep.subr.bf16.mxu1 %v988_v27  ;;  %v1059_v26 = vunpack.c.l.s8.bf16 %v379_v24  ;;  %v1066_v27 = vunpack.c.h.s8.bf16 %v378_v16  ;;  %v1124_v16 = vunpack.c.l.s8.bf16 %v412_v11 }
 0x13c   :  { %1863 = vmatprep.mubr.bf16.mxu0 %v4925_v30  ;;  %2207 = vmatprep.mubr.bf16.mxu1 %v4925_v30 }
 0x13e   :  { %1834 = vmatpush1.bf16.msra.mxu0 %v985_v31  ;;  %2178 = vmatpush1.bf16.msra.mxu1 %v987_v32  ;;  %v388_v31 = vld [vmem:[#allocation5 + $0x598] sm:$0xff]  ;;  %v1065_v32 = vunpack.c.h.s8.bf16 %v377_v23  ;;  %v1132_v23 = vunpack.c.h.s8.bf16 %v412_v11 }
 0x13f   :  { %1835 = vmatprep.subr.bf16.mxu0 %v994_v33  ;;  %2179 = vmatprep.subr.bf16.mxu1 %v996_v34  ;;  %v1067_v33 = vunpack.c.h.s8.bf16 %v379_v24  ;;  %v1074_v34 = vunpack.c.l.s8.bf16 %v386_v29  ;;  %v1076_v35 = vunpack.c.l.s8.bf16 %v388_v31  ;;  %v1084_v42 = vunpack.c.h.s8.bf16 %v388_v31  ;;  %v418_v24 = vld [vmem:[#allocation5 + $0x688] sm:$0xff]  ;;  %v417_v31 = vld [vmem:[#allocation5 + $0x680] sm:$0xff] }
 0x142   :  { %1836 = vmatpush1.bf16.msra.mxu0 %v993_v38  ;;  %2180 = vmatpush1.bf16.msra.mxu1 %v995_v39  ;;  %v387_v38 = vld [vmem:[#allocation5 + $0x590] sm:$0xff]  ;;  %v1073_v39 = vunpack.c.l.s8.bf16 %v385_v37 }
 0x143   :  { %1837 = vmatprep.subr.bf16.mxu0 %v1002_v40  ;;  %2181 = vmatprep.subr.bf16.mxu1 %v1004_v41  ;;  %v1075_v40 = vunpack.c.l.s8.bf16 %v387_v38  ;;  %v1082_v41 = vunpack.c.h.s8.bf16 %v386_v29 }
 0x146   :  { %1838 = vmatpush1.bf16.msra.mxu0 %v1001_v45  ;;  %2182 = vmatpush1.bf16.msra.mxu1 %v1003_v46  ;;  %v396_v45 = vld [vmem:[#allocation5 + $0x5d8] sm:$0xff]  ;;  %v1081_v46 = vunpack.c.h.s8.bf16 %v385_v37 }
 0x147   :  { %1839 = vmatprep.subr.bf16.mxu0 %v1010_v47  ;;  %2183 = vmatprep.subr.bf16.mxu1 %v1012_v48  ;;  %v1083_v47 = vunpack.c.h.s8.bf16 %v387_v38  ;;  %v1090_v48 = vunpack.c.l.s8.bf16 %v394_v43  ;;  %v1092_v49 = vunpack.c.l.s8.bf16 %v396_v45  ;;  %v1100_v56 = vunpack.c.h.s8.bf16 %v396_v45  ;;  %v426_v38 = vld [vmem:[#allocation5 + $0x6c8] sm:$0xff]  ;;  %v425_v45 = vld [vmem:[#allocation5 + $0x6c0] sm:$0xff] }
 0x14a   :  { %1840 = vmatpush1.bf16.msra.mxu0 %v1009_v51  ;;  %2184 = vmatpush1.bf16.msra.mxu1 %v1011_v52  ;;  %v395_v51 = vld [vmem:[#allocation5 + $0x5d0] sm:$0xff]  ;;  %v1089_v52 = vunpack.c.l.s8.bf16 %v393_v50 }
 0x14b   :  { %1841 = vmatprep.subr.bf16.mxu0 %v1018_v54  ;;  %2185 = vmatprep.subr.bf16.mxu1 %v1020_v55  ;;  %v1091_v54 = vunpack.c.l.s8.bf16 %v395_v51  ;;  %v1098_v55 = vunpack.c.h.s8.bf16 %v394_v43 }
 0x14e   :  { %1842 = vmatpush1.bf16.msra.mxu0 %v1017_v58  ;;  %2186 = vmatpush1.bf16.msra.mxu1 %v1019_v59  ;;  %v404_v58 = vld [vmem:[#allocation5 + $0x618] sm:$0xff]  ;;  %v1097_v59 = vunpack.c.h.s8.bf16 %v393_v50 }
 0x14f   :  { %1843 = vmatprep.subr.bf16.mxu0 %v1026_v60  ;;  %2187 = vmatprep.subr.bf16.mxu1 %v1028_v61  ;;  %v1099_v60 = vunpack.c.h.s8.bf16 %v395_v51  ;;  %v165_v61 = vld [vmem:[#allocation2 + $0x20] sm:$0xff]  ;;  %v434_v51 = vld [vmem:[#allocation5 + $0x708] sm:$0xff] }
 0x152   :  { %1844 = vmatpush1.bf16.msra.mxu0 %v1025_v0  ;;  %2188 = vmatpush1.bf16.msra.mxu1 %v1027_v1  ;;  %v1108_v0 = vunpack.c.l.s8.bf16 %v404_v58  ;;  %v401_v1 = vld [vmem:[#allocation5 + $0x600] sm:$0xff] }
 0x153   :  { %1845 = vmatprep.subr.bf16.mxu0 %v1034_v2  ;;  %2189 = vmatprep.subr.bf16.mxu1 %v1036_v3  ;;  %v403_v2 = vld [vmem:[#allocation5 + $0x610] sm:$0xff]  ;;  %v4931_v3 = vpack.c.bf16 %v181_v62, %v165_v61  ;;  %v1178_v62 = vunpack.c.h.s8.bf16 %v434_v51 }
 0x156   :  { %1846 = vmatpush1.bf16.msra.mxu0 %v1033_v6  ;;  %2190 = vmatpush1.bf16.msra.mxu1 %v1035_v7  ;;  %v1105_v6 = vunpack.c.l.s8.bf16 %v401_v1  ;;  %v1107_v7 = vunpack.c.l.s8.bf16 %v403_v2 }
 0x157   :  { %1847 = vmatprep.subr.bf16.mxu0 %v1042_v8  ;;  %2191 = vmatprep.subr.bf16.mxu1 %v1044_v9  ;;  %v1114_v8 = vunpack.c.h.s8.bf16 %v402_v57  ;;  %v1116_v9 = vunpack.c.h.s8.bf16 %v404_v58  ;;  %v433_v58 = vld [vmem:[#allocation5 + $0x700] sm:$0xff] }
 0x15a   :  { %1848 = vmatpush1.bf16.msra.mxu0 %v1041_v12  ;;  %2192 = vmatpush1.bf16.msra.mxu1 %v1043_v13  ;;  %v4933_v12 = vpack.c.bf16 %v184_v5, %v168_v4  ;;  %v1113_v13 = vunpack.c.h.s8.bf16 %v401_v1  ;;  %v444_v1 = vld [vmem:[#allocation5 + $0x758] sm:$0xff] }
 0x15b   :  { %1849 = vmatprep.subr.bf16.mxu0 %v1050_v14  ;;  %2193 = vmatprep.subr.bf16.mxu1 %v1052_v15  ;;  %v1115_v14 = vunpack.c.h.s8.bf16 %v403_v2  ;;  %v1122_v15 = vunpack.c.l.s8.bf16 %v410_v10  ;;  %v1177_v2 = vunpack.c.h.s8.bf16 %v433_v58 }
 0x15e   :  { %1850 = vmatpush1.bf16.msra.mxu0 %v1049_v18  ;;  %2194 = vmatpush1.bf16.msra.mxu1 %v1051_v19  ;;  %v411_v18 = vld [vmem:[#allocation5 + $0x650] sm:$0xff]  ;;  %v1121_v19 = vunpack.c.l.s8.bf16 %v409_v17 }
 0x15f   :  { %1851 = vmatprep.subr.bf16.mxu0 %v1058_v20  ;;  %2195 = vmatprep.subr.bf16.mxu1 %v1060_v22  ;;  %v1123_v20 = vunpack.c.l.s8.bf16 %v411_v18  ;;  %v1130_v22 = vunpack.c.h.s8.bf16 %v410_v10 }
 0x162   :  { %1852 = vmatpush1.bf16.msra.mxu0 %v1057_v25  ;;  %2196 = vmatpush1.bf16.msra.mxu1 %v1059_v26  ;;  %v420_v25 = vld [vmem:[#allocation5 + $0x698] sm:$0xff]  ;;  %v1129_v26 = vunpack.c.h.s8.bf16 %v409_v17 }
 0x163   :  { %1853 = vmatprep.subr.bf16.mxu0 %v1066_v27  ;;  %2197 = vmatprep.subr.bf16.mxu1 %v1068_v28  ;;  %v1131_v27 = vunpack.c.h.s8.bf16 %v411_v18  ;;  %v1138_v28 = vunpack.c.l.s8.bf16 %v418_v24  ;;  %v1140_v29 = vunpack.c.l.s8.bf16 %v420_v25  ;;  %v1148_v37 = vunpack.c.h.s8.bf16 %v420_v25 }
 0x166   :  { %1854 = vmatpush1.bf16.msra.mxu0 %v1065_v32  ;;  %2198 = vmatpush1.bf16.msra.mxu1 %v1067_v33  ;;  %v419_v32 = vld [vmem:[#allocation5 + $0x690] sm:$0xff]  ;;  %v1137_v33 = vunpack.c.l.s8.bf16 %v417_v31 }
 0x167   :  { %1855 = vmatprep.subr.bf16.mxu0 %v1074_v34  ;;  %2199 = vmatprep.subr.bf16.mxu1 %v1076_v35  ;;  %v1139_v34 = vunpack.c.l.s8.bf16 %v419_v32  ;;  %v1146_v35 = vunpack.c.h.s8.bf16 %v418_v24 }
 0x16a   :  { %1856 = vmatpush1.bf16.msra.mxu0 %v1073_v39  ;;  %2200 = vmatpush1.bf16.msra.mxu1 %v1075_v40  ;;  %v428_v39 = vld [vmem:[#allocation5 + $0x6d8] sm:$0xff]  ;;  %v1145_v40 = vunpack.c.h.s8.bf16 %v417_v31 }
 0x16b   :  { %1857 = vmatprep.subr.bf16.mxu0 %v1082_v41  ;;  %2201 = vmatprep.subr.bf16.mxu1 %v1084_v42  ;;  %v1147_v41 = vunpack.c.h.s8.bf16 %v419_v32  ;;  %v1154_v42 = vunpack.c.l.s8.bf16 %v426_v38  ;;  %v1156_v43 = vunpack.c.l.s8.bf16 %v428_v39  ;;  %v1164_v50 = vunpack.c.h.s8.bf16 %v428_v39 }
 0x16e   :  { %1858 = vmatpush1.bf16.msra.mxu0 %v1081_v46  ;;  %2202 = vmatpush1.bf16.msra.mxu1 %v1083_v47  ;;  %v427_v46 = vld [vmem:[#allocation5 + $0x6d0] sm:$0xff]  ;;  %v1153_v47 = vunpack.c.l.s8.bf16 %v425_v45 }
 0x16f   :  { %1859 = vmatprep.subr.bf16.mxu0 %v1090_v48  ;;  %2203 = vmatprep.subr.bf16.mxu1 %v1092_v49  ;;  %v1155_v48 = vunpack.c.l.s8.bf16 %v427_v46  ;;  %v1162_v49 = vunpack.c.h.s8.bf16 %v426_v38 }
 0x172   :  { %1860 = vmatpush1.bf16.msra.mxu0 %v1089_v52  ;;  %2204 = vmatpush1.bf16.msra.mxu1 %v1091_v54  ;;  %v436_v52 = vld [vmem:[#allocation5 + $0x718] sm:$0xff]  ;;  %v1161_v54 = vunpack.c.h.s8.bf16 %v425_v45 }
 0x173   :  { %1861 = vmatprep.subr.bf16.mxu0 %v1098_v55  ;;  %2205 = vmatprep.subr.bf16.mxu1 %v1100_v56  ;;  %v1163_v55 = vunpack.c.h.s8.bf16 %v427_v46  ;;  %v1170_v56 = vunpack.c.l.s8.bf16 %v434_v51  ;;  %v1172_v57 = vunpack.c.l.s8.bf16 %v436_v52  ;;  %v167_v46 = vld [vmem:[#allocation2 + $0x30] sm:$0xff] }
 0x174   :  { %v467_v51 = vld [vmem:[#allocation5 + $0x810] sm:$0xff] }
 0x176   :  { %1862 = vmatpush1.bf16.msra.mxu0 %v1097_v59  ;;  %2206 = vmatpush1.bf16.msra.mxu1 %v1099_v60  ;;  %v435_v59 = vld [vmem:[#allocation5 + $0x710] sm:$0xff]  ;;  %v1169_v60 = vunpack.c.l.s8.bf16 %v433_v58 }
 0x177   :  { %1874 = vmatprep.subr.bf16.mxu0 %v1106_v63  ;;  %2218 = vmatprep.subr.bf16.mxu1 %v1108_v0  ;;  %v1171_v61 = vunpack.c.l.s8.bf16 %v435_v59  ;;  %v1180_v63 = vunpack.c.h.s8.bf16 %v436_v52  ;;  %v442_v0 = vld [vmem:[#allocation5 + $0x748] sm:$0xff]  ;;  %v1179_v4 = vunpack.c.h.s8.bf16 %v435_v59 }
 0x178   :  { %v1186_v5 = vunpack.c.l.s8.bf16 %v442_v0  ;;  %v1194_v11 = vunpack.c.h.s8.bf16 %v442_v0  ;;  %v1243_v0 = vunpack.c.h.s8.bf16 %v467_v51 }
 0x179   :  { %1864 = vmatmul.mubr.bf16.vlgmr.msra.gmra.mrb[0].mxu0 %v4931_v3  ;;  %2208 = vmatmul.mubr.bf16.vlgmr.msra.gmra.mrb[0].mxu1 %v4931_v3 }
 0x17a   :  { %1875 = vmatpush1.bf16.msra.mxu0 %v1105_v6  ;;  %2219 = vmatpush1.bf16.msra.mxu1 %v1107_v7  ;;  %v1188_v6 = vunpack.c.l.s8.bf16 %v444_v1  ;;  %v441_v7 = vld [vmem:[#allocation5 + $0x740] sm:$0xff] }
 0x17b   :  { %1876 = vmatprep.subr.bf16.mxu0 %v1114_v8  ;;  %2220 = vmatprep.subr.bf16.mxu1 %v1116_v9  ;;  %v443_v8 = vld [vmem:[#allocation5 + $0x750] sm:$0xff]  ;;  %v1185_v9 = vunpack.c.l.s8.bf16 %v441_v7 }
 0x17c   :  { %1906 = vmatprep.mubr.bf16.mxu0 %v4933_v12  ;;  %2250 = vmatprep.mubr.bf16.mxu1 %v4933_v12  ;;  %v1187_v10 = vunpack.c.l.s8.bf16 %v443_v8  ;;  %v1195_v17 = vunpack.c.h.s8.bf16 %v443_v8 }
 0x17e   :  { %1877 = vmatpush1.bf16.msra.mxu0 %v1113_v13  ;;  %2221 = vmatpush1.bf16.msra.mxu1 %v1115_v14  ;;  %v1196_v13 = vunpack.c.h.s8.bf16 %v444_v1  ;;  %v450_v14 = vld [vmem:[#allocation5 + $0x788] sm:$0xff] }
 0x17f   :  { %1878 = vmatprep.subr.bf16.mxu0 %v1122_v15  ;;  %2222 = vmatprep.subr.bf16.mxu1 %v1124_v16  ;;  %v452_v15 = vld [vmem:[#allocation5 + $0x798] sm:$0xff]  ;;  %v1193_v16 = vunpack.c.h.s8.bf16 %v441_v7  ;;  %v1202_v18 = vunpack.c.l.s8.bf16 %v450_v14  ;;  %v1210_v25 = vunpack.c.h.s8.bf16 %v450_v14 }
 0x182   :  { %1879 = vmatpush1.bf16.msra.mxu0 %v1121_v19  ;;  %2223 = vmatpush1.bf16.msra.mxu1 %v1123_v20  ;;  %v1204_v19 = vunpack.c.l.s8.bf16 %v452_v15  ;;  %v449_v20 = vld [vmem:[#allocation5 + $0x780] sm:$0xff] }
 0x183   :  { %1880 = vmatprep.subr.bf16.mxu0 %v1130_v22  ;;  %2224 = vmatprep.subr.bf16.mxu1 %v1132_v23  ;;  %v451_v22 = vld [vmem:[#allocation5 + $0x790] sm:$0xff]  ;;  %v1201_v23 = vunpack.c.l.s8.bf16 %v449_v20 }
 0x184   :  { %v1203_v24 = vunpack.c.l.s8.bf16 %v451_v22  ;;  %v1211_v31 = vunpack.c.h.s8.bf16 %v451_v22 }
 0x186   :  { %1881 = vmatpush1.bf16.msra.mxu0 %v1129_v26  ;;  %2225 = vmatpush1.bf16.msra.mxu1 %v1131_v27  ;;  %v1212_v26 = vunpack.c.h.s8.bf16 %v452_v15  ;;  %v458_v27 = vld [vmem:[#allocation5 + $0x7c8] sm:$0xff] }
 0x187   :  { %1882 = vmatprep.subr.bf16.mxu0 %v1138_v28  ;;  %2226 = vmatprep.subr.bf16.mxu1 %v1140_v29  ;;  %v460_v28 = vld [vmem:[#allocation5 + $0x7d8] sm:$0xff]  ;;  %v1209_v29 = vunpack.c.h.s8.bf16 %v449_v20  ;;  %v1218_v32 = vunpack.c.l.s8.bf16 %v458_v27  ;;  %v1226_v39 = vunpack.c.h.s8.bf16 %v458_v27 }
 0x18a   :  { %1883 = vmatpush1.bf16.msra.mxu0 %v1137_v33  ;;  %2227 = vmatpush1.bf16.msra.mxu1 %v1139_v34  ;;  %v1220_v33 = vunpack.c.l.s8.bf16 %v460_v28  ;;  %v457_v34 = vld [vmem:[#allocation5 + $0x7c0] sm:$0xff] }
 0x18b   :  { %1884 = vmatprep.subr.bf16.mxu0 %v1146_v35  ;;  %2228 = vmatprep.subr.bf16.mxu1 %v1148_v37  ;;  %v459_v35 = vld [vmem:[#allocation5 + $0x7d0] sm:$0xff]  ;;  %v1217_v37 = vunpack.c.l.s8.bf16 %v457_v34 }
 0x18c   :  { %v1219_v38 = vunpack.c.l.s8.bf16 %v459_v35  ;;  %v1227_v45 = vunpack.c.h.s8.bf16 %v459_v35 }
 0x18e   :  { %1885 = vmatpush1.bf16.msra.mxu0 %v1145_v40  ;;  %2229 = vmatpush1.bf16.msra.mxu1 %v1147_v41  ;;  %v1228_v40 = vunpack.c.h.s8.bf16 %v460_v28  ;;  %v466_v41 = vld [vmem:[#allocation5 + $0x808] sm:$0xff] }
 0x18f   :  { %1886 = vmatprep.subr.bf16.mxu0 %v1154_v42  ;;  %2230 = vmatprep.subr.bf16.mxu1 %v1156_v43  ;;  %v468_v42 = vld [vmem:[#allocation5 + $0x818] sm:$0xff]  ;;  %v1225_v43 = vunpack.c.h.s8.bf16 %v457_v34  ;;  %v1242_v58 = vunpack.c.h.s8.bf16 %v466_v41 }
 0x190   :  { %v1244_v59 = vunpack.c.h.s8.bf16 %v468_v42 }
 0x192   :  { %1887 = vmatpush1.bf16.msra.mxu0 %v1153_v47  ;;  %2231 = vmatpush1.bf16.msra.mxu1 %v1155_v48  ;;  %v183_v47 = vld [vmem:[#allocation2 + $0xb0] sm:$0xff]  ;;  %v1234_v48 = vunpack.c.l.s8.bf16 %v466_v41 }
 0x193   :  { %1888 = vmatprep.subr.bf16.mxu0 %v1162_v49  ;;  %2232 = vmatprep.subr.bf16.mxu1 %v1164_v50  ;;  %v1236_v49 = vunpack.c.l.s8.bf16 %v468_v42  ;;  %v465_v50 = vld [vmem:[#allocation5 + $0x800] sm:$0xff]  ;;  %v4939_v52 = vpack.c.bf16 %v183_v47, %v167_v46  ;;  %v499_v46 = vld [vmem:[#allocation5 + $0x910] sm:$0xff] }
 0x196   :  { %1889 = vmatpush1.bf16.msra.mxu0 %v1161_v54  ;;  %2233 = vmatpush1.bf16.msra.mxu1 %v1163_v55  ;;  %v170_v54 = vld [vmem:[#allocation2 + $0x48] sm:$0xff] }
 0x197   :  { %1890 = vmatprep.subr.bf16.mxu0 %v1170_v56  ;;  %2234 = vmatprep.subr.bf16.mxu1 %v1172_v57  ;;  %v186_v55 = vld [vmem:[#allocation2 + $0xc8] sm:$0xff]  ;;  %v1233_v56 = vunpack.c.l.s8.bf16 %v465_v50  ;;  %v1235_v57 = vunpack.c.l.s8.bf16 %v467_v51 }
 0x198   :  { %v506_v51 = vld [vmem:[#allocation5 + $0x948] sm:$0xff] }
 0x19a   :  { %1891 = vmatpush1.bf16.msra.mxu0 %v1169_v60  ;;  %2235 = vmatpush1.bf16.msra.mxu1 %v1171_v61  ;;  %v474_v60 = vld [vmem:[#allocation5 + $0x848] sm:$0xff]  ;;  %v476_v61 = vld [vmem:[#allocation5 + $0x858] sm:$0xff] }
 0x19b   :  { %1892 = vmatprep.subr.bf16.mxu0 %v1178_v62  ;;  %2236 = vmatprep.subr.bf16.mxu1 %v1180_v63  ;;  %v4941_v62 = vpack.c.bf16 %v186_v55, %v170_v54  ;;  %v1241_v63 = vunpack.c.h.s8.bf16 %v465_v50  ;;  %v1250_v1 = vunpack.c.l.s8.bf16 %v474_v60  ;;  %v1258_v8 = vunpack.c.h.s8.bf16 %v474_v60  ;;  %v508_v54 = vld [vmem:[#allocation5 + $0x958] sm:$0xff]  ;;  %v507_v60 = vld [vmem:[#allocation5 + $0x950] sm:$0xff] }
 0x19e   :  { %1893 = vmatpush1.bf16.msra.mxu0 %v1177_v2  ;;  %2237 = vmatpush1.bf16.msra.mxu1 %v1179_v4  ;;  %v1252_v2 = vunpack.c.l.s8.bf16 %v476_v61  ;;  %v473_v4 = vld [vmem:[#allocation5 + $0x840] sm:$0xff] }
 0x19f   :  { %1894 = vmatprep.subr.bf16.mxu0 %v1186_v5  ;;  %2238 = vmatprep.subr.bf16.mxu1 %v1188_v6  ;;  %v475_v5 = vld [vmem:[#allocation5 + $0x850] sm:$0xff]  ;;  %v1249_v6 = vunpack.c.l.s8.bf16 %v473_v4 }
 0x1a0   :  { %v1251_v7 = vunpack.c.l.s8.bf16 %v475_v5  ;;  %v1259_v14 = vunpack.c.h.s8.bf16 %v475_v5 }
 0x1a2   :  { %1895 = vmatpush1.bf16.msra.mxu0 %v1185_v9  ;;  %2239 = vmatpush1.bf16.msra.mxu1 %v1187_v10  ;;  %v1260_v9 = vunpack.c.h.s8.bf16 %v476_v61  ;;  %v482_v10 = vld [vmem:[#allocation5 + $0x888] sm:$0xff] }
 0x1a3   :  { %1896 = vmatprep.subr.bf16.mxu0 %v1194_v11  ;;  %2240 = vmatprep.subr.bf16.mxu1 %v1196_v13  ;;  %v484_v11 = vld [vmem:[#allocation5 + $0x898] sm:$0xff]  ;;  %v1257_v13 = vunpack.c.h.s8.bf16 %v473_v4  ;;  %v1266_v15 = vunpack.c.l.s8.bf16 %v482_v10  ;;  %v1274_v22 = vunpack.c.h.s8.bf16 %v482_v10  ;;  %v515_v10 = vld [vmem:[#allocation5 + $0x990] sm:$0xff] }
 0x1a4   :  { %v516_v4 = vld [vmem:[#allocation5 + $0x998] sm:$0xff] }
 0x1a6   :  { %1897 = vmatpush1.bf16.msra.mxu0 %v1193_v16  ;;  %2241 = vmatpush1.bf16.msra.mxu1 %v1195_v17  ;;  %v1268_v16 = vunpack.c.l.s8.bf16 %v484_v11  ;;  %v481_v17 = vld [vmem:[#allocation5 + $0x880] sm:$0xff] }
 0x1a7   :  { %1898 = vmatprep.subr.bf16.mxu0 %v1202_v18  ;;  %2242 = vmatprep.subr.bf16.mxu1 %v1204_v19  ;;  %v483_v18 = vld [vmem:[#allocation5 + $0x890] sm:$0xff]  ;;  %v1265_v19 = vunpack.c.l.s8.bf16 %v481_v17 }
 0x1a8   :  { %v1267_v20 = vunpack.c.l.s8.bf16 %v483_v18  ;;  %v1275_v27 = vunpack.c.h.s8.bf16 %v483_v18 }
 0x1aa   :  { %1899 = vmatpush1.bf16.msra.mxu0 %v1201_v23  ;;  %2243 = vmatpush1.bf16.msra.mxu1 %v1203_v24  ;;  %v1276_v23 = vunpack.c.h.s8.bf16 %v484_v11  ;;  %v490_v24 = vld [vmem:[#allocation5 + $0x8c8] sm:$0xff] }
 0x1ab   :  { %1900 = vmatprep.subr.bf16.mxu0 %v1210_v25  ;;  %2244 = vmatprep.subr.bf16.mxu1 %v1212_v26  ;;  %v492_v25 = vld [vmem:[#allocation5 + $0x8d8] sm:$0xff]  ;;  %v1273_v26 = vunpack.c.h.s8.bf16 %v481_v17  ;;  %v1282_v28 = vunpack.c.l.s8.bf16 %v490_v24  ;;  %v1290_v35 = vunpack.c.h.s8.bf16 %v490_v24  ;;  %v523_v24 = vld [vmem:[#allocation5 + $0x9d0] sm:$0xff] }
 0x1ac   :  { %v524_v17 = vld [vmem:[#allocation5 + $0x9d8] sm:$0xff] }
 0x1ae   :  { %1901 = vmatpush1.bf16.msra.mxu0 %v1209_v29  ;;  %2245 = vmatpush1.bf16.msra.mxu1 %v1211_v31  ;;  %v1284_v29 = vunpack.c.l.s8.bf16 %v492_v25  ;;  %v489_v31 = vld [vmem:[#allocation5 + $0x8c0] sm:$0xff] }
 0x1af   :  { %1902 = vmatprep.subr.bf16.mxu0 %v1218_v32  ;;  %2246 = vmatprep.subr.bf16.mxu1 %v1220_v33  ;;  %v491_v32 = vld [vmem:[#allocation5 + $0x8d0] sm:$0xff]  ;;  %v1281_v33 = vunpack.c.l.s8.bf16 %v489_v31 }
 0x1b0   :  { %v1283_v34 = vunpack.c.l.s8.bf16 %v491_v32  ;;  %v1291_v41 = vunpack.c.h.s8.bf16 %v491_v32 }
 0x1b2   :  { %1903 = vmatpush1.bf16.msra.mxu0 %v1217_v37  ;;  %2247 = vmatpush1.bf16.msra.mxu1 %v1219_v38  ;;  %v1292_v37 = vunpack.c.h.s8.bf16 %v492_v25  ;;  %v498_v38 = vld [vmem:[#allocation5 + $0x908] sm:$0xff] }
 0x1b3   :  { %1904 = vmatprep.subr.bf16.mxu0 %v1226_v39  ;;  %2248 = vmatprep.subr.bf16.mxu1 %v1228_v40  ;;  %v500_v39 = vld [vmem:[#allocation5 + $0x918] sm:$0xff]  ;;  %v1289_v40 = vunpack.c.h.s8.bf16 %v489_v31  ;;  %v1298_v42 = vunpack.c.l.s8.bf16 %v498_v38 }
 0x1b4   :  { %v1308_v50 = vunpack.c.h.s8.bf16 %v500_v39  ;;  %v532_v31 = vld [vmem:[#allocation5 + $0xa18] sm:$0xff] }
 0x1b6   :  { %1905 = vmatpush1.bf16.msra.mxu0 %v1225_v43  ;;  %2249 = vmatpush1.bf16.msra.mxu1 %v1227_v45  ;;  %v1300_v43 = vunpack.c.l.s8.bf16 %v500_v39  ;;  %v497_v45 = vld [vmem:[#allocation5 + $0x900] sm:$0xff] }
 0x1b7   :  { %1917 = vmatprep.subr.bf16.mxu0 %v1234_v48  ;;  %2261 = vmatprep.subr.bf16.mxu1 %v1236_v49  ;;  %v1297_v47 = vunpack.c.l.s8.bf16 %v497_v45  ;;  %v1299_v48 = vunpack.c.l.s8.bf16 %v499_v46  ;;  %v1306_v49 = vunpack.c.h.s8.bf16 %v498_v38  ;;  %v1305_v55 = vunpack.c.h.s8.bf16 %v497_v45  ;;  %v529_v39 = vld [vmem:[#allocation5 + $0xa00] sm:$0xff] }
 0x1b8   :  { %v1364_v38 = vunpack.c.l.s8.bf16 %v532_v31  ;;  %v1361_v45 = vunpack.c.l.s8.bf16 %v529_v39 }
 0x1b9   :  { %1907 = vmatmul.mubr.bf16.vlgmr.msra.gmra.mrb[0].mxu0 %v4939_v52  ;;  %2251 = vmatmul.mubr.bf16.vlgmr.msra.gmra.mrb[0].mxu1 %v4939_v52 }
 0x1ba   :  { %1918 = vmatpush1.bf16.msra.mxu0 %v1233_v56  ;;  %2262 = vmatpush1.bf16.msra.mxu1 %v1235_v57  ;;  %v1307_v56 = vunpack.c.h.s8.bf16 %v499_v46  ;;  %v1314_v57 = vunpack.c.l.s8.bf16 %v506_v51 }
 0x1bb   :  { %1919 = vmatprep.subr.bf16.mxu0 %v1242_v58  ;;  %2263 = vmatprep.subr.bf16.mxu1 %v1244_v59  ;;  %v1316_v58 = vunpack.c.l.s8.bf16 %v508_v54  ;;  %v505_v59 = vld [vmem:[#allocation5 + $0x940] sm:$0xff] }
 0x1bc   :  { %1949 = vmatprep.mubr.bf16.mxu0 %v4941_v62  ;;  %2293 = vmatprep.mubr.bf16.mxu1 %v4941_v62  ;;  %v1313_v61 = vunpack.c.l.s8.bf16 %v505_v59  ;;  %v1321_v5 = vunpack.c.h.s8.bf16 %v505_v59  ;;  %v539_v59 = vld [vmem:[#allocation5 + $0xa50] sm:$0xff] }
 0x1be   :  { %1920 = vmatpush1.bf16.msra.mxu0 %v1241_v63  ;;  %2264 = vmatpush1.bf16.msra.mxu1 %v1243_v0  ;;  %v1315_v63 = vunpack.c.l.s8.bf16 %v507_v60  ;;  %v1322_v0 = vunpack.c.h.s8.bf16 %v506_v51 }
 0x1bf   :  { %1921 = vmatprep.subr.bf16.mxu0 %v1250_v1  ;;  %2265 = vmatprep.subr.bf16.mxu1 %v1252_v2  ;;  %v1324_v1 = vunpack.c.h.s8.bf16 %v508_v54  ;;  %v514_v2 = vld [vmem:[#allocation5 + $0x988] sm:$0xff]  ;;  %v1369_v54 = vunpack.c.h.s8.bf16 %v529_v39 }
 0x1c2   :  { %1922 = vmatpush1.bf16.msra.mxu0 %v1249_v6  ;;  %2266 = vmatpush1.bf16.msra.mxu1 %v1251_v7  ;;  %v1323_v6 = vunpack.c.h.s8.bf16 %v507_v60  ;;  %v1330_v7 = vunpack.c.l.s8.bf16 %v514_v2 }
 0x1c3   :  { %1923 = vmatprep.subr.bf16.mxu0 %v1258_v8  ;;  %2267 = vmatprep.subr.bf16.mxu1 %v1260_v9  ;;  %v1332_v8 = vunpack.c.l.s8.bf16 %v516_v4  ;;  %v513_v9 = vld [vmem:[#allocation5 + $0x980] sm:$0xff] }
 0x1c4   :  { %v1329_v11 = vunpack.c.l.s8.bf16 %v513_v9  ;;  %v1337_v18 = vunpack.c.h.s8.bf16 %v513_v9  ;;  %v547_v9 = vld [vmem:[#allocation5 + $0xa90] sm:$0xff] }
 0x1c6   :  { %1924 = vmatpush1.bf16.msra.mxu0 %v1257_v13  ;;  %2268 = vmatpush1.bf16.msra.mxu1 %v1259_v14  ;;  %v1331_v13 = vunpack.c.l.s8.bf16 %v515_v10  ;;  %v1338_v14 = vunpack.c.h.s8.bf16 %v514_v2  ;;  %v548_v2 = vld [vmem:[#allocation5 + $0xa98] sm:$0xff] }
 0x1c7   :  { %1925 = vmatprep.subr.bf16.mxu0 %v1266_v15  ;;  %2269 = vmatprep.subr.bf16.mxu1 %v1268_v16  ;;  %v1340_v15 = vunpack.c.h.s8.bf16 %v516_v4  ;;  %v522_v16 = vld [vmem:[#allocation5 + $0x9c8] sm:$0xff] }
 0x1ca   :  { %1926 = vmatpush1.bf16.msra.mxu0 %v1265_v19  ;;  %2270 = vmatpush1.bf16.msra.mxu1 %v1267_v20  ;;  %v1339_v19 = vunpack.c.h.s8.bf16 %v515_v10  ;;  %v1346_v20 = vunpack.c.l.s8.bf16 %v522_v16 }
 0x1cb   :  { %1927 = vmatprep.subr.bf16.mxu0 %v1274_v22  ;;  %2271 = vmatprep.subr.bf16.mxu1 %v1276_v23  ;;  %v1348_v22 = vunpack.c.l.s8.bf16 %v524_v17  ;;  %v521_v23 = vld [vmem:[#allocation5 + $0x9c0] sm:$0xff] }
 0x1cc   :  { %v1345_v25 = vunpack.c.l.s8.bf16 %v521_v23  ;;  %v1353_v32 = vunpack.c.h.s8.bf16 %v521_v23  ;;  %v555_v23 = vld [vmem:[#allocation5 + $0xad0] sm:$0xff] }
 0x1ce   :  { %1928 = vmatpush1.bf16.msra.mxu0 %v1273_v26  ;;  %2272 = vmatpush1.bf16.msra.mxu1 %v1275_v27  ;;  %v1347_v26 = vunpack.c.l.s8.bf16 %v523_v24  ;;  %v1354_v27 = vunpack.c.h.s8.bf16 %v522_v16  ;;  %v556_v16 = vld [vmem:[#allocation5 + $0xad8] sm:$0xff] }
 0x1cf   :  { %1929 = vmatprep.subr.bf16.mxu0 %v1282_v28  ;;  %2273 = vmatprep.subr.bf16.mxu1 %v1284_v29  ;;  %v1356_v28 = vunpack.c.h.s8.bf16 %v524_v17  ;;  %v530_v29 = vld [vmem:[#allocation5 + $0xa08] sm:$0xff] }
 0x1d2   :  { %1930 = vmatpush1.bf16.msra.mxu0 %v1281_v33  ;;  %2274 = vmatpush1.bf16.msra.mxu1 %v1283_v34  ;;  %v1355_v33 = vunpack.c.h.s8.bf16 %v523_v24  ;;  %v169_v34 = vld [vmem:[#allocation2 + $0x40] sm:$0xff] }
 0x1d3   :  { %1931 = vmatprep.subr.bf16.mxu0 %v1290_v35  ;;  %2275 = vmatprep.subr.bf16.mxu1 %v1292_v37  ;;  %v185_v35 = vld [vmem:[#allocation2 + $0xc0] sm:$0xff]  ;;  %v1362_v37 = vunpack.c.l.s8.bf16 %v530_v29 }
 0x1d6   :  { %1932 = vmatpush1.bf16.msra.mxu0 %v1289_v40  ;;  %2276 = vmatpush1.bf16.msra.mxu1 %v1291_v41  ;;  %v531_v40 = vld [vmem:[#allocation5 + $0xa10] sm:$0xff]  ;;  %v4947_v41 = vpack.c.bf16 %v185_v35, %v169_v34  ;;  %v561_v35 = vld [vmem:[#allocation5 + $0xb00] sm:$0xff] }
 0x1d7   :  { %1933 = vmatprep.subr.bf16.mxu0 %v1298_v42  ;;  %2277 = vmatprep.subr.bf16.mxu1 %v1300_v43  ;;  %v172_v42 = vld [vmem:[#allocation2 + $0x58] sm:$0xff]  ;;  %v1363_v46 = vunpack.c.l.s8.bf16 %v531_v40 }
 0x1d8   :  { %v188_v43 = vld [vmem:[#allocation2 + $0xd8] sm:$0xff] }
 0x1d9   :  { %v4949_v51 = vpack.c.bf16 %v188_v43, %v172_v42  ;;  %v570_v43 = vld [vmem:[#allocation5 + $0xb48] sm:$0xff] }
 0x1da   :  { %1934 = vmatpush1.bf16.msra.mxu0 %v1297_v47  ;;  %2278 = vmatpush1.bf16.msra.mxu1 %v1299_v48  ;;  %v1370_v47 = vunpack.c.h.s8.bf16 %v530_v29  ;;  %v1372_v48 = vunpack.c.h.s8.bf16 %v532_v31  ;;  %v564_v29 = vld [vmem:[#allocation5 + $0xb18] sm:$0xff] }
 0x1db   :  { %1935 = vmatprep.subr.bf16.mxu0 %v1306_v49  ;;  %2279 = vmatprep.subr.bf16.mxu1 %v1308_v50  ;;  %v538_v49 = vld [vmem:[#allocation5 + $0xa48] sm:$0xff]  ;;  %v540_v50 = vld [vmem:[#allocation5 + $0xa58] sm:$0xff]  ;;  %v1428_v34 = vunpack.c.l.s8.bf16 %v564_v29  ;;  %v1436_v42 = vunpack.c.h.s8.bf16 %v564_v29 }
 0x1de   :  { %1936 = vmatpush1.bf16.msra.mxu0 %v1305_v55  ;;  %2280 = vmatpush1.bf16.msra.mxu1 %v1307_v56  ;;  %v1371_v55 = vunpack.c.h.s8.bf16 %v531_v40  ;;  %v1378_v56 = vunpack.c.l.s8.bf16 %v538_v49 }
 0x1df   :  { %1937 = vmatprep.subr.bf16.mxu0 %v1314_v57  ;;  %2281 = vmatprep.subr.bf16.mxu1 %v1316_v58  ;;  %v1380_v57 = vunpack.c.l.s8.bf16 %v540_v50  ;;  %v537_v58 = vld [vmem:[#allocation5 + $0xa40] sm:$0xff] }
 0x1e0   :  { %v1377_v60 = vunpack.c.l.s8.bf16 %v537_v58  ;;  %v1385_v4 = vunpack.c.h.s8.bf16 %v537_v58 }
 0x1e2   :  { %1938 = vmatpush1.bf16.msra.mxu0 %v1313_v61  ;;  %2282 = vmatpush1.bf16.msra.mxu1 %v1315_v63  ;;  %v1379_v61 = vunpack.c.l.s8.bf16 %v539_v59  ;;  %v1386_v63 = vunpack.c.h.s8.bf16 %v538_v49 }
 0x1e3   :  { %1939 = vmatprep.subr.bf16.mxu0 %v1322_v0  ;;  %2283 = vmatprep.subr.bf16.mxu1 %v1324_v1  ;;  %v1388_v0 = vunpack.c.h.s8.bf16 %v540_v50  ;;  %v546_v1 = vld [vmem:[#allocation5 + $0xa88] sm:$0xff]  ;;  %v569_v50 = vld [vmem:[#allocation5 + $0xb40] sm:$0xff] }
 0x1e6   :  { %1940 = vmatpush1.bf16.msra.mxu0 %v1321_v5  ;;  %2284 = vmatpush1.bf16.msra.mxu1 %v1323_v6  ;;  %v1387_v5 = vunpack.c.h.s8.bf16 %v539_v59  ;;  %v1394_v6 = vunpack.c.l.s8.bf16 %v546_v1  ;;  %v578_v59 = vld [vmem:[#allocation5 + $0xb88] sm:$0xff] }
 0x1e7   :  { %1941 = vmatprep.subr.bf16.mxu0 %v1330_v7  ;;  %2285 = vmatprep.subr.bf16.mxu1 %v1332_v8  ;;  %v1396_v7 = vunpack.c.l.s8.bf16 %v548_v2  ;;  %v545_v8 = vld [vmem:[#allocation5 + $0xa80] sm:$0xff] }
 0x1e8   :  { %v1393_v10 = vunpack.c.l.s8.bf16 %v545_v8  ;;  %v1401_v17 = vunpack.c.h.s8.bf16 %v545_v8 }
 0x1ea   :  { %1942 = vmatpush1.bf16.msra.mxu0 %v1329_v11  ;;  %2286 = vmatpush1.bf16.msra.mxu1 %v1331_v13  ;;  %v1395_v11 = vunpack.c.l.s8.bf16 %v547_v9  ;;  %v1402_v13 = vunpack.c.h.s8.bf16 %v546_v1 }
 0x1eb   :  { %1943 = vmatprep.subr.bf16.mxu0 %v1338_v14  ;;  %2287 = vmatprep.subr.bf16.mxu1 %v1340_v15  ;;  %v1404_v14 = vunpack.c.h.s8.bf16 %v548_v2  ;;  %v554_v15 = vld [vmem:[#allocation5 + $0xac8] sm:$0xff]  ;;  %v577_v2 = vld [vmem:[#allocation5 + $0xb80] sm:$0xff] }
 0x1ee   :  { %1944 = vmatpush1.bf16.msra.mxu0 %v1337_v18  ;;  %2288 = vmatpush1.bf16.msra.mxu1 %v1339_v19  ;;  %v1403_v18 = vunpack.c.h.s8.bf16 %v547_v9  ;;  %v1410_v19 = vunpack.c.l.s8.bf16 %v554_v15  ;;  %v586_v9 = vld [vmem:[#allocation5 + $0xbc8] sm:$0xff] }
 0x1ef   :  { %1945 = vmatprep.subr.bf16.mxu0 %v1346_v20  ;;  %2289 = vmatprep.subr.bf16.mxu1 %v1348_v22  ;;  %v1412_v20 = vunpack.c.l.s8.bf16 %v556_v16  ;;  %v553_v22 = vld [vmem:[#allocation5 + $0xac0] sm:$0xff] }
 0x1f0   :  { %v1409_v24 = vunpack.c.l.s8.bf16 %v553_v22  ;;  %v1417_v31 = vunpack.c.h.s8.bf16 %v553_v22 }
 0x1f2   :  { %1946 = vmatpush1.bf16.msra.mxu0 %v1345_v25  ;;  %2290 = vmatpush1.bf16.msra.mxu1 %v1347_v26  ;;  %v1411_v25 = vunpack.c.l.s8.bf16 %v555_v23  ;;  %v1418_v26 = vunpack.c.h.s8.bf16 %v554_v15 }
 0x1f3   :  { %1947 = vmatprep.subr.bf16.mxu0 %v1354_v27  ;;  %2291 = vmatprep.subr.bf16.mxu1 %v1356_v28  ;;  %v1420_v27 = vunpack.c.h.s8.bf16 %v556_v16  ;;  %v562_v28 = vld [vmem:[#allocation5 + $0xb08] sm:$0xff]  ;;  %v585_v16 = vld [vmem:[#allocation5 + $0xbc0] sm:$0xff] }
 0x1f4   :  { %v1434_v40 = vunpack.c.h.s8.bf16 %v562_v28 }
 0x1f6   :  { %1948 = vmatpush1.bf16.msra.mxu0 %v1353_v32  ;;  %2292 = vmatpush1.bf16.msra.mxu1 %v1355_v33  ;;  %v1419_v32 = vunpack.c.h.s8.bf16 %v555_v23  ;;  %v1426_v33 = vunpack.c.l.s8.bf16 %v562_v28  ;;  %v594_v23 = vld [vmem:[#allocation5 + $0xc08] sm:$0xff]  ;;  %v187_v28 = vld [vmem:[#allocation2 + $0xd0] sm:$0xff] }
 0x1f7   :  { %1960 = vmatprep.subr.bf16.mxu0 %v1362_v37  ;;  %2304 = vmatprep.subr.bf16.mxu1 %v1364_v38  ;;  %v563_v37 = vld [vmem:[#allocation5 + $0xb10] sm:$0xff]  ;;  %v1425_v38 = vunpack.c.l.s8.bf16 %v561_v35  ;;  %v1490_v29 = vunpack.c.l.s8.bf16 %v594_v23 }
 0x1f8   :  { %v1427_v39 = vunpack.c.l.s8.bf16 %v563_v37 }
 0x1f9   :  { %1950 = vmatmul.mubr.bf16.vlgmr.msra.gmra.mrb[0].mxu0 %v4947_v41  ;;  %2294 = vmatmul.mubr.bf16.vlgmr.msra.gmra.mrb[0].mxu1 %v4947_v41 }
 0x1fa   :  { %1961 = vmatpush1.bf16.msra.mxu0 %v1361_v45  ;;  %2305 = vmatpush1.bf16.msra.mxu1 %v1363_v46  ;;  %v572_v45 = vld [vmem:[#allocation5 + $0xb58] sm:$0xff]  ;;  %v1433_v46 = vunpack.c.h.s8.bf16 %v561_v35  ;;  %v174_v35 = vld [vmem:[#allocation2 + $0x68] sm:$0xff] }
 0x1fb   :  { %1962 = vmatprep.subr.bf16.mxu0 %v1370_v47  ;;  %2306 = vmatprep.subr.bf16.mxu1 %v1372_v48  ;;  %v1435_v47 = vunpack.c.h.s8.bf16 %v563_v37  ;;  %v1442_v48 = vunpack.c.l.s8.bf16 %v570_v43  ;;  %v1444_v49 = vunpack.c.l.s8.bf16 %v572_v45  ;;  %v1452_v58 = vunpack.c.h.s8.bf16 %v572_v45  ;;  %v190_v37 = vld [vmem:[#allocation2 + $0xe8] sm:$0xff]  ;;  %v604_v45 = vld [vmem:[#allocation5 + $0xc58] sm:$0xff] }
 0x1fc   :  { %1992 = vmatprep.mubr.bf16.mxu0 %v4949_v51  ;;  %2336 = vmatprep.mubr.bf16.mxu1 %v4949_v51 }
 0x1fe   :  { %1963 = vmatpush1.bf16.msra.mxu0 %v1369_v54  ;;  %2307 = vmatpush1.bf16.msra.mxu1 %v1371_v55  ;;  %v571_v54 = vld [vmem:[#allocation5 + $0xb50] sm:$0xff]  ;;  %v1441_v55 = vunpack.c.l.s8.bf16 %v569_v50 }
 0x1ff   :  { %1964 = vmatprep.subr.bf16.mxu0 %v1378_v56  ;;  %2308 = vmatprep.subr.bf16.mxu1 %v1380_v57  ;;  %v1443_v56 = vunpack.c.l.s8.bf16 %v571_v54  ;;  %v1450_v57 = vunpack.c.h.s8.bf16 %v570_v43  ;;  %v602_v43 = vld [vmem:[#allocation5 + $0xc48] sm:$0xff] }
 0x202   :  { %1965 = vmatpush1.bf16.msra.mxu0 %v1377_v60  ;;  %2309 = vmatpush1.bf16.msra.mxu1 %v1379_v61  ;;  %v580_v60 = vld [vmem:[#allocation5 + $0xb98] sm:$0xff]  ;;  %v1449_v61 = vunpack.c.h.s8.bf16 %v569_v50  ;;  %v1508_v50 = vunpack.c.l.s8.bf16 %v604_v45 }
 0x203   :  { %1966 = vmatprep.subr.bf16.mxu0 %v1386_v63  ;;  %2310 = vmatprep.subr.bf16.mxu1 %v1388_v0  ;;  %v1451_v63 = vunpack.c.h.s8.bf16 %v571_v54  ;;  %v1458_v0 = vunpack.c.l.s8.bf16 %v578_v59  ;;  %v1460_v1 = vunpack.c.l.s8.bf16 %v580_v60  ;;  %v1468_v8 = vunpack.c.h.s8.bf16 %v580_v60  ;;  %v601_v54 = vld [vmem:[#allocation5 + $0xc40] sm:$0xff]  ;;  %v610_v60 = vld [vmem:[#allocation5 + $0xc88] sm:$0xff] }
 0x206   :  { %1967 = vmatpush1.bf16.msra.mxu0 %v1385_v4  ;;  %2311 = vmatpush1.bf16.msra.mxu1 %v1387_v5  ;;  %v579_v4 = vld [vmem:[#allocation5 + $0xb90] sm:$0xff]  ;;  %v1457_v5 = vunpack.c.l.s8.bf16 %v577_v2 }
 0x207   :  { %1968 = vmatprep.subr.bf16.mxu0 %v1394_v6  ;;  %2312 = vmatprep.subr.bf16.mxu1 %v1396_v7  ;;  %v1459_v6 = vunpack.c.l.s8.bf16 %v579_v4  ;;  %v1466_v7 = vunpack.c.h.s8.bf16 %v578_v59  ;;  %v1516_v59 = vunpack.c.h.s8.bf16 %v604_v45 }
 0x20a   :  { %1969 = vmatpush1.bf16.msra.mxu0 %v1393_v10  ;;  %2313 = vmatpush1.bf16.msra.mxu1 %v1395_v11  ;;  %v588_v10 = vld [vmem:[#allocation5 + $0xbd8] sm:$0xff]  ;;  %v1465_v11 = vunpack.c.h.s8.bf16 %v577_v2 }
 0x20b   :  { %1970 = vmatprep.subr.bf16.mxu0 %v1402_v13  ;;  %2314 = vmatprep.subr.bf16.mxu1 %v1404_v14  ;;  %v1467_v13 = vunpack.c.h.s8.bf16 %v579_v4  ;;  %v1474_v14 = vunpack.c.l.s8.bf16 %v586_v9  ;;  %v1476_v15 = vunpack.c.l.s8.bf16 %v588_v10  ;;  %v1484_v22 = vunpack.c.h.s8.bf16 %v588_v10  ;;  %v609_v4 = vld [vmem:[#allocation5 + $0xc80] sm:$0xff]  ;;  %v618_v10 = vld [vmem:[#allocation5 + $0xcc8] sm:$0xff] }
 0x20e   :  { %1971 = vmatpush1.bf16.msra.mxu0 %v1401_v17  ;;  %2315 = vmatpush1.bf16.msra.mxu1 %v1403_v18  ;;  %v587_v17 = vld [vmem:[#allocation5 + $0xbd0] sm:$0xff]  ;;  %v1473_v18 = vunpack.c.l.s8.bf16 %v585_v16 }
 0x20f   :  { %1972 = vmatprep.subr.bf16.mxu0 %v1410_v19  ;;  %2316 = vmatprep.subr.bf16.mxu1 %v1412_v20  ;;  %v1475_v19 = vunpack.c.l.s8.bf16 %v587_v17  ;;  %v1482_v20 = vunpack.c.h.s8.bf16 %v586_v9 }
 0x212   :  { %1973 = vmatpush1.bf16.msra.mxu0 %v1409_v24  ;;  %2317 = vmatpush1.bf16.msra.mxu1 %v1411_v25  ;;  %v596_v24 = vld [vmem:[#allocation5 + $0xc18] sm:$0xff]  ;;  %v1481_v25 = vunpack.c.h.s8.bf16 %v585_v16 }
 0x213   :  { %1974 = vmatprep.subr.bf16.mxu0 %v1418_v26  ;;  %2318 = vmatprep.subr.bf16.mxu1 %v1420_v27  ;;  %v1483_v26 = vunpack.c.h.s8.bf16 %v587_v17  ;;  %v171_v27 = vld [vmem:[#allocation2 + $0x50] sm:$0xff]  ;;  %v617_v17 = vld [vmem:[#allocation5 + $0xcc0] sm:$0xff] }
 0x216   :  { %1975 = vmatpush1.bf16.msra.mxu0 %v1417_v31  ;;  %2319 = vmatpush1.bf16.msra.mxu1 %v1419_v32  ;;  %v1492_v31 = vunpack.c.l.s8.bf16 %v596_v24  ;;  %v593_v32 = vld [vmem:[#allocation5 + $0xc00] sm:$0xff] }
 0x217   :  { %1976 = vmatprep.subr.bf16.mxu0 %v1426_v33  ;;  %2320 = vmatprep.subr.bf16.mxu1 %v1428_v34  ;;  %v595_v33 = vld [vmem:[#allocation5 + $0xc10] sm:$0xff]  ;;  %v4955_v34 = vpack.c.bf16 %v187_v28, %v171_v27 }
 0x21a   :  { %1977 = vmatpush1.bf16.msra.mxu0 %v1425_v38  ;;  %2321 = vmatpush1.bf16.msra.mxu1 %v1427_v39  ;;  %v1489_v38 = vunpack.c.l.s8.bf16 %v593_v32  ;;  %v1491_v39 = vunpack.c.l.s8.bf16 %v595_v33 }
 0x21b   :  { %1978 = vmatprep.subr.bf16.mxu0 %v1434_v40  ;;  %2322 = vmatprep.subr.bf16.mxu1 %v1436_v42  ;;  %v1498_v40 = vunpack.c.h.s8.bf16 %v594_v23  ;;  %v1500_v42 = vunpack.c.h.s8.bf16 %v596_v24  ;;  %v626_v24 = vld [vmem:[#allocation5 + $0xd08] sm:$0xff] }
 0x21c   :  { %v1554_v28 = vunpack.c.l.s8.bf16 %v626_v24 }
 0x21e   :  { %1979 = vmatpush1.bf16.msra.mxu0 %v1433_v46  ;;  %2323 = vmatpush1.bf16.msra.mxu1 %v1435_v47  ;;  %v4957_v46 = vpack.c.bf16 %v190_v37, %v174_v35  ;;  %v1497_v47 = vunpack.c.h.s8.bf16 %v593_v32  ;;  %v627_v32 = vld [vmem:[#allocation5 + $0xd10] sm:$0xff]  ;;  %v1562_v37 = vunpack.c.h.s8.bf16 %v626_v24 }
 0x21f   :  { %1980 = vmatprep.subr.bf16.mxu0 %v1442_v48  ;;  %2324 = vmatprep.subr.bf16.mxu1 %v1444_v49  ;;  %v1499_v48 = vunpack.c.h.s8.bf16 %v595_v33  ;;  %v1506_v49 = vunpack.c.l.s8.bf16 %v602_v43  ;;  %v1555_v35 = vunpack.c.l.s8.bf16 %v627_v32 }
 0x222   :  { %1981 = vmatpush1.bf16.msra.mxu0 %v1441_v55  ;;  %2325 = vmatpush1.bf16.msra.mxu1 %v1443_v56  ;;  %v603_v55 = vld [vmem:[#allocation5 + $0xc50] sm:$0xff]  ;;  %v1505_v56 = vunpack.c.l.s8.bf16 %v601_v54 }
 0x223   :  { %1982 = vmatprep.subr.bf16.mxu0 %v1450_v57  ;;  %2326 = vmatprep.subr.bf16.mxu1 %v1452_v58  ;;  %v1507_v57 = vunpack.c.l.s8.bf16 %v603_v55  ;;  %v1514_v58 = vunpack.c.h.s8.bf16 %v602_v43  ;;  %v1563_v43 = vunpack.c.h.s8.bf16 %v627_v32 }
 0x226   :  { %1983 = vmatpush1.bf16.msra.mxu0 %v1449_v61  ;;  %2327 = vmatpush1.bf16.msra.mxu1 %v1451_v63  ;;  %v612_v61 = vld [vmem:[#allocation5 + $0xc98] sm:$0xff]  ;;  %v1513_v63 = vunpack.c.h.s8.bf16 %v601_v54 }
 0x227   :  { %1984 = vmatprep.subr.bf16.mxu0 %v1458_v0  ;;  %2328 = vmatprep.subr.bf16.mxu1 %v1460_v1  ;;  %v1515_v0 = vunpack.c.h.s8.bf16 %v603_v55  ;;  %v1522_v1 = vunpack.c.l.s8.bf16 %v610_v60  ;;  %v1524_v2 = vunpack.c.l.s8.bf16 %v612_v61  ;;  %v1532_v9 = vunpack.c.h.s8.bf16 %v612_v61 }
 0x22a   :  { %1985 = vmatpush1.bf16.msra.mxu0 %v1457_v5  ;;  %2329 = vmatpush1.bf16.msra.mxu1 %v1459_v6  ;;  %v611_v5 = vld [vmem:[#allocation5 + $0xc90] sm:$0xff]  ;;  %v1521_v6 = vunpack.c.l.s8.bf16 %v609_v4 }
 0x22b   :  { %1986 = vmatprep.subr.bf16.mxu0 %v1466_v7  ;;  %2330 = vmatprep.subr.bf16.mxu1 %v1468_v8  ;;  %v1523_v7 = vunpack.c.l.s8.bf16 %v611_v5  ;;  %v1530_v8 = vunpack.c.h.s8.bf16 %v610_v60 }
 0x22e   :  { %1987 = vmatpush1.bf16.msra.mxu0 %v1465_v11  ;;  %2331 = vmatpush1.bf16.msra.mxu1 %v1467_v13  ;;  %v620_v11 = vld [vmem:[#allocation5 + $0xcd8] sm:$0xff]  ;;  %v1529_v13 = vunpack.c.h.s8.bf16 %v609_v4 }
 0x22f   :  { %1988 = vmatprep.subr.bf16.mxu0 %v1474_v14  ;;  %2332 = vmatprep.subr.bf16.mxu1 %v1476_v15  ;;  %v1531_v14 = vunpack.c.h.s8.bf16 %v611_v5  ;;  %v1538_v15 = vunpack.c.l.s8.bf16 %v618_v10  ;;  %v1540_v16 = vunpack.c.l.s8.bf16 %v620_v11  ;;  %v1548_v23 = vunpack.c.h.s8.bf16 %v620_v11 }
 0x232   :  { %1989 = vmatpush1.bf16.msra.mxu0 %v1473_v18  ;;  %2333 = vmatpush1.bf16.msra.mxu1 %v1475_v19  ;;  %v619_v18 = vld [vmem:[#allocation5 + $0xcd0] sm:$0xff]  ;;  %v1537_v19 = vunpack.c.l.s8.bf16 %v617_v17 }
 0x233   :  { %1990 = vmatprep.subr.bf16.mxu0 %v1482_v20  ;;  %2334 = vmatprep.subr.bf16.mxu1 %v1484_v22  ;;  %v1539_v20 = vunpack.c.l.s8.bf16 %v619_v18  ;;  %v1546_v22 = vunpack.c.h.s8.bf16 %v618_v10  ;;  %v1547_v27 = vunpack.c.h.s8.bf16 %v619_v18 }
 0x236   :  { %1991 = vmatpush1.bf16.msra.mxu0 %v1481_v25  ;;  %2335 = vmatpush1.bf16.msra.mxu1 %v1483_v26  ;;  %v628_v25 = vld [vmem:[#allocation5 + $0xd18] sm:$0xff]  ;;  %v1545_v26 = vunpack.c.h.s8.bf16 %v617_v17 }
 0x237   :  { %2003 = vmatprep.subr.bf16.mxu0 %v1490_v29  ;;  %2347 = vmatprep.subr.bf16.mxu1 %v1492_v31  ;;  %v1556_v29 = vunpack.c.l.s8.bf16 %v628_v25  ;;  %v625_v31 = vld [vmem:[#allocation5 + $0xd00] sm:$0xff] }
 0x238   :  { %v1553_v33 = vunpack.c.l.s8.bf16 %v625_v31 }
 0x239   :  { %1993 = vmatmul.mubr.bf16.vlgmr.msra.gmra.mrb[0].mxu0 %v4955_v34  ;;  %2337 = vmatmul.mubr.bf16.vlgmr.msra.gmra.mrb[0].mxu1 %v4955_v34 }
 0x23a   :  { %2004 = vmatpush1.bf16.msra.mxu0 %v1489_v38  ;;  %2348 = vmatpush1.bf16.msra.mxu1 %v1491_v39  ;;  %v1564_v38 = vunpack.c.h.s8.bf16 %v628_v25  ;;  %v634_v39 = vld [vmem:[#allocation5 + $0xd48] sm:$0xff]  ;;  %v173_v25 = vld [vmem:[#allocation2 + $0x60] sm:$0xff] }
 0x23b   :  { %2005 = vmatprep.subr.bf16.mxu0 %v1498_v40  ;;  %2349 = vmatprep.subr.bf16.mxu1 %v1500_v42  ;;  %v636_v40 = vld [vmem:[#allocation5 + $0xd58] sm:$0xff]  ;;  %v1561_v42 = vunpack.c.h.s8.bf16 %v625_v31  ;;  %v1570_v45 = vunpack.c.l.s8.bf16 %v634_v39  ;;  %v1578_v55 = vunpack.c.h.s8.bf16 %v634_v39  ;;  %v659_v31 = vld [vmem:[#allocation5 + $0xe10] sm:$0xff] }
 0x23c   :  { %2035 = vmatprep.mubr.bf16.mxu0 %v4957_v46  ;;  %2379 = vmatprep.mubr.bf16.mxu1 %v4957_v46 }
 0x23e   :  { %2006 = vmatpush1.bf16.msra.mxu0 %v1497_v47  ;;  %2350 = vmatpush1.bf16.msra.mxu1 %v1499_v48  ;;  %v1572_v47 = vunpack.c.l.s8.bf16 %v636_v40  ;;  %v633_v48 = vld [vmem:[#allocation5 + $0xd40] sm:$0xff] }
 0x23f   :  { %2007 = vmatprep.subr.bf16.mxu0 %v1506_v49  ;;  %2351 = vmatprep.subr.bf16.mxu1 %v1508_v50  ;;  %v635_v49 = vld [vmem:[#allocation5 + $0xd50] sm:$0xff]  ;;  %v1569_v50 = vunpack.c.l.s8.bf16 %v633_v48 }
 0x240   :  { %v1571_v54 = vunpack.c.l.s8.bf16 %v635_v49  ;;  %v1579_v60 = vunpack.c.h.s8.bf16 %v635_v49 }
 0x242   :  { %2008 = vmatpush1.bf16.msra.mxu0 %v1505_v56  ;;  %2352 = vmatpush1.bf16.msra.mxu1 %v1507_v57  ;;  %v1580_v56 = vunpack.c.h.s8.bf16 %v636_v40  ;;  %v642_v57 = vld [vmem:[#allocation5 + $0xd88] sm:$0xff] }
 0x243   :  { %2009 = vmatprep.subr.bf16.mxu0 %v1514_v58  ;;  %2353 = vmatprep.subr.bf16.mxu1 %v1516_v59  ;;  %v644_v58 = vld [vmem:[#allocation5 + $0xd98] sm:$0xff]  ;;  %v1577_v59 = vunpack.c.h.s8.bf16 %v633_v48  ;;  %v1586_v61 = vunpack.c.l.s8.bf16 %v642_v57  ;;  %v1594_v5 = vunpack.c.h.s8.bf16 %v642_v57  ;;  %v1627_v48 = vunpack.c.h.s8.bf16 %v659_v31 }
 0x246   :  { %2010 = vmatpush1.bf16.msra.mxu0 %v1513_v63  ;;  %2354 = vmatpush1.bf16.msra.mxu1 %v1515_v0  ;;  %v1588_v63 = vunpack.c.l.s8.bf16 %v644_v58  ;;  %v641_v0 = vld [vmem:[#allocation5 + $0xd80] sm:$0xff] }
 0x247   :  { %2011 = vmatprep.subr.bf16.mxu0 %v1522_v1  ;;  %2355 = vmatprep.subr.bf16.mxu1 %v1524_v2  ;;  %v643_v1 = vld [vmem:[#allocation5 + $0xd90] sm:$0xff]  ;;  %v1585_v2 = vunpack.c.l.s8.bf16 %v641_v0 }
 0x248   :  { %v1587_v4 = vunpack.c.l.s8.bf16 %v643_v1  ;;  %v1595_v10 = vunpack.c.h.s8.bf16 %v643_v1 }
 0x24a   :  { %2012 = vmatpush1.bf16.msra.mxu0 %v1521_v6  ;;  %2356 = vmatpush1.bf16.msra.mxu1 %v1523_v7  ;;  %v1596_v6 = vunpack.c.h.s8.bf16 %v644_v58  ;;  %v650_v7 = vld [vmem:[#allocation5 + $0xdc8] sm:$0xff] }
 0x24b   :  { %2013 = vmatprep.subr.bf16.mxu0 %v1530_v8  ;;  %2357 = vmatprep.subr.bf16.mxu1 %v1532_v9  ;;  %v652_v8 = vld [vmem:[#allocation5 + $0xdd8] sm:$0xff]  ;;  %v1593_v9 = vunpack.c.h.s8.bf16 %v641_v0  ;;  %v1602_v11 = vunpack.c.l.s8.bf16 %v650_v7  ;;  %v1610_v18 = vunpack.c.h.s8.bf16 %v650_v7 }
 0x24e   :  { %2014 = vmatpush1.bf16.msra.mxu0 %v1529_v13  ;;  %2358 = vmatpush1.bf16.msra.mxu1 %v1531_v14  ;;  %v1604_v13 = vunpack.c.l.s8.bf16 %v652_v8  ;;  %v649_v14 = vld [vmem:[#allocation5 + $0xdc0] sm:$0xff] }
 0x24f   :  { %2015 = vmatprep.subr.bf16.mxu0 %v1538_v15  ;;  %2359 = vmatprep.subr.bf16.mxu1 %v1540_v16  ;;  %v651_v15 = vld [vmem:[#allocation5 + $0xdd0] sm:$0xff]  ;;  %v1601_v16 = vunpack.c.l.s8.bf16 %v649_v14 }
 0x250   :  { %v1603_v17 = vunpack.c.l.s8.bf16 %v651_v15  ;;  %v1611_v24 = vunpack.c.h.s8.bf16 %v651_v15 }
 0x252   :  { %2016 = vmatpush1.bf16.msra.mxu0 %v1537_v19  ;;  %2360 = vmatpush1.bf16.msra.mxu1 %v1539_v20  ;;  %v1612_v19 = vunpack.c.h.s8.bf16 %v652_v8  ;;  %v658_v20 = vld [vmem:[#allocation5 + $0xe08] sm:$0xff] }
 0x253   :  { %2017 = vmatprep.subr.bf16.mxu0 %v1546_v22  ;;  %2361 = vmatprep.subr.bf16.mxu1 %v1548_v23  ;;  %v660_v22 = vld [vmem:[#allocation5 + $0xe18] sm:$0xff]  ;;  %v1609_v23 = vunpack.c.h.s8.bf16 %v649_v14  ;;  %v1626_v39 = vunpack.c.h.s8.bf16 %v658_v20 }
 0x254   :  { %v1628_v40 = vunpack.c.h.s8.bf16 %v660_v22 }
 0x256   :  { %2018 = vmatpush1.bf16.msra.mxu0 %v1545_v26  ;;  %2362 = vmatpush1.bf16.msra.mxu1 %v1547_v27  ;;  %v189_v26 = vld [vmem:[#allocation2 + $0xe0] sm:$0xff]  ;;  %v1618_v27 = vunpack.c.l.s8.bf16 %v658_v20 }
 0x257   :  { %2019 = vmatprep.subr.bf16.mxu0 %v1554_v28  ;;  %2363 = vmatprep.subr.bf16.mxu1 %v1556_v29  ;;  %v1620_v28 = vunpack.c.l.s8.bf16 %v660_v22  ;;  %v657_v29 = vld [vmem:[#allocation5 + $0xe00] sm:$0xff]  ;;  %v4963_v32 = vpack.c.bf16 %v189_v26, %v173_v25  ;;  %v692_v25 = vld [vmem:[#allocation5 + $0xf18] sm:$0xff] }
 0x25a   :  { %2020 = vmatpush1.bf16.msra.mxu0 %v1553_v33  ;;  %2364 = vmatpush1.bf16.msra.mxu1 %v1555_v35  ;;  %v176_v33 = vld [vmem:[#allocation2 + $0x78] sm:$0xff] }
 0x25b   :  { %2021 = vmatprep.subr.bf16.mxu0 %v1562_v37  ;;  %2365 = vmatprep.subr.bf16.mxu1 %v1564_v38  ;;  %v192_v35 = vld [vmem:[#allocation2 + $0xf8] sm:$0xff]  ;;  %v1617_v37 = vunpack.c.l.s8.bf16 %v657_v29  ;;  %v1619_v38 = vunpack.c.l.s8.bf16 %v659_v31  ;;  %v689_v31 = vld [vmem:[#allocation5 + $0xf00] sm:$0xff] }
 0x25e   :  { %2022 = vmatpush1.bf16.msra.mxu0 %v1561_v42  ;;  %2366 = vmatpush1.bf16.msra.mxu1 %v1563_v43  ;;  %v666_v42 = vld [vmem:[#allocation5 + $0xe48] sm:$0xff]  ;;  %v668_v43 = vld [vmem:[#allocation5 + $0xe58] sm:$0xff] }
 0x25f   :  { %2023 = vmatprep.subr.bf16.mxu0 %v1570_v45  ;;  %2367 = vmatprep.subr.bf16.mxu1 %v1572_v47  ;;  %v4965_v45 = vpack.c.bf16 %v192_v35, %v176_v33  ;;  %v1625_v47 = vunpack.c.h.s8.bf16 %v657_v29  ;;  %v1634_v49 = vunpack.c.l.s8.bf16 %v666_v42  ;;  %v1642_v58 = vunpack.c.h.s8.bf16 %v666_v42  ;;  %v691_v33 = vld [vmem:[#allocation5 + $0xf10] sm:$0xff]  ;;  %v700_v42 = vld [vmem:[#allocation5 + $0xf58] sm:$0xff] }
 0x260   :  { %v1684_v29 = vunpack.c.l.s8.bf16 %v692_v25  ;;  %v1681_v35 = vunpack.c.l.s8.bf16 %v689_v31 }
 0x262   :  { %2024 = vmatpush1.bf16.msra.mxu0 %v1569_v50  ;;  %2368 = vmatpush1.bf16.msra.mxu1 %v1571_v54  ;;  %v1636_v50 = vunpack.c.l.s8.bf16 %v668_v43  ;;  %v665_v54 = vld [vmem:[#allocation5 + $0xe40] sm:$0xff] }
 0x263   :  { %2025 = vmatprep.subr.bf16.mxu0 %v1578_v55  ;;  %2369 = vmatprep.subr.bf16.mxu1 %v1580_v56  ;;  %v667_v55 = vld [vmem:[#allocation5 + $0xe50] sm:$0xff]  ;;  %v1633_v56 = vunpack.c.l.s8.bf16 %v665_v54 }
 0x264   :  { %v1635_v57 = vunpack.c.l.s8.bf16 %v667_v55  ;;  %v1643_v0 = vunpack.c.h.s8.bf16 %v667_v55 }
 0x266   :  { %2026 = vmatpush1.bf16.msra.mxu0 %v1577_v59  ;;  %2370 = vmatpush1.bf16.msra.mxu1 %v1579_v60  ;;  %v1644_v59 = vunpack.c.h.s8.bf16 %v668_v43  ;;  %v674_v60 = vld [vmem:[#allocation5 + $0xe88] sm:$0xff]  ;;  %v1689_v43 = vunpack.c.h.s8.bf16 %v689_v31 }
 0x267   :  { %2027 = vmatprep.subr.bf16.mxu0 %v1586_v61  ;;  %2371 = vmatprep.subr.bf16.mxu1 %v1588_v63  ;;  %v676_v61 = vld [vmem:[#allocation5 + $0xe98] sm:$0xff]  ;;  %v1641_v63 = vunpack.c.h.s8.bf16 %v665_v54  ;;  %v1650_v1 = vunpack.c.l.s8.bf16 %v674_v60  ;;  %v1658_v8 = vunpack.c.h.s8.bf16 %v674_v60  ;;  %v699_v54 = vld [vmem:[#allocation5 + $0xf50] sm:$0xff] }
 0x268   :  { %v708_v60 = vld [vmem:[#allocation5 + $0xf98] sm:$0xff] }
 0x26a   :  { %2028 = vmatpush1.bf16.msra.mxu0 %v1585_v2  ;;  %2372 = vmatpush1.bf16.msra.mxu1 %v1587_v4  ;;  %v1652_v2 = vunpack.c.l.s8.bf16 %v676_v61  ;;  %v673_v4 = vld [vmem:[#allocation5 + $0xe80] sm:$0xff] }
 0x26b   :  { %2029 = vmatprep.subr.bf16.mxu0 %v1594_v5  ;;  %2373 = vmatprep.subr.bf16.mxu1 %v1596_v6  ;;  %v675_v5 = vld [vmem:[#allocation5 + $0xe90] sm:$0xff]  ;;  %v1649_v6 = vunpack.c.l.s8.bf16 %v673_v4 }
 0x26c   :  { %v1651_v7 = vunpack.c.l.s8.bf16 %v675_v5  ;;  %v1659_v14 = vunpack.c.h.s8.bf16 %v675_v5 }
 0x26e   :  { %2030 = vmatpush1.bf16.msra.mxu0 %v1593_v9  ;;  %2374 = vmatpush1.bf16.msra.mxu1 %v1595_v10  ;;  %v1660_v9 = vunpack.c.h.s8.bf16 %v676_v61  ;;  %v682_v10 = vld [vmem:[#allocation5 + $0xec8] sm:$0xff] }
 0x26f   :  { %2031 = vmatprep.subr.bf16.mxu0 %v1602_v11  ;;  %2375 = vmatprep.subr.bf16.mxu1 %v1604_v13  ;;  %v684_v11 = vld [vmem:[#allocation5 + $0xed8] sm:$0xff]  ;;  %v1657_v13 = vunpack.c.h.s8.bf16 %v673_v4  ;;  %v1666_v15 = vunpack.c.l.s8.bf16 %v682_v10  ;;  %v1674_v22 = vunpack.c.h.s8.bf16 %v682_v10  ;;  %v707_v4 = vld [vmem:[#allocation5 + $0xf90] sm:$0xff] }
 0x270   :  { %v716_v10 = vld [vmem:[#allocation5 + $0xfd8] sm:$0xff] }
 0x272   :  { %2032 = vmatpush1.bf16.msra.mxu0 %v1601_v16  ;;  %2376 = vmatpush1.bf16.msra.mxu1 %v1603_v17  ;;  %v1668_v16 = vunpack.c.l.s8.bf16 %v684_v11  ;;  %v681_v17 = vld [vmem:[#allocation5 + $0xec0] sm:$0xff] }
 0x273   :  { %2033 = vmatprep.subr.bf16.mxu0 %v1610_v18  ;;  %2377 = vmatprep.subr.bf16.mxu1 %v1612_v19  ;;  %v683_v18 = vld [vmem:[#allocation5 + $0xed0] sm:$0xff]  ;;  %v1665_v19 = vunpack.c.l.s8.bf16 %v681_v17  ;;  %v1673_v26 = vunpack.c.h.s8.bf16 %v681_v17 }
 0x274   :  { %v1667_v20 = vunpack.c.l.s8.bf16 %v683_v18  ;;  %v715_v17 = vld [vmem:[#allocation5 + $0xfd0] sm:$0xff] }
 0x276   :  { %2034 = vmatpush1.bf16.msra.mxu0 %v1609_v23  ;;  %2378 = vmatpush1.bf16.msra.mxu1 %v1611_v24  ;;  %v1676_v23 = vunpack.c.h.s8.bf16 %v684_v11  ;;  %v690_v24 = vld [vmem:[#allocation5 + $0xf08] sm:$0xff] }
 0x277   :  { %2046 = vmatprep.subr.bf16.mxu0 %v1618_v27  ;;  %2390 = vmatprep.subr.bf16.mxu1 %v1620_v28  ;;  %v1675_v27 = vunpack.c.h.s8.bf16 %v683_v18  ;;  %v1682_v28 = vunpack.c.l.s8.bf16 %v690_v24 }
 0x279   :  { %2036 = vmatmul.mubr.bf16.vlgmr.msra.gmra.mrb[0].mxu0 %v4963_v32  ;;  %2380 = vmatmul.mubr.bf16.vlgmr.msra.gmra.mrb[0].mxu1 %v4963_v32 }
 0x27a   :  { %2047 = vmatpush1.bf16.msra.mxu0 %v1617_v37  ;;  %2391 = vmatpush1.bf16.msra.mxu1 %v1619_v38  ;;  %v1683_v37 = vunpack.c.l.s8.bf16 %v691_v33  ;;  %v1690_v38 = vunpack.c.h.s8.bf16 %v690_v24  ;;  %v216_v24 = vld [vmem:[#allocation5 + $0x38] sm:$0xff] }
 0x27b   :  { %2048 = vmatprep.subr.bf16.mxu0 %v1626_v39  ;;  %2392 = vmatprep.subr.bf16.mxu1 %v1628_v40  ;;  %v1692_v39 = vunpack.c.h.s8.bf16 %v692_v25  ;;  %v698_v40 = vld [vmem:[#allocation5 + $0xf48] sm:$0xff]  ;;  %v728_v31 = vunpack.c.l.s8.bf16 %v216_v24 }
 0x27c   :  { %2078 = vmatprep.mubr.bf16.mxu0 %v4965_v45  ;;  %2422 = vmatprep.mubr.bf16.mxu1 %v4965_v45 }
 0x27e   :  { %2049 = vmatpush1.bf16.msra.mxu0 %v1625_v47  ;;  %2393 = vmatpush1.bf16.msra.mxu1 %v1627_v48  ;;  %v1691_v47 = vunpack.c.h.s8.bf16 %v691_v33  ;;  %v1698_v48 = vunpack.c.l.s8.bf16 %v698_v40  ;;  %v213_v33 = vld [vmem:[#allocation5 + $0x20] sm:$0xff] }
 0x27f   :  { %2050 = vmatprep.subr.bf16.mxu0 %v1634_v49  ;;  %2394 = vmatprep.subr.bf16.mxu1 %v1636_v50  ;;  %v1700_v49 = vunpack.c.l.s8.bf16 %v700_v42  ;;  %v697_v50 = vld [vmem:[#allocation5 + $0xf40] sm:$0xff] }
 0x280   :  { %v1697_v55 = vunpack.c.l.s8.bf16 %v697_v50  ;;  %v1705_v61 = vunpack.c.h.s8.bf16 %v697_v50 }
 0x282   :  { %2051 = vmatpush1.bf16.msra.mxu0 %v1633_v56  ;;  %2395 = vmatpush1.bf16.msra.mxu1 %v1635_v57  ;;  %v1699_v56 = vunpack.c.l.s8.bf16 %v699_v54  ;;  %v1706_v57 = vunpack.c.h.s8.bf16 %v698_v40 }
 0x283   :  { %2052 = vmatprep.subr.bf16.mxu0 %v1642_v58  ;;  %2396 = vmatprep.subr.bf16.mxu1 %v1644_v59  ;;  %v1708_v58 = vunpack.c.h.s8.bf16 %v700_v42  ;;  %v706_v59 = vld [vmem:[#allocation5 + $0xf88] sm:$0xff]  ;;  %v736_v42 = vunpack.c.h.s8.bf16 %v216_v24 }
 0x284   :  { %v246_v24 = vld [vmem:[#allocation5 + $0x128] sm:$0xff] }
 0x286   :  { %2053 = vmatpush1.bf16.msra.mxu0 %v1641_v63  ;;  %2397 = vmatpush1.bf16.msra.mxu1 %v1643_v0  ;;  %v1707_v63 = vunpack.c.h.s8.bf16 %v699_v54  ;;  %v1714_v0 = vunpack.c.l.s8.bf16 %v706_v59 }
 0x287   :  { %2054 = vmatprep.subr.bf16.mxu0 %v1650_v1  ;;  %2398 = vmatprep.subr.bf16.mxu1 %v1652_v2  ;;  %v1716_v1 = vunpack.c.l.s8.bf16 %v708_v60  ;;  %v705_v2 = vld [vmem:[#allocation5 + $0xf80] sm:$0xff] }
 0x288   :  { %v1713_v5 = vunpack.c.l.s8.bf16 %v705_v2  ;;  %v1721_v11 = vunpack.c.h.s8.bf16 %v705_v2 }
 0x28a   :  { %2055 = vmatpush1.bf16.msra.mxu0 %v1649_v6  ;;  %2399 = vmatpush1.bf16.msra.mxu1 %v1651_v7  ;;  %v1715_v6 = vunpack.c.l.s8.bf16 %v707_v4  ;;  %v1722_v7 = vunpack.c.h.s8.bf16 %v706_v59 }
 0x28b   :  { %2056 = vmatprep.subr.bf16.mxu0 %v1658_v8  ;;  %2400 = vmatprep.subr.bf16.mxu1 %v1660_v9  ;;  %v1724_v8 = vunpack.c.h.s8.bf16 %v708_v60  ;;  %v714_v9 = vld [vmem:[#allocation5 + $0xfc8] sm:$0xff] }
 0x28e   :  { %2057 = vmatpush1.bf16.msra.mxu0 %v1657_v13  ;;  %2401 = vmatpush1.bf16.msra.mxu1 %v1659_v14  ;;  %v1723_v13 = vunpack.c.h.s8.bf16 %v707_v4  ;;  %v1730_v14 = vunpack.c.l.s8.bf16 %v714_v9 }
 0x28f   :  { %2058 = vmatprep.subr.bf16.mxu0 %v1666_v15  ;;  %2402 = vmatprep.subr.bf16.mxu1 %v1668_v16  ;;  %v1732_v15 = vunpack.c.l.s8.bf16 %v716_v10  ;;  %v713_v16 = vld [vmem:[#allocation5 + $0xfc0] sm:$0xff] }
 0x290   :  { %v1729_v18 = vunpack.c.l.s8.bf16 %v713_v16  ;;  %v1737_v25 = vunpack.c.h.s8.bf16 %v713_v16 }
 0x292   :  { %2059 = vmatpush1.bf16.msra.mxu0 %v1665_v19  ;;  %2403 = vmatpush1.bf16.msra.mxu1 %v1667_v20  ;;  %v1731_v19 = vunpack.c.l.s8.bf16 %v715_v17  ;;  %v1738_v20 = vunpack.c.h.s8.bf16 %v714_v9 }
 0x293   :  { %2060 = vmatprep.subr.bf16.mxu0 %v1674_v22  ;;  %2404 = vmatprep.subr.bf16.mxu1 %v1676_v23  ;;  %v1740_v22 = vunpack.c.h.s8.bf16 %v716_v10  ;;  %v214_v23 = vld [vmem:[#allocation5 + $0x28] sm:$0xff] }
 0x294   :  { %v734_v40 = vunpack.c.h.s8.bf16 %v214_v23  ;;  %v238_v10 = vld [vmem:[#allocation5 + $0xe8] sm:$0xff] }
 0x296   :  { %2061 = vmatpush1.bf16.msra.mxu0 %v1673_v26  ;;  %2405 = vmatpush1.bf16.msra.mxu1 %v1675_v27  ;;  %v1739_v26 = vunpack.c.h.s8.bf16 %v715_v17  ;;  %v175_v27 = vld [vmem:[#allocation2 + $0x70] sm:$0xff]  ;;  %v237_v17 = vld [vmem:[#allocation5 + $0xe0] sm:$0xff] }
 0x297   :  { %2062 = vmatprep.subr.bf16.mxu0 %v1682_v28  ;;  %2406 = vmatprep.subr.bf16.mxu1 %v1684_v29  ;;  %v191_v28 = vld [vmem:[#allocation2 + $0xf0] sm:$0xff]  ;;  %v726_v29 = vunpack.c.l.s8.bf16 %v214_v23 }
 0x29a   :  { %2063 = vmatpush1.bf16.msra.mxu0 %v1681_v35  ;;  %2407 = vmatpush1.bf16.msra.mxu1 %v1683_v37  ;;  %v215_v35 = vld [vmem:[#allocation5 + $0x30] sm:$0xff]  ;;  %v4971_v37 = vpack.c.bf16 %v191_v28, %v175_v27  ;;  %v790_v28 = vunpack.c.l.s8.bf16 %v246_v24 }
 0x29b   :  { %2064 = vmatprep.subr.bf16.mxu0 %v1690_v38  ;;  %2408 = vmatprep.subr.bf16.mxu1 %v1692_v39  ;;  %v725_v38 = vunpack.c.l.s8.bf16 %v213_v33  ;;  %v727_v39 = vunpack.c.l.s8.bf16 %v215_v35 }
 0x29e   :  { %2065 = vmatpush1.bf16.msra.mxu0 %v1689_v43  ;;  %2409 = vmatpush1.bf16.msra.mxu1 %v1691_v47  ;;  %v222_v43 = vld [vmem:[#allocation5 + $0x68] sm:$0xff]  ;;  %v224_v47 = vld [vmem:[#allocation5 + $0x78] sm:$0xff] }
 0x29f   :  { %2066 = vmatprep.subr.bf16.mxu0 %v1698_v48  ;;  %2410 = vmatprep.subr.bf16.mxu1 %v1700_v49  ;;  %v733_v48 = vunpack.c.h.s8.bf16 %v213_v33  ;;  %v735_v49 = vunpack.c.h.s8.bf16 %v215_v35  ;;  %v742_v50 = vunpack.c.l.s8.bf16 %v222_v43  ;;  %v744_v54 = vunpack.c.l.s8.bf16 %v224_v47  ;;  %v247_v33 = vld [vmem:[#allocation5 + $0x130] sm:$0xff] }
 0x2a0   :  { %v750_v59 = vunpack.c.h.s8.bf16 %v222_v43  ;;  %v752_v60 = vunpack.c.h.s8.bf16 %v224_v47  ;;  %v256_v43 = vld [vmem:[#allocation5 + $0x178] sm:$0xff] }
 0x2a2   :  { %2067 = vmatpush1.bf16.msra.mxu0 %v1697_v55  ;;  %2411 = vmatpush1.bf16.msra.mxu1 %v1699_v56  ;;  %v221_v55 = vld [vmem:[#allocation5 + $0x60] sm:$0xff]  ;;  %v223_v56 = vld [vmem:[#allocation5 + $0x70] sm:$0xff] }
 0x2a3   :  { %2068 = vmatprep.subr.bf16.mxu0 %v1706_v57  ;;  %2412 = vmatprep.subr.bf16.mxu1 %v1708_v58  ;;  %v741_v57 = vunpack.c.l.s8.bf16 %v221_v55  ;;  %v743_v58 = vunpack.c.l.s8.bf16 %v223_v56 }
 0x2a6   :  { %2069 = vmatpush1.bf16.msra.mxu0 %v1705_v61  ;;  %2413 = vmatpush1.bf16.msra.mxu1 %v1707_v63  ;;  %v230_v61 = vld [vmem:[#allocation5 + $0xa8] sm:$0xff]  ;;  %v232_v63 = vld [vmem:[#allocation5 + $0xb8] sm:$0xff] }
 0x2a7   :  { %2070 = vmatprep.subr.bf16.mxu0 %v1714_v0  ;;  %2414 = vmatprep.subr.bf16.mxu1 %v1716_v1  ;;  %v749_v0 = vunpack.c.h.s8.bf16 %v221_v55  ;;  %v751_v1 = vunpack.c.h.s8.bf16 %v223_v56  ;;  %v758_v2 = vunpack.c.l.s8.bf16 %v230_v61  ;;  %v760_v4 = vunpack.c.l.s8.bf16 %v232_v63  ;;  %v255_v55 = vld [vmem:[#allocation5 + $0x170] sm:$0xff] }
 0x2a8   :  { %v768_v9 = vunpack.c.h.s8.bf16 %v232_v63 }
 0x2aa   :  { %2071 = vmatpush1.bf16.msra.mxu0 %v1713_v5  ;;  %2415 = vmatpush1.bf16.msra.mxu1 %v1715_v6  ;;  %v229_v5 = vld [vmem:[#allocation5 + $0xa0] sm:$0xff] }
 0x2ab   :  { %2072 = vmatprep.subr.bf16.mxu0 %v1722_v7  ;;  %2416 = vmatprep.subr.bf16.mxu1 %v1724_v8  ;;  %v757_v6 = vunpack.c.l.s8.bf16 %v229_v5  ;;  %v766_v8 = vunpack.c.h.s8.bf16 %v230_v61  ;;  %v264_v61 = vld [vmem:[#allocation5 + $0x1b8] sm:$0xff] }
 0x2ae   :  { %2073 = vmatpush1.bf16.msra.mxu0 %v1721_v11  ;;  %2417 = vmatpush1.bf16.msra.mxu1 %v1723_v13  ;;  %v240_v11 = vld [vmem:[#allocation5 + $0xf8] sm:$0xff]  ;;  %v765_v13 = vunpack.c.h.s8.bf16 %v229_v5  ;;  %v263_v5 = vld [vmem:[#allocation5 + $0x1b0] sm:$0xff] }
 0x2af   :  { %2074 = vmatprep.subr.bf16.mxu0 %v1730_v14  ;;  %2418 = vmatprep.subr.bf16.mxu1 %v1732_v15  ;;  %v774_v15 = vunpack.c.l.s8.bf16 %v238_v10  ;;  %v776_v16 = vunpack.c.l.s8.bf16 %v240_v11  ;;  %v784_v23 = vunpack.c.h.s8.bf16 %v240_v11 }
 0x2b2   :  { %2075 = vmatpush1.bf16.msra.mxu0 %v1729_v18  ;;  %2419 = vmatpush1.bf16.msra.mxu1 %v1731_v19  ;;  %v239_v18 = vld [vmem:[#allocation5 + $0xf0] sm:$0xff]  ;;  %v773_v19 = vunpack.c.l.s8.bf16 %v237_v17 }
 0x2b3   :  { %2076 = vmatprep.subr.bf16.mxu0 %v1738_v20  ;;  %2420 = vmatprep.subr.bf16.mxu1 %v1740_v22  ;;  %v775_v20 = vunpack.c.l.s8.bf16 %v239_v18  ;;  %v782_v22 = vunpack.c.h.s8.bf16 %v238_v10  ;;  %v783_v27 = vunpack.c.h.s8.bf16 %v239_v18  ;;  %v272_v10 = vld [vmem:[#allocation5 + $0x1f8] sm:$0xff] }
 0x2b6   :  { %2077 = vmatpush1.bf16.msra.mxu0 %v1737_v25  ;;  %2421 = vmatpush1.bf16.msra.mxu1 %v1739_v26  ;;  %v248_v25 = vld [vmem:[#allocation5 + $0x138] sm:$0xff]  ;;  %v781_v26 = vunpack.c.h.s8.bf16 %v237_v17  ;;  %v271_v17 = vld [vmem:[#allocation5 + $0x1f0] sm:$0xff] }
 0x2b7   :  { %2433 = vmatprep.subr.bf16.mxu0 %v726_v29  ;;  %2777 = vmatprep.subr.bf16.mxu1 %v728_v31  ;;  %v792_v29 = vunpack.c.l.s8.bf16 %v248_v25  ;;  %v245_v31 = vld [vmem:[#allocation5 + $0x120] sm:$0xff] }
 0x2b8   :  { %v789_v35 = vunpack.c.l.s8.bf16 %v245_v31  ;;  %v797_v47 = vunpack.c.h.s8.bf16 %v245_v31  ;;  %v279_v31 = vld [vmem:[#allocation5 + $0x230] sm:$0xff] }
 0x2b9   :  { %2079 = vmatmul.mubr.bf16.vlgmr.msra.gmra.mrb[0].mxu0 %v4971_v37  ;;  %2423 = vmatmul.mubr.bf16.vlgmr.msra.gmra.mrb[0].mxu1 %v4971_v37 }
 0x2ba   :  { %2434 = vmatpush1.bf16.msra.mxu0 %v725_v38  ;;  %2778 = vmatpush1.bf16.msra.mxu1 %v727_v39  ;;  %v791_v38 = vunpack.c.l.s8.bf16 %v247_v33  ;;  %v798_v39 = vunpack.c.h.s8.bf16 %v246_v24  ;;  %v280_v24 = vld [vmem:[#allocation5 + $0x238] sm:$0xff] }
 0x2bb   :  { %2435 = vmatprep.subr.bf16.mxu0 %v734_v40  ;;  %2779 = vmatprep.subr.bf16.mxu1 %v736_v42  ;;  %v800_v40 = vunpack.c.h.s8.bf16 %v248_v25  ;;  %v254_v42 = vld [vmem:[#allocation5 + $0x168] sm:$0xff] }
 0x2bc   :  { %2465 = vmatprep.mubr.bf16.mxu0 %v4911_v36  ;;  %2809 = vmatprep.mubr.bf16.mxu1 %v4911_v36  ;;  %v231_v36 = vld [vmem:[#allocation5 + $0xb0] sm:$0xff] }
 0x2bd   :  { %v759_v7 = vunpack.c.l.s8.bf16 %v231_v36  ;;  %v767_v14 = vunpack.c.h.s8.bf16 %v231_v36 }
 0x2be   :  { %2436 = vmatpush1.bf16.msra.mxu0 %v733_v48  ;;  %2780 = vmatpush1.bf16.msra.mxu1 %v735_v49  ;;  %v799_v48 = vunpack.c.h.s8.bf16 %v247_v33  ;;  %v806_v49 = vunpack.c.l.s8.bf16 %v254_v42 }
 0x2bf   :  { %2437 = vmatprep.subr.bf16.mxu0 %v742_v50  ;;  %2781 = vmatprep.subr.bf16.mxu1 %v744_v54  ;;  %v808_v50 = vunpack.c.l.s8.bf16 %v256_v43  ;;  %v253_v54 = vld [vmem:[#allocation5 + $0x160] sm:$0xff] }
 0x2c0   :  { %v805_v56 = vunpack.c.l.s8.bf16 %v253_v54  ;;  %v813_v63 = vunpack.c.h.s8.bf16 %v253_v54  ;;  %v287_v54 = vld [vmem:[#allocation5 + $0x270] sm:$0xff] }
 0x2c2   :  { %2438 = vmatpush1.bf16.msra.mxu0 %v741_v57  ;;  %2782 = vmatpush1.bf16.msra.mxu1 %v743_v58  ;;  %v807_v57 = vunpack.c.l.s8.bf16 %v255_v55  ;;  %v814_v58 = vunpack.c.h.s8.bf16 %v254_v42  ;;  %v288_v42 = vld [vmem:[#allocation5 + $0x278] sm:$0xff] }
 0x2c3   :  { %2439 = vmatprep.subr.bf16.mxu0 %v750_v59  ;;  %2783 = vmatprep.subr.bf16.mxu1 %v752_v60  ;;  %v816_v59 = vunpack.c.h.s8.bf16 %v256_v43  ;;  %v262_v60 = vld [vmem:[#allocation5 + $0x1a8] sm:$0xff] }
 0x2c6   :  { %2440 = vmatpush1.bf16.msra.mxu0 %v749_v0  ;;  %2784 = vmatpush1.bf16.msra.mxu1 %v751_v1  ;;  %v815_v0 = vunpack.c.h.s8.bf16 %v255_v55  ;;  %v822_v1 = vunpack.c.l.s8.bf16 %v262_v60 }
 0x2c7   :  { %2441 = vmatprep.subr.bf16.mxu0 %v758_v2  ;;  %2785 = vmatprep.subr.bf16.mxu1 %v760_v4  ;;  %v824_v2 = vunpack.c.l.s8.bf16 %v264_v61  ;;  %v261_v4 = vld [vmem:[#allocation5 + $0x1a0] sm:$0xff] }
 0x2c8   :  { %v821_v36 = vunpack.c.l.s8.bf16 %v261_v4  ;;  %v829_v11 = vunpack.c.h.s8.bf16 %v261_v4 }
 0x2ca   :  { %2442 = vmatpush1.bf16.msra.mxu0 %v757_v6  ;;  %2786 = vmatpush1.bf16.msra.mxu1 %v759_v7  ;;  %v823_v6 = vunpack.c.l.s8.bf16 %v263_v5  ;;  %v830_v7 = vunpack.c.h.s8.bf16 %v262_v60 }
 0x2cb   :  { %2443 = vmatprep.subr.bf16.mxu0 %v766_v8  ;;  %2787 = vmatprep.subr.bf16.mxu1 %v768_v9  ;;  %v832_v8 = vunpack.c.h.s8.bf16 %v264_v61  ;;  %v270_v9 = vld [vmem:[#allocation5 + $0x1e8] sm:$0xff]  ;;  %v879_v61 = vunpack.c.h.s8.bf16 %v287_v54 }
 0x2ce   :  { %2444 = vmatpush1.bf16.msra.mxu0 %v765_v13  ;;  %2788 = vmatpush1.bf16.msra.mxu1 %v767_v14  ;;  %v831_v13 = vunpack.c.h.s8.bf16 %v263_v5  ;;  %v838_v14 = vunpack.c.l.s8.bf16 %v270_v9 }
 0x2cf   :  { %2445 = vmatprep.subr.bf16.mxu0 %v774_v15  ;;  %2789 = vmatprep.subr.bf16.mxu1 %v776_v16  ;;  %v840_v15 = vunpack.c.l.s8.bf16 %v272_v10  ;;  %v269_v16 = vld [vmem:[#allocation5 + $0x1e0] sm:$0xff] }
 0x2d0   :  { %v837_v18 = vunpack.c.l.s8.bf16 %v269_v16  ;;  %v845_v25 = vunpack.c.h.s8.bf16 %v269_v16 }
 0x2d2   :  { %2446 = vmatpush1.bf16.msra.mxu0 %v773_v19  ;;  %2790 = vmatpush1.bf16.msra.mxu1 %v775_v20  ;;  %v839_v19 = vunpack.c.l.s8.bf16 %v271_v17  ;;  %v846_v20 = vunpack.c.h.s8.bf16 %v270_v9 }
 0x2d3   :  { %2447 = vmatprep.subr.bf16.mxu0 %v782_v22  ;;  %2791 = vmatprep.subr.bf16.mxu1 %v784_v23  ;;  %v848_v22 = vunpack.c.h.s8.bf16 %v272_v10  ;;  %v278_v23 = vld [vmem:[#allocation5 + $0x228] sm:$0xff] }
 0x2d6   :  { %2448 = vmatpush1.bf16.msra.mxu0 %v781_v26  ;;  %2792 = vmatpush1.bf16.msra.mxu1 %v783_v27  ;;  %v847_v26 = vunpack.c.h.s8.bf16 %v271_v17  ;;  %v854_v27 = vunpack.c.l.s8.bf16 %v278_v23 }
 0x2d7   :  { %2449 = vmatprep.subr.bf16.mxu0 %v790_v28  ;;  %2793 = vmatprep.subr.bf16.mxu1 %v792_v29  ;;  %v856_v28 = vunpack.c.l.s8.bf16 %v280_v24  ;;  %v277_v29 = vld [vmem:[#allocation5 + $0x220] sm:$0xff] }
 0x2d8   :  { %v853_v33 = vunpack.c.l.s8.bf16 %v277_v29  ;;  %v861_v43 = vunpack.c.h.s8.bf16 %v277_v29 }
 0x2da   :  { %2450 = vmatpush1.bf16.msra.mxu0 %v789_v35  ;;  %2794 = vmatpush1.bf16.msra.mxu1 %v791_v38  ;;  %v855_v35 = vunpack.c.l.s8.bf16 %v279_v31  ;;  %v862_v38 = vunpack.c.h.s8.bf16 %v278_v23 }
 0x2db   :  { %2451 = vmatprep.subr.bf16.mxu0 %v798_v39  ;;  %2795 = vmatprep.subr.bf16.mxu1 %v800_v40  ;;  %v864_v39 = vunpack.c.h.s8.bf16 %v280_v24  ;;  %v286_v40 = vld [vmem:[#allocation5 + $0x268] sm:$0xff] }
 0x2de   :  { %2452 = vmatpush1.bf16.msra.mxu0 %v797_v47  ;;  %2796 = vmatpush1.bf16.msra.mxu1 %v799_v48  ;;  %v863_v47 = vunpack.c.h.s8.bf16 %v279_v31  ;;  %v870_v48 = vunpack.c.l.s8.bf16 %v286_v40 }
 0x2df   :  { %2453 = vmatprep.subr.bf16.mxu0 %v806_v49  ;;  %2797 = vmatprep.subr.bf16.mxu1 %v808_v50  ;;  %v872_v49 = vunpack.c.l.s8.bf16 %v288_v42  ;;  %v285_v50 = vld [vmem:[#allocation5 + $0x260] sm:$0xff] }
 0x2e0   :  { %v869_v55 = vunpack.c.l.s8.bf16 %v285_v50  ;;  %v877_v60 = vunpack.c.h.s8.bf16 %v285_v50 }
 0x2e2   :  { %2454 = vmatpush1.bf16.msra.mxu0 %v805_v56  ;;  %2798 = vmatpush1.bf16.msra.mxu1 %v807_v57  ;;  %v871_v56 = vunpack.c.l.s8.bf16 %v287_v54  ;;  %v880_v57 = vunpack.c.h.s8.bf16 %v288_v42 }
 0x2e3   :  { %2455 = vmatprep.subr.bf16.mxu0 %v814_v58  ;;  %2799 = vmatprep.subr.bf16.mxu1 %v816_v59  ;;  %v294_v58 = vld [vmem:[#allocation5 + $0x2a8] sm:$0xff]  ;;  %v296_v59 = vld [vmem:[#allocation5 + $0x2b8] sm:$0xff] }
 0x2e4   :  { %v894_v5 = vunpack.c.h.s8.bf16 %v294_v58 }
 0x2e6   :  { %2456 = vmatpush1.bf16.msra.mxu0 %v813_v63  ;;  %2800 = vmatpush1.bf16.msra.mxu1 %v815_v0  ;;  %v886_v63 = vunpack.c.l.s8.bf16 %v294_v58  ;;  %v888_v0 = vunpack.c.l.s8.bf16 %v296_v59 }
 0x2e7   :  { %2457 = vmatprep.subr.bf16.mxu0 %v822_v1  ;;  %2801 = vmatprep.subr.bf16.mxu1 %v824_v2  ;;  %v293_v1 = vld [vmem:[#allocation5 + $0x2a0] sm:$0xff] }
 0x2e8   :  { %v885_v2 = vunpack.c.l.s8.bf16 %v293_v1 }
 0x2ea   :  { %2458 = vmatpush1.bf16.msra.mxu0 %v821_v36  ;;  %2802 = vmatpush1.bf16.msra.mxu1 %v823_v6  ;;  %v896_v36 = vunpack.c.h.s8.bf16 %v296_v59  ;;  %v302_v6 = vld [vmem:[#allocation5 + $0x2e8] sm:$0xff] }
 0x2eb   :  { %2459 = vmatprep.subr.bf16.mxu0 %v830_v7  ;;  %2803 = vmatprep.subr.bf16.mxu1 %v832_v8  ;;  %v304_v7 = vld [vmem:[#allocation5 + $0x2f8] sm:$0xff]  ;;  %v893_v8 = vunpack.c.h.s8.bf16 %v293_v1  ;;  %v902_v10 = vunpack.c.l.s8.bf16 %v302_v6  ;;  %v910_v17 = vunpack.c.h.s8.bf16 %v302_v6 }
 0x2ee   :  { %2460 = vmatpush1.bf16.msra.mxu0 %v829_v11  ;;  %2804 = vmatpush1.bf16.msra.mxu1 %v831_v13  ;;  %v904_v11 = vunpack.c.l.s8.bf16 %v304_v7  ;;  %v301_v13 = vld [vmem:[#allocation5 + $0x2e0] sm:$0xff] }
 0x2ef   :  { %2461 = vmatprep.subr.bf16.mxu0 %v838_v14  ;;  %2805 = vmatprep.subr.bf16.mxu1 %v840_v15  ;;  %v303_v14 = vld [vmem:[#allocation5 + $0x2f0] sm:$0xff]  ;;  %v901_v15 = vunpack.c.l.s8.bf16 %v301_v13 }
 0x2f0   :  { %v903_v16 = vunpack.c.l.s8.bf16 %v303_v14  ;;  %v911_v23 = vunpack.c.h.s8.bf16 %v303_v14 }
 0x2f2   :  { %2462 = vmatpush1.bf16.msra.mxu0 %v837_v18  ;;  %2806 = vmatpush1.bf16.msra.mxu1 %v839_v19  ;;  %v912_v18 = vunpack.c.h.s8.bf16 %v304_v7  ;;  %v310_v19 = vld [vmem:[#allocation5 + $0x328] sm:$0xff] }
 0x2f3   :  { %2463 = vmatprep.subr.bf16.mxu0 %v846_v20  ;;  %2807 = vmatprep.subr.bf16.mxu1 %v848_v22  ;;  %v312_v20 = vld [vmem:[#allocation5 + $0x338] sm:$0xff]  ;;  %v909_v22 = vunpack.c.h.s8.bf16 %v301_v13  ;;  %v918_v24 = vunpack.c.l.s8.bf16 %v310_v19  ;;  %v926_v31 = vunpack.c.h.s8.bf16 %v310_v19 }
 0x2f6   :  { %2464 = vmatpush1.bf16.msra.mxu0 %v845_v25  ;;  %2808 = vmatpush1.bf16.msra.mxu1 %v847_v26  ;;  %v920_v25 = vunpack.c.l.s8.bf16 %v312_v20  ;;  %v309_v26 = vld [vmem:[#allocation5 + $0x320] sm:$0xff] }
 0x2f7   :  { %2476 = vmatprep.subr.bf16.mxu0 %v854_v27  ;;  %2820 = vmatprep.subr.bf16.mxu1 %v856_v28  ;;  %v311_v27 = vld [vmem:[#allocation5 + $0x330] sm:$0xff]  ;;  %v917_v28 = vunpack.c.l.s8.bf16 %v309_v26 }
 0x2f8   :  { %v919_v29 = vunpack.c.l.s8.bf16 %v311_v27 }
 0x2f9   :  { %2466 = vmatmul.mubr.bf16.vlgmr.msra.gmra.mrb[4].mxu0 %v4915_v44  ;;  %2810 = vmatmul.mubr.bf16.vlgmr.msra.gmra.mrb[4].mxu1 %v4915_v44  ;;  %v878_v44 = vunpack.c.h.s8.bf16 %v286_v40  ;;  %v927_v40 = vunpack.c.h.s8.bf16 %v311_v27 }
 0x2fa   :  { %2477 = vmatpush1.bf16.msra.mxu0 %v853_v33  ;;  %2821 = vmatpush1.bf16.msra.mxu1 %v855_v35  ;;  %v928_v33 = vunpack.c.h.s8.bf16 %v312_v20  ;;  %v318_v35 = vld [vmem:[#allocation5 + $0x368] sm:$0xff] }
 0x2fb   :  { %2478 = vmatprep.subr.bf16.mxu0 %v862_v38  ;;  %2822 = vmatprep.subr.bf16.mxu1 %v864_v39  ;;  %v320_v38 = vld [vmem:[#allocation5 + $0x378] sm:$0xff]  ;;  %v925_v39 = vunpack.c.h.s8.bf16 %v309_v26  ;;  %v934_v42 = vunpack.c.l.s8.bf16 %v318_v35  ;;  %v942_v54 = vunpack.c.h.s8.bf16 %v318_v35 }
 0x2fc   :  { %2508 = vmatprep.mubr.bf16.mxu0 %v4917_v53  ;;  %2852 = vmatprep.mubr.bf16.mxu1 %v4917_v53  ;;  %v295_v53 = vld [vmem:[#allocation5 + $0x2b0] sm:$0xff] }
 0x2fd   :  { %v887_v4 = vunpack.c.l.s8.bf16 %v295_v53  ;;  %v895_v9 = vunpack.c.h.s8.bf16 %v295_v53 }
 0x2fe   :  { %2479 = vmatpush1.bf16.msra.mxu0 %v861_v43  ;;  %2823 = vmatpush1.bf16.msra.mxu1 %v863_v47  ;;  %v936_v43 = vunpack.c.l.s8.bf16 %v320_v38  ;;  %v317_v47 = vld [vmem:[#allocation5 + $0x360] sm:$0xff] }
 0x2ff   :  { %2480 = vmatprep.subr.bf16.mxu0 %v870_v48  ;;  %2824 = vmatprep.subr.bf16.mxu1 %v872_v49  ;;  %v319_v48 = vld [vmem:[#allocation5 + $0x370] sm:$0xff]  ;;  %v933_v49 = vunpack.c.l.s8.bf16 %v317_v47 }
 0x300   :  { %v935_v50 = vunpack.c.l.s8.bf16 %v319_v48  ;;  %v943_v58 = vunpack.c.h.s8.bf16 %v319_v48 }
 0x302   :  { %2481 = vmatpush1.bf16.msra.mxu0 %v869_v55  ;;  %2825 = vmatpush1.bf16.msra.mxu1 %v871_v56  ;;  %v944_v55 = vunpack.c.h.s8.bf16 %v320_v38  ;;  %v326_v56 = vld [vmem:[#allocation5 + $0x3a8] sm:$0xff] }
 0x303   :  { %2482 = vmatprep.subr.bf16.mxu0 %v878_v44  ;;  %2826 = vmatprep.subr.bf16.mxu1 %v880_v57  ;;  %v328_v44 = vld [vmem:[#allocation5 + $0x3b8] sm:$0xff]  ;;  %v941_v57 = vunpack.c.h.s8.bf16 %v317_v47  ;;  %v950_v59 = vunpack.c.l.s8.bf16 %v326_v56  ;;  %v958_v53 = vunpack.c.h.s8.bf16 %v326_v56 }
 0x306   :  { %2483 = vmatpush1.bf16.msra.mxu0 %v877_v60  ;;  %2827 = vmatpush1.bf16.msra.mxu1 %v879_v61  ;;  %v952_v60 = vunpack.c.l.s8.bf16 %v328_v44  ;;  %v325_v61 = vld [vmem:[#allocation5 + $0x3a0] sm:$0xff] }
 0x307   :  { %2484 = vmatprep.subr.bf16.mxu0 %v886_v63  ;;  %2828 = vmatprep.subr.bf16.mxu1 %v888_v0  ;;  %v327_v63 = vld [vmem:[#allocation5 + $0x3b0] sm:$0xff]  ;;  %v949_v0 = vunpack.c.l.s8.bf16 %v325_v61 }
 0x308   :  { %v951_v1 = vunpack.c.l.s8.bf16 %v327_v63  ;;  %v959_v6 = vunpack.c.h.s8.bf16 %v327_v63  ;;  %v366_v63 = vld [vmem:[#allocation5 + $0x4e8] sm:$0xff] }
 0x30a   :  { %2485 = vmatpush1.bf16.msra.mxu0 %v885_v2  ;;  %2829 = vmatpush1.bf16.msra.mxu1 %v887_v4  ;;  %v960_v2 = vunpack.c.h.s8.bf16 %v328_v44  ;;  %v334_v4 = vld [vmem:[#allocation5 + $0x3e8] sm:$0xff] }
 0x30b   :  { %2486 = vmatprep.subr.bf16.mxu0 %v894_v5  ;;  %2830 = vmatprep.subr.bf16.mxu1 %v896_v36  ;;  %v336_v5 = vld [vmem:[#allocation5 + $0x3f8] sm:$0xff]  ;;  %v957_v36 = vunpack.c.h.s8.bf16 %v325_v61  ;;  %v966_v7 = vunpack.c.l.s8.bf16 %v334_v4  ;;  %v974_v14 = vunpack.c.h.s8.bf16 %v334_v4 }
 0x30e   :  { %2487 = vmatpush1.bf16.msra.mxu0 %v893_v8  ;;  %2831 = vmatpush1.bf16.msra.mxu1 %v895_v9  ;;  %v968_v8 = vunpack.c.l.s8.bf16 %v336_v5  ;;  %v333_v9 = vld [vmem:[#allocation5 + $0x3e0] sm:$0xff] }
 0x30f   :  { %2488 = vmatprep.subr.bf16.mxu0 %v902_v10  ;;  %2832 = vmatprep.subr.bf16.mxu1 %v904_v11  ;;  %v335_v10 = vld [vmem:[#allocation5 + $0x3f0] sm:$0xff]  ;;  %v965_v11 = vunpack.c.l.s8.bf16 %v333_v9 }
 0x310   :  { %v967_v13 = vunpack.c.l.s8.bf16 %v335_v10  ;;  %v975_v19 = vunpack.c.h.s8.bf16 %v335_v10  ;;  %v374_v10 = vld [vmem:[#allocation5 + $0x528] sm:$0xff] }
 0x312   :  { %2489 = vmatpush1.bf16.msra.mxu0 %v901_v15  ;;  %2833 = vmatpush1.bf16.msra.mxu1 %v903_v16  ;;  %v976_v15 = vunpack.c.h.s8.bf16 %v336_v5  ;;  %v342_v16 = vld [vmem:[#allocation5 + $0x428] sm:$0xff]  ;;  %v365_v5 = vld [vmem:[#allocation5 + $0x4e0] sm:$0xff] }
 0x313   :  { %2490 = vmatprep.subr.bf16.mxu0 %v910_v17  ;;  %2834 = vmatprep.subr.bf16.mxu1 %v912_v18  ;;  %v344_v17 = vld [vmem:[#allocation5 + $0x438] sm:$0xff]  ;;  %v973_v18 = vunpack.c.h.s8.bf16 %v333_v9  ;;  %v982_v20 = vunpack.c.l.s8.bf16 %v342_v16  ;;  %v990_v27 = vunpack.c.h.s8.bf16 %v342_v16 }
 0x316   :  { %2491 = vmatpush1.bf16.msra.mxu0 %v909_v22  ;;  %2835 = vmatpush1.bf16.msra.mxu1 %v911_v23  ;;  %v984_v22 = vunpack.c.l.s8.bf16 %v344_v17  ;;  %v341_v23 = vld [vmem:[#allocation5 + $0x420] sm:$0xff] }
 0x317   :  { %2492 = vmatprep.subr.bf16.mxu0 %v918_v24  ;;  %2836 = vmatprep.subr.bf16.mxu1 %v920_v25  ;;  %v343_v24 = vld [vmem:[#allocation5 + $0x430] sm:$0xff]  ;;  %v981_v25 = vunpack.c.l.s8.bf16 %v341_v23 }
 0x318   :  { %v983_v26 = vunpack.c.l.s8.bf16 %v343_v24  ;;  %v991_v35 = vunpack.c.h.s8.bf16 %v343_v24  ;;  %v382_v24 = vld [vmem:[#allocation5 + $0x568] sm:$0xff] }
 0x31a   :  { %2493 = vmatpush1.bf16.msra.mxu0 %v917_v28  ;;  %2837 = vmatpush1.bf16.msra.mxu1 %v919_v29  ;;  %v992_v28 = vunpack.c.h.s8.bf16 %v344_v17  ;;  %v350_v29 = vld [vmem:[#allocation5 + $0x468] sm:$0xff]  ;;  %v373_v17 = vld [vmem:[#allocation5 + $0x520] sm:$0xff] }
 0x31b   :  { %2494 = vmatprep.subr.bf16.mxu0 %v926_v31  ;;  %2838 = vmatprep.subr.bf16.mxu1 %v928_v33  ;;  %v352_v31 = vld [vmem:[#allocation5 + $0x478] sm:$0xff]  ;;  %v989_v33 = vunpack.c.h.s8.bf16 %v341_v23  ;;  %v998_v38 = vunpack.c.l.s8.bf16 %v350_v29 }
 0x31c   :  { %v1008_v48 = vunpack.c.h.s8.bf16 %v352_v31 }
 0x31e   :  { %2495 = vmatpush1.bf16.msra.mxu0 %v925_v39  ;;  %2839 = vmatpush1.bf16.msra.mxu1 %v927_v40  ;;  %v1000_v39 = vunpack.c.l.s8.bf16 %v352_v31  ;;  %v349_v40 = vld [vmem:[#allocation5 + $0x460] sm:$0xff] }
 0x31f   :  { %2496 = vmatprep.subr.bf16.mxu0 %v934_v42  ;;  %2840 = vmatprep.subr.bf16.mxu1 %v936_v43  ;;  %v351_v42 = vld [vmem:[#allocation5 + $0x470] sm:$0xff]  ;;  %v997_v43 = vunpack.c.l.s8.bf16 %v349_v40  ;;  %v381_v31 = vld [vmem:[#allocation5 + $0x560] sm:$0xff] }
 0x320   :  { %v999_v47 = vunpack.c.l.s8.bf16 %v351_v42 }
 0x322   :  { %2497 = vmatpush1.bf16.msra.mxu0 %v933_v49  ;;  %2841 = vmatpush1.bf16.msra.mxu1 %v935_v50  ;;  %v358_v49 = vld [vmem:[#allocation5 + $0x4a8] sm:$0xff]  ;;  %v360_v50 = vld [vmem:[#allocation5 + $0x4b8] sm:$0xff] }
 0x323   :  { %2498 = vmatprep.subr.bf16.mxu0 %v942_v54  ;;  %2842 = vmatprep.subr.bf16.mxu1 %v944_v55  ;;  %v1005_v54 = vunpack.c.h.s8.bf16 %v349_v40  ;;  %v1007_v55 = vunpack.c.h.s8.bf16 %v351_v42  ;;  %v1014_v56 = vunpack.c.l.s8.bf16 %v358_v49  ;;  %v1016_v44 = vunpack.c.l.s8.bf16 %v360_v50  ;;  %v390_v42 = vld [vmem:[#allocation5 + $0x5a8] sm:$0xff] }
 0x324   :  { %v1024_v61 = vunpack.c.h.s8.bf16 %v360_v50  ;;  %v389_v50 = vld [vmem:[#allocation5 + $0x5a0] sm:$0xff] }
 0x326   :  { %2499 = vmatpush1.bf16.msra.mxu0 %v941_v57  ;;  %2843 = vmatpush1.bf16.msra.mxu1 %v943_v58  ;;  %v357_v57 = vld [vmem:[#allocation5 + $0x4a0] sm:$0xff] }
 0x327   :  { %2500 = vmatprep.subr.bf16.mxu0 %v950_v59  ;;  %2844 = vmatprep.subr.bf16.mxu1 %v952_v60  ;;  %v1013_v58 = vunpack.c.l.s8.bf16 %v357_v57  ;;  %v1022_v60 = vunpack.c.h.s8.bf16 %v358_v49 }
 0x32a   :  { %2501 = vmatpush1.bf16.msra.mxu0 %v949_v0  ;;  %2845 = vmatpush1.bf16.msra.mxu1 %v951_v1  ;;  %v368_v0 = vld [vmem:[#allocation5 + $0x4f8] sm:$0xff]  ;;  %v1021_v1 = vunpack.c.h.s8.bf16 %v357_v57 }
 0x32b   :  { %2502 = vmatprep.subr.bf16.mxu0 %v958_v53  ;;  %2846 = vmatprep.subr.bf16.mxu1 %v960_v2  ;;  %v1030_v2 = vunpack.c.l.s8.bf16 %v366_v63  ;;  %v1032_v4 = vunpack.c.l.s8.bf16 %v368_v0  ;;  %v1040_v9 = vunpack.c.h.s8.bf16 %v368_v0  ;;  %v397_v0 = vld [vmem:[#allocation5 + $0x5e0] sm:$0xff] }
 0x32e   :  { %2503 = vmatpush1.bf16.msra.mxu0 %v957_v36  ;;  %2847 = vmatpush1.bf16.msra.mxu1 %v959_v6  ;;  %v367_v36 = vld [vmem:[#allocation5 + $0x4f0] sm:$0xff]  ;;  %v1029_v6 = vunpack.c.l.s8.bf16 %v365_v5 }
 0x32f   :  { %2504 = vmatprep.subr.bf16.mxu0 %v966_v7  ;;  %2848 = vmatprep.subr.bf16.mxu1 %v968_v8  ;;  %v1031_v7 = vunpack.c.l.s8.bf16 %v367_v36  ;;  %v1038_v8 = vunpack.c.h.s8.bf16 %v366_v63 }
 0x332   :  { %2505 = vmatpush1.bf16.msra.mxu0 %v965_v11  ;;  %2849 = vmatpush1.bf16.msra.mxu1 %v967_v13  ;;  %v376_v11 = vld [vmem:[#allocation5 + $0x538] sm:$0xff]  ;;  %v1037_v13 = vunpack.c.h.s8.bf16 %v365_v5 }
 0x333   :  { %2506 = vmatprep.subr.bf16.mxu0 %v974_v14  ;;  %2850 = vmatprep.subr.bf16.mxu1 %v976_v15  ;;  %v1039_v14 = vunpack.c.h.s8.bf16 %v367_v36  ;;  %v1046_v15 = vunpack.c.l.s8.bf16 %v374_v10  ;;  %v1048_v16 = vunpack.c.l.s8.bf16 %v376_v11  ;;  %v1056_v23 = vunpack.c.h.s8.bf16 %v376_v11  ;;  %v406_v36 = vld [vmem:[#allocation5 + $0x628] sm:$0xff]  ;;  %v405_v11 = vld [vmem:[#allocation5 + $0x620] sm:$0xff] }
 0x336   :  { %2507 = vmatpush1.bf16.msra.mxu0 %v973_v18  ;;  %2851 = vmatpush1.bf16.msra.mxu1 %v975_v19  ;;  %v375_v18 = vld [vmem:[#allocation5 + $0x530] sm:$0xff]  ;;  %v1045_v19 = vunpack.c.l.s8.bf16 %v373_v17 }
 0x337   :  { %2519 = vmatprep.subr.bf16.mxu0 %v982_v20  ;;  %2863 = vmatprep.subr.bf16.mxu1 %v984_v22  ;;  %v1047_v20 = vunpack.c.l.s8.bf16 %v375_v18  ;;  %v1054_v22 = vunpack.c.h.s8.bf16 %v374_v10 }
 0x339   :  { %2509 = vmatmul.mubr.bf16.vlgmr.msra.gmra.mrb[4].mxu0 %v4923_v21  ;;  %2853 = vmatmul.mubr.bf16.vlgmr.msra.gmra.mrb[4].mxu1 %v4923_v21  ;;  %v1006_v21 = vunpack.c.h.s8.bf16 %v350_v29 }
 0x33a   :  { %2520 = vmatpush1.bf16.msra.mxu0 %v981_v25  ;;  %2864 = vmatpush1.bf16.msra.mxu1 %v983_v26  ;;  %v384_v25 = vld [vmem:[#allocation5 + $0x578] sm:$0xff]  ;;  %v1053_v26 = vunpack.c.h.s8.bf16 %v373_v17 }
 0x33b   :  { %2521 = vmatprep.subr.bf16.mxu0 %v990_v27  ;;  %2865 = vmatprep.subr.bf16.mxu1 %v992_v28  ;;  %v1055_v27 = vunpack.c.h.s8.bf16 %v375_v18  ;;  %v1062_v28 = vunpack.c.l.s8.bf16 %v382_v24  ;;  %v1064_v29 = vunpack.c.l.s8.bf16 %v384_v25  ;;  %v1072_v40 = vunpack.c.h.s8.bf16 %v384_v25  ;;  %v414_v18 = vld [vmem:[#allocation5 + $0x668] sm:$0xff]  ;;  %v413_v25 = vld [vmem:[#allocation5 + $0x660] sm:$0xff] }
 0x33c   :  { %2551 = vmatprep.mubr.bf16.mxu0 %v4925_v30  ;;  %2895 = vmatprep.mubr.bf16.mxu1 %v4925_v30  ;;  %v359_v30 = vld [vmem:[#allocation5 + $0x4b0] sm:$0xff] }
 0x33d   :  { %v1015_v59 = vunpack.c.l.s8.bf16 %v359_v30  ;;  %v1023_v53 = vunpack.c.h.s8.bf16 %v359_v30  ;;  %v398_v30 = vld [vmem:[#allocation5 + $0x5e8] sm:$0xff] }
 0x33e   :  { %2522 = vmatpush1.bf16.msra.mxu0 %v989_v33  ;;  %2866 = vmatpush1.bf16.msra.mxu1 %v991_v35  ;;  %v383_v33 = vld [vmem:[#allocation5 + $0x570] sm:$0xff]  ;;  %v1061_v35 = vunpack.c.l.s8.bf16 %v381_v31 }
 0x33f   :  { %2523 = vmatprep.subr.bf16.mxu0 %v998_v38  ;;  %2867 = vmatprep.subr.bf16.mxu1 %v1000_v39  ;;  %v1063_v38 = vunpack.c.l.s8.bf16 %v383_v33  ;;  %v1070_v39 = vunpack.c.h.s8.bf16 %v382_v24 }
 0x342   :  { %2524 = vmatpush1.bf16.msra.mxu0 %v997_v43  ;;  %2868 = vmatpush1.bf16.msra.mxu1 %v999_v47  ;;  %v392_v43 = vld [vmem:[#allocation5 + $0x5b8] sm:$0xff]  ;;  %v1069_v47 = vunpack.c.h.s8.bf16 %v381_v31 }
 0x343   :  { %2525 = vmatprep.subr.bf16.mxu0 %v1006_v21  ;;  %2869 = vmatprep.subr.bf16.mxu1 %v1008_v48  ;;  %v1071_v21 = vunpack.c.h.s8.bf16 %v383_v33  ;;  %v1078_v48 = vunpack.c.l.s8.bf16 %v390_v42  ;;  %v1080_v49 = vunpack.c.l.s8.bf16 %v392_v43  ;;  %v1088_v57 = vunpack.c.h.s8.bf16 %v392_v43  ;;  %v422_v33 = vld [vmem:[#allocation5 + $0x6a8] sm:$0xff]  ;;  %v421_v43 = vld [vmem:[#allocation5 + $0x6a0] sm:$0xff] }
 0x346   :  { %2526 = vmatpush1.bf16.msra.mxu0 %v1005_v54  ;;  %2870 = vmatpush1.bf16.msra.mxu1 %v1007_v55  ;;  %v391_v54 = vld [vmem:[#allocation5 + $0x5b0] sm:$0xff]  ;;  %v1077_v55 = vunpack.c.l.s8.bf16 %v389_v50 }
 0x347   :  { %2527 = vmatprep.subr.bf16.mxu0 %v1014_v56  ;;  %2871 = vmatprep.subr.bf16.mxu1 %v1016_v44  ;;  %v1079_v56 = vunpack.c.l.s8.bf16 %v391_v54  ;;  %v1086_v44 = vunpack.c.h.s8.bf16 %v390_v42 }
 0x34a   :  { %2528 = vmatpush1.bf16.msra.mxu0 %v1013_v58  ;;  %2872 = vmatpush1.bf16.msra.mxu1 %v1015_v59  ;;  %v400_v58 = vld [vmem:[#allocation5 + $0x5f8] sm:$0xff]  ;;  %v1085_v59 = vunpack.c.h.s8.bf16 %v389_v50 }
 0x34b   :  { %2529 = vmatprep.subr.bf16.mxu0 %v1022_v60  ;;  %2873 = vmatprep.subr.bf16.mxu1 %v1024_v61  ;;  %v1087_v60 = vunpack.c.h.s8.bf16 %v391_v54  ;;  %v1094_v61 = vunpack.c.l.s8.bf16 %v398_v30  ;;  %v1096_v63 = vunpack.c.l.s8.bf16 %v400_v58  ;;  %v1104_v5 = vunpack.c.h.s8.bf16 %v400_v58  ;;  %v3121_v54 = vld [vmem:[#allocation7] sm:$0xff]  ;;  %v5003_v58 = vld [vmem:[#allocation5 + $0x6e8] sm:$0xff] }
 0x34e   :  { %2530 = vmatpush1.bf16.msra.mxu0 %v1021_v1  ;;  %2874 = vmatpush1.bf16.msra.mxu1 %v1023_v53  ;;  %v399_v1 = vld [vmem:[#allocation5 + $0x5f0] sm:$0xff]  ;;  %v1093_v53 = vunpack.c.l.s8.bf16 %v397_v0 }
 0x34f   :  { %2531 = vmatprep.subr.bf16.mxu0 %v1030_v2  ;;  %2875 = vmatprep.subr.bf16.mxu1 %v1032_v4  ;;  %v1095_v2 = vunpack.c.l.s8.bf16 %v399_v1  ;;  %v1102_v4 = vunpack.c.h.s8.bf16 %v398_v30  ;;  %v3179_v30 = vld [vmem:[#allocation8] sm:$0xff] }
 0x352   :  { %2532 = vmatpush1.bf16.msra.mxu0 %v1029_v6  ;;  %2876 = vmatpush1.bf16.msra.mxu1 %v1031_v7  ;;  %v408_v6 = vld [vmem:[#allocation5 + $0x638] sm:$0xff]  ;;  %v1101_v7 = vunpack.c.h.s8.bf16 %v397_v0 }
 0x353   :  { %2533 = vmatprep.subr.bf16.mxu0 %v1038_v8  ;;  %2877 = vmatprep.subr.bf16.mxu1 %v1040_v9  ;;  %v1103_v8 = vunpack.c.h.s8.bf16 %v399_v1  ;;  %v1110_v9 = vunpack.c.l.s8.bf16 %v406_v36  ;;  %v1112_v10 = vunpack.c.l.s8.bf16 %v408_v6  ;;  %v1120_v17 = vunpack.c.h.s8.bf16 %v408_v6 }
 0x354   :  { %v1149_v1 = vunpack.c.h.s8.bf16 %v421_v43  ;;  %v1158_v6 = vunpack.c.l.s8.bf16 %v5003_v58 }
 0x356   :  { %2534 = vmatpush1.bf16.msra.mxu0 %v1037_v13  ;;  %2878 = vmatpush1.bf16.msra.mxu1 %v1039_v14  ;;  %v407_v13 = vld [vmem:[#allocation5 + $0x630] sm:$0xff]  ;;  %v1109_v14 = vunpack.c.l.s8.bf16 %v405_v11 }
 0x357   :  { %2535 = vmatprep.subr.bf16.mxu0 %v1046_v15  ;;  %2879 = vmatprep.subr.bf16.mxu1 %v1048_v16  ;;  %v1111_v15 = vunpack.c.l.s8.bf16 %v407_v13  ;;  %v1118_v16 = vunpack.c.h.s8.bf16 %v406_v36 }
 0x35a   :  { %2536 = vmatpush1.bf16.msra.mxu0 %v1045_v19  ;;  %2880 = vmatpush1.bf16.msra.mxu1 %v1047_v20  ;;  %v416_v19 = vld [vmem:[#allocation5 + $0x678] sm:$0xff]  ;;  %v1117_v20 = vunpack.c.h.s8.bf16 %v405_v11 }
 0x35b   :  { %2537 = vmatprep.subr.bf16.mxu0 %v1054_v22  ;;  %2881 = vmatprep.subr.bf16.mxu1 %v1056_v23  ;;  %v1119_v22 = vunpack.c.h.s8.bf16 %v407_v13  ;;  %v1126_v23 = vunpack.c.l.s8.bf16 %v414_v18  ;;  %v1128_v24 = vunpack.c.l.s8.bf16 %v416_v19  ;;  %v1136_v31 = vunpack.c.h.s8.bf16 %v416_v19 }
 0x35e   :  { %2538 = vmatpush1.bf16.msra.mxu0 %v1053_v26  ;;  %2882 = vmatpush1.bf16.msra.mxu1 %v1055_v27  ;;  %v415_v26 = vld [vmem:[#allocation5 + $0x670] sm:$0xff]  ;;  %v3123_v27 = vlaneseq }
 0x35f   :  { %2539 = vmatprep.subr.bf16.mxu0 %v1062_v28  ;;  %2883 = vmatprep.subr.bf16.mxu1 %v1064_v29  ;;  %v1125_v28 = vunpack.c.l.s8.bf16 %v413_v25  ;;  %v1127_v29 = vunpack.c.l.s8.bf16 %v415_v26 }
 0x362   :  { %2540 = vmatpush1.bf16.msra.mxu0 %v1061_v35  ;;  %2884 = vmatpush1.bf16.msra.mxu1 %v1063_v38  ;;  %v424_v35 = vld [vmem:[#allocation5 + $0x6b8] sm:$0xff]  ;;  %v4989_v38 = vshrl.u32 %v3123_v27, 7 }
 0x363   :  { %2541 = vmatprep.subr.bf16.mxu0 %v1070_v39  ;;  %2885 = vmatprep.subr.bf16.mxu1 %v1072_v40  ;;  %v1133_v39 = vunpack.c.h.s8.bf16 %v413_v25  ;;  %v1135_v40 = vunpack.c.h.s8.bf16 %v415_v26  ;;  %v1144_v42 = vunpack.c.l.s8.bf16 %v424_v35 }
 0x366   :  { %2542 = vmatpush1.bf16.msra.mxu0 %v1069_v47  ;;  %2886 = vmatpush1.bf16.msra.mxu1 %v1071_v21  ;;  %v423_v47 = vld [vmem:[#allocation5 + $0x6b0] sm:$0xff]  ;;  %v4992_v21 = vsub.s32 0, %v4989_v38 }
 0x367   :  { %2543 = vmatprep.subr.bf16.mxu0 %v1078_v48  ;;  %2887 = vmatprep.subr.bf16.mxu1 %v1080_v49  ;;  %v4995_v48 = vsub.s32 2, %v4989_v38  ;;  %v1141_v49 = vunpack.c.l.s8.bf16 %v421_v43  ;;  %v1143_v50 = vunpack.c.l.s8.bf16 %v423_v47 }
 0x369   :  { %v3192_v36 = vrot.slane %v3179_v30, %v4995_v48 }
 0x36a   :  { %2544 = vmatpush1.bf16.msra.mxu0 %v1077_v55  ;;  %2888 = vmatpush1.bf16.msra.mxu1 %v1079_v56  ;;  %v4998_v55 = vsub.s32 1, %v4989_v38  ;;  %v5001_v56 = vsub.s32 3, %v4989_v38 }
 0x36b   :  { %2545 = vmatprep.subr.bf16.mxu0 %v1086_v44  ;;  %2889 = vmatprep.subr.bf16.mxu1 %v1088_v57  ;;  %v1150_v44 = vunpack.c.h.s8.bf16 %v422_v33  ;;  %v1152_v57 = vunpack.c.h.s8.bf16 %v424_v35  ;;  %v440_v35 = vld [vmem:[#allocation5 + $0x738] sm:$0xff] }
 0x36c   :  { %v3138_v0 = vrot.slane %v3121_v54, %v5001_v56 }
 0x36e   :  { %2546 = vmatpush1.bf16.msra.mxu0 %v1085_v59  ;;  %2890 = vmatpush1.bf16.msra.mxu1 %v1087_v60  ;;  %v3126_v59 = vrot.slane %v3121_v54, %v4992_v21  ;;  %v3134_v60 = vrot.slane %v3121_v54, %v4995_v48 }
 0x36f   :  { %2547 = vmatprep.subr.bf16.mxu0 %v1094_v61  ;;  %2891 = vmatprep.subr.bf16.mxu1 %v1096_v63  ;;  %v432_v61 = vld [vmem:[#allocation5 + $0x6f8] sm:$0xff]  ;;  %v3130_v63 = vrot.slane %v3121_v54, %v4998_v55 }
 0x370   :  { %v1160_v11 = vunpack.c.l.s8.bf16 %v432_v61  ;;  %v1168_v25 = vunpack.c.h.s8.bf16 %v432_v61 }
 0x372   :  { %2548 = vmatpush1.bf16.msra.mxu0 %v1093_v53  ;;  %2892 = vmatpush1.bf16.msra.mxu1 %v1095_v2  ;;  %v1151_v53 = vunpack.c.h.s8.bf16 %v423_v47  ;;  %v5009_v2 = vld [vmem:[#allocation5 + $0x6e0] sm:$0xff] }
 0x373   :  { %2549 = vmatprep.subr.bf16.mxu0 %v1102_v4  ;;  %2893 = vmatprep.subr.bf16.mxu1 %v1104_v5  ;;  %v5011_v4 = vld [vmem:[#allocation5 + $0x6f0] sm:$0xff]  ;;  %v3184_v5 = vrot.slane %v3179_v30, %v4992_v21 }
 0x376   :  { %2550 = vmatpush1.bf16.msra.mxu0 %v1101_v7  ;;  %2894 = vmatpush1.bf16.msra.mxu1 %v1103_v8 }
 0x377   :  { %2562 = vmatprep.subr.bf16.mxu0 %v1110_v9  ;;  %2906 = vmatprep.subr.bf16.mxu1 %v1112_v10  ;;  %v3188_v9 = vrot.slane %v3179_v30, %v4998_v55  ;;  %v3196_v10 = vrot.slane %v3179_v30, %v5001_v56  ;;  %v1176_v30 = vunpack.c.l.s8.bf16 %v440_v35 }
 0x379   :  { %2552 = vmatmul.mubr.bf16.vlgmr.msra.gmra.mrb[4].mxu0 %v4931_v3  ;;  %2896 = vmatmul.mubr.bf16.vlgmr.msra.gmra.mrb[4].mxu1 %v4931_v3  ;;  %v1134_v3 = vunpack.c.h.s8.bf16 %v414_v18  ;;  %v1159_v18 = vunpack.c.l.s8.bf16 %v5011_v4 }
 0x37a   :  { %2563 = vmatpush1.bf16.msra.mxu0 %v1109_v14  ;;  %2907 = vmatpush1.bf16.msra.mxu1 %v1111_v15 }
 0x37b   :  { %2564 = vmatprep.subr.bf16.mxu0 %v1118_v16  ;;  %2908 = vmatprep.subr.bf16.mxu1 %v1120_v17  ;;  %v1157_v17 = vunpack.c.l.s8.bf16 %v5009_v2 }
 0x37c   :  { %2594 = vmatprep.mubr.bf16.mxu0 %v4933_v12  ;;  %2938 = vmatprep.mubr.bf16.mxu1 %v4933_v12  ;;  %v1142_v12 = vunpack.c.l.s8.bf16 %v422_v33  ;;  %v438_v33 = vld [vmem:[#allocation5 + $0x728] sm:$0xff] }
 0x37e   :  { %2565 = vmatpush1.bf16.msra.mxu0 %v1117_v20  ;;  %2909 = vmatpush1.bf16.msra.mxu1 %v1119_v22 }
 0x37f   :  { %2566 = vmatprep.subr.bf16.mxu0 %v1126_v23  ;;  %2910 = vmatprep.subr.bf16.mxu1 %v1128_v24  ;;  %v1166_v24 = vunpack.c.h.s8.bf16 %v5003_v58 }
 0x382   :  { %2567 = vmatpush1.bf16.msra.mxu0 %v1125_v28  ;;  %2911 = vmatpush1.bf16.msra.mxu1 %v1127_v29 }
 0x383   :  { %2568 = vmatprep.subr.bf16.mxu0 %v1134_v3  ;;  %2912 = vmatprep.subr.bf16.mxu1 %v1136_v31 }
 0x386   :  { %2569 = vmatpush1.bf16.msra.mxu0 %v1133_v39  ;;  %2913 = vmatpush1.bf16.msra.mxu1 %v1135_v40 }
 0x387   :  { %2570 = vmatprep.subr.bf16.mxu0 %v1142_v12  ;;  %2914 = vmatprep.subr.bf16.mxu1 %v1144_v42 }
 0x38a   :  { %2571 = vmatpush1.bf16.msra.mxu0 %v1141_v49  ;;  %2915 = vmatpush1.bf16.msra.mxu1 %v1143_v50  ;;  %v1165_v49 = vunpack.c.h.s8.bf16 %v5009_v2  ;;  %v1167_v50 = vunpack.c.h.s8.bf16 %v5011_v4 }
 0x38b   :  { %2572 = vmatprep.subr.bf16.mxu0 %v1150_v44  ;;  %2916 = vmatprep.subr.bf16.mxu1 %v1152_v57  ;;  %v1174_v57 = vunpack.c.l.s8.bf16 %v438_v33 }
 0x38c   :  { %v2080_v7 = vpop.f32.mrb[0].mxu0  ;;  %v2424_v8 = vpop.f32.mrb[0].mxu1 }
 0x38d   :  { %v3163_v13 = vmul.f32 %v3126_v59, %v2080_v7  ;;  %v3165_v14 = vmul.f32 %v3134_v60, %v2424_v8  ;;  %v2082_v15 = vpop.f32.mrb[1].mxu0  ;;  %v2426_v16 = vpop.f32.mrb[1].mxu1 }
 0x38e   :  { %v3164_v19 = vmul.f32 %v3130_v63, %v2082_v15  ;;  %v3166_v20 = vmul.f32 %v3138_v0, %v2426_v16  ;;  %v2084_v22 = vpop.f32.mrb[2].mxu0  ;;  %v2428_v23 = vpop.f32.mrb[2].mxu1  ;;  %2573 = vmatpush1.bf16.msra.mxu0 %v1149_v1  ;;  %2917 = vmatpush1.bf16.msra.mxu1 %v1151_v53 }
 0x38f   :  { %v3221_v26 = vadd.f32 %v3184_v5, %v3163_v13  ;;  %v3223_v27 = vadd.f32 %v3192_v36, %v3165_v14  ;;  %v3171_v28 = vmul.f32 %v3126_v59, %v2084_v22  ;;  %v3173_v29 = vmul.f32 %v3134_v60, %v2428_v23  ;;  %v2086_v3 = vpop.f32.mrb[3].mxu0  ;;  %v2430_v31 = vpop.f32.mrb[3].mxu1  ;;  %2574 = vmatprep.subr.bf16.mxu0 %v1158_v6  ;;  %v446_v13 = vld [vmem:[#allocation5 + $0x768] sm:$0xff]  ;;  %v448_v14 = vld [vmem:[#allocation5 + $0x778] sm:$0xff] }
 0x390   :  { %v3222_v39 = vadd.f32 %v3188_v9, %v3164_v19  ;;  %v3224_v40 = vadd.f32 %v3196_v10, %v3166_v20  ;;  %v3172_v12 = vmul.f32 %v3130_v63, %v2086_v3  ;;  %v3174_v42 = vmul.f32 %v3138_v0, %v2430_v31  ;;  %2918 = vmatprep.subr.bf16.mxu1 %v1160_v11  ;;  %v437_v63 = vld [vmem:[#allocation5 + $0x720] sm:$0xff]  ;;  %v439_v0 = vld [vmem:[#allocation5 + $0x730] sm:$0xff] }
 0x391   :  { %v3229_v43 = vadd.f32 %v3184_v5, %v3171_v28  ;;  %v3231_v47 = vadd.f32 %v3192_v36, %v3173_v29  ;;  %v3237_v58 = vmax.f32 %v3221_v26, 0.0  ;;  %v3239_v59 = vmax.f32 %v3223_v27, 0.0  ;;  %v445_v19 = vld [vmem:[#allocation5 + $0x760] sm:$0xff]  ;;  %v447_v20 = vld [vmem:[#allocation5 + $0x770] sm:$0xff]  ;;  %v454_v26 = vld [vmem:[#allocation5 + $0x7a8] sm:$0xff] }
 0x392   :  { %v3230_v54 = vadd.f32 %v3188_v9, %v3172_v12  ;;  %v3232_v44 = vadd.f32 %v3196_v10, %v3174_v42  ;;  %2575 = vmatpush1.bf16.msra.mxu0 %v1157_v17  ;;  %2919 = vmatpush1.bf16.msra.mxu1 %v1159_v18  ;;  %v3238_v1 = vmax.f32 %v3222_v39, 0.0  ;;  %v3240_v53 = vmax.f32 %v3224_v40, 0.0  ;;  %v456_v27 = vld [vmem:[#allocation5 + $0x7b8] sm:$0xff] }
 0x393   :  { %v3245_v60 = vmax.f32 %v3229_v43, 0.0  ;;  %v3247_v61 = vmax.f32 %v3231_v47, 0.0  ;;  %2576 = vmatprep.subr.bf16.mxu0 %v1166_v24  ;;  %2920 = vmatprep.subr.bf16.mxu1 %v1168_v25  ;;  %v1173_v6 = vunpack.c.l.s8.bf16 %v437_v63  ;;  %v1175_v7 = vunpack.c.l.s8.bf16 %v439_v0  ;;  %v462_v43 = vld [vmem:[#allocation5 + $0x7e8] sm:$0xff]  ;;  %v464_v47 = vld [vmem:[#allocation5 + $0x7f8] sm:$0xff] }
 0x394   :  { %v3246_v5 = vmax.f32 %v3230_v54, 0.0  ;;  %v3248_v2 = vmax.f32 %v3232_v44, 0.0  ;;  %v1182_v10 = vunpack.c.h.s8.bf16 %v438_v33  ;;  %v1184_v11 = vunpack.c.h.s8.bf16 %v440_v35  ;;  %v453_v33 = vld [vmem:[#allocation5 + $0x7a0] sm:$0xff]  ;;  %v455_v35 = vld [vmem:[#allocation5 + $0x7b0] sm:$0xff] }
 0x395   :  { %v5023_v36 = vpack.c.bf16 %v3245_v60, %v3237_v58  ;;  %v5025_v4 = vpack.c.bf16 %v3247_v61, %v3239_v59  ;;  %v1181_v15 = vunpack.c.h.s8.bf16 %v437_v63  ;;  %v1183_v16 = vunpack.c.h.s8.bf16 %v439_v0  ;;  %v470_v63 = vld [vmem:[#allocation5 + $0x828] sm:$0xff]  ;;  %v472_v0 = vld [vmem:[#allocation5 + $0x838] sm:$0xff] }
 0x396   :  { %2577 = vmatpush1.bf16.msra.mxu0 %v1165_v49  ;;  %2921 = vmatpush1.bf16.msra.mxu1 %v1167_v50  ;;  %v5027_v8 = vpack.c.bf16 %v3246_v5, %v3238_v1  ;;  %v5029_v9 = vpack.c.bf16 %v3248_v2, %v3240_v53  ;;  %v1190_v17 = vunpack.c.l.s8.bf16 %v446_v13  ;;  %v1192_v18 = vunpack.c.l.s8.bf16 %v448_v14 }
 0x397   :  { %2578 = vmatprep.subr.bf16.mxu0 %v1174_v57  ;;  %2922 = vmatprep.subr.bf16.mxu1 %v1176_v30  ;;  %v1189_v22 = vunpack.c.l.s8.bf16 %v445_v19  ;;  %v1191_v23 = vunpack.c.l.s8.bf16 %v447_v20  ;;  %v1198_v24 = vunpack.c.h.s8.bf16 %v446_v13  ;;  %v1200_v25 = vunpack.c.h.s8.bf16 %v448_v14  ;;  %v461_v57 = vld [vmem:[#allocation5 + $0x7e0] sm:$0xff]  ;;  %v463_v30 = vld [vmem:[#allocation5 + $0x7f0] sm:$0xff] }
 0x398   :  { %v1197_v28 = vunpack.c.h.s8.bf16 %v445_v19  ;;  %v1199_v29 = vunpack.c.h.s8.bf16 %v447_v20  ;;  %v1206_v3 = vunpack.c.l.s8.bf16 %v454_v26  ;;  %v1208_v31 = vunpack.c.l.s8.bf16 %v456_v27 }
 0x399   :  { %v1205_v39 = vunpack.c.l.s8.bf16 %v453_v33  ;;  %v1207_v40 = vunpack.c.l.s8.bf16 %v455_v35  ;;  %v1214_v12 = vunpack.c.h.s8.bf16 %v454_v26  ;;  %v1216_v42 = vunpack.c.h.s8.bf16 %v456_v27  ;;  %v486_v27 = vld [vmem:[#allocation5 + $0x8a8] sm:$0xff] }
 0x39a   :  { %2579 = vmatpush1.bf16.msra.mxu0 %v1173_v6  ;;  %2923 = vmatpush1.bf16.msra.mxu1 %v1175_v7  ;;  %v1213_v49 = vunpack.c.h.s8.bf16 %v453_v33  ;;  %v1215_v50 = vunpack.c.h.s8.bf16 %v455_v35  ;;  %v1222_v54 = vunpack.c.l.s8.bf16 %v462_v43  ;;  %v1224_v44 = vunpack.c.l.s8.bf16 %v464_v47  ;;  %v469_v6 = vld [vmem:[#allocation5 + $0x820] sm:$0xff]  ;;  %v471_v7 = vld [vmem:[#allocation5 + $0x830] sm:$0xff] }
 0x39b   :  { %2580 = vmatprep.subr.bf16.mxu0 %v1182_v10  ;;  %2924 = vmatprep.subr.bf16.mxu1 %v1184_v11  ;;  %v1221_v58 = vunpack.c.l.s8.bf16 %v461_v57  ;;  %v1223_v59 = vunpack.c.l.s8.bf16 %v463_v30  ;;  %v1230_v60 = vunpack.c.h.s8.bf16 %v462_v43  ;;  %v1232_v61 = vunpack.c.h.s8.bf16 %v464_v47  ;;  %v485_v35 = vld [vmem:[#allocation5 + $0x8a0] sm:$0xff]  ;;  %v494_v43 = vld [vmem:[#allocation5 + $0x8e8] sm:$0xff]  ;;  %v496_v47 = vld [vmem:[#allocation5 + $0x8f8] sm:$0xff] }
 0x39c   :  { %v1229_v1 = vunpack.c.h.s8.bf16 %v461_v57  ;;  %v1231_v53 = vunpack.c.h.s8.bf16 %v463_v30  ;;  %v1238_v5 = vunpack.c.l.s8.bf16 %v470_v63  ;;  %v1240_v2 = vunpack.c.l.s8.bf16 %v472_v0  ;;  %v493_v57 = vld [vmem:[#allocation5 + $0x8e0] sm:$0xff]  ;;  %v495_v30 = vld [vmem:[#allocation5 + $0x8f0] sm:$0xff] }
 0x39d   :  { %v1237_v10 = vunpack.c.l.s8.bf16 %v469_v6  ;;  %v1239_v11 = vunpack.c.l.s8.bf16 %v471_v7  ;;  %v1246_v13 = vunpack.c.h.s8.bf16 %v470_v63  ;;  %v1248_v14 = vunpack.c.h.s8.bf16 %v472_v0  ;;  %v502_v63 = vld [vmem:[#allocation5 + $0x928] sm:$0xff]  ;;  %v504_v0 = vld [vmem:[#allocation5 + $0x938] sm:$0xff] }
 0x39e   :  { %2581 = vmatpush1.bf16.msra.mxu0 %v1181_v15  ;;  %2925 = vmatpush1.bf16.msra.mxu1 %v1183_v16  ;;  %v478_v15 = vld [vmem:[#allocation5 + $0x868] sm:$0xff]  ;;  %v480_v16 = vld [vmem:[#allocation5 + $0x878] sm:$0xff] }
 0x39f   :  { %2582 = vmatprep.subr.bf16.mxu0 %v1190_v17  ;;  %2926 = vmatprep.subr.bf16.mxu1 %v1192_v18  ;;  %v1245_v17 = vunpack.c.h.s8.bf16 %v469_v6  ;;  %v1247_v18 = vunpack.c.h.s8.bf16 %v471_v7  ;;  %v1254_v19 = vunpack.c.l.s8.bf16 %v478_v15  ;;  %v1256_v20 = vunpack.c.l.s8.bf16 %v480_v16  ;;  %v501_v6 = vld [vmem:[#allocation5 + $0x920] sm:$0xff]  ;;  %v503_v7 = vld [vmem:[#allocation5 + $0x930] sm:$0xff] }
 0x3a0   :  { %v1264_v26 = vunpack.c.h.s8.bf16 %v480_v16  ;;  %v512_v16 = vld [vmem:[#allocation5 + $0x978] sm:$0xff] }
 0x3a2   :  { %2583 = vmatpush1.bf16.msra.mxu0 %v1189_v22  ;;  %2927 = vmatpush1.bf16.msra.mxu1 %v1191_v23  ;;  %v477_v22 = vld [vmem:[#allocation5 + $0x860] sm:$0xff]  ;;  %v479_v23 = vld [vmem:[#allocation5 + $0x870] sm:$0xff] }
 0x3a3   :  { %2584 = vmatprep.subr.bf16.mxu0 %v1198_v24  ;;  %2928 = vmatprep.subr.bf16.mxu1 %v1200_v25  ;;  %v1253_v24 = vunpack.c.l.s8.bf16 %v477_v22  ;;  %v1255_v25 = vunpack.c.l.s8.bf16 %v479_v23 }
 0x3a6   :  { %2585 = vmatpush1.bf16.msra.mxu0 %v1197_v28  ;;  %2929 = vmatpush1.bf16.msra.mxu1 %v1199_v29  ;;  %v488_v28 = vld [vmem:[#allocation5 + $0x8b8] sm:$0xff]  ;;  %v1261_v29 = vunpack.c.h.s8.bf16 %v477_v22  ;;  %v509_v22 = vld [vmem:[#allocation5 + $0x960] sm:$0xff] }
 0x3a7   :  { %2586 = vmatprep.subr.bf16.mxu0 %v1206_v3  ;;  %2930 = vmatprep.subr.bf16.mxu1 %v1208_v31  ;;  %v1263_v3 = vunpack.c.h.s8.bf16 %v479_v23  ;;  %v1270_v31 = vunpack.c.l.s8.bf16 %v486_v27  ;;  %v1272_v33 = vunpack.c.l.s8.bf16 %v488_v28  ;;  %v511_v23 = vld [vmem:[#allocation5 + $0x970] sm:$0xff] }
 0x3aa   :  { %2587 = vmatpush1.bf16.msra.mxu0 %v1205_v39  ;;  %2931 = vmatpush1.bf16.msra.mxu1 %v1207_v40  ;;  %v1269_v39 = vunpack.c.l.s8.bf16 %v485_v35 }
 0x3ab   :  { %2588 = vmatprep.subr.bf16.mxu0 %v1214_v12  ;;  %2932 = vmatprep.subr.bf16.mxu1 %v1216_v42  ;;  %v1278_v12 = vunpack.c.h.s8.bf16 %v486_v27  ;;  %v1280_v42 = vunpack.c.h.s8.bf16 %v488_v28  ;;  %v518_v27 = vld [vmem:[#allocation5 + $0x9a8] sm:$0xff]  ;;  %v520_v28 = vld [vmem:[#allocation5 + $0x9b8] sm:$0xff] }
 0x3ae   :  { %2589 = vmatpush1.bf16.msra.mxu0 %v1213_v49  ;;  %2933 = vmatpush1.bf16.msra.mxu1 %v1215_v50  ;;  %v1277_v49 = vunpack.c.h.s8.bf16 %v485_v35  ;;  %v517_v35 = vld [vmem:[#allocation5 + $0x9a0] sm:$0xff] }
 0x3af   :  { %2590 = vmatprep.subr.bf16.mxu0 %v1222_v54  ;;  %2934 = vmatprep.subr.bf16.mxu1 %v1224_v44  ;;  %v1286_v54 = vunpack.c.l.s8.bf16 %v494_v43  ;;  %v1288_v44 = vunpack.c.l.s8.bf16 %v496_v47 }
 0x3b2   :  { %2591 = vmatpush1.bf16.msra.mxu0 %v1221_v58  ;;  %2935 = vmatpush1.bf16.msra.mxu1 %v1223_v59  ;;  %v1285_v58 = vunpack.c.l.s8.bf16 %v493_v57  ;;  %v1287_v59 = vunpack.c.l.s8.bf16 %v495_v30 }
 0x3b3   :  { %2592 = vmatprep.subr.bf16.mxu0 %v1230_v60  ;;  %2936 = vmatprep.subr.bf16.mxu1 %v1232_v61  ;;  %v1294_v60 = vunpack.c.h.s8.bf16 %v494_v43  ;;  %v1296_v61 = vunpack.c.h.s8.bf16 %v496_v47  ;;  %v526_v43 = vld [vmem:[#allocation5 + $0x9e8] sm:$0xff]  ;;  %v528_v47 = vld [vmem:[#allocation5 + $0x9f8] sm:$0xff] }
 0x3b6   :  { %2593 = vmatpush1.bf16.msra.mxu0 %v1229_v1  ;;  %2937 = vmatpush1.bf16.msra.mxu1 %v1231_v53  ;;  %v1293_v1 = vunpack.c.h.s8.bf16 %v493_v57  ;;  %v1295_v53 = vunpack.c.h.s8.bf16 %v495_v30  ;;  %v525_v57 = vld [vmem:[#allocation5 + $0x9e0] sm:$0xff]  ;;  %v527_v30 = vld [vmem:[#allocation5 + $0x9f0] sm:$0xff] }
 0x3b7   :  { %2605 = vmatprep.subr.bf16.mxu0 %v1238_v5  ;;  %2949 = vmatprep.subr.bf16.mxu1 %v1240_v2  ;;  %v1302_v5 = vunpack.c.l.s8.bf16 %v502_v63  ;;  %v1304_v2 = vunpack.c.l.s8.bf16 %v504_v0 }
 0x3b9   :  { %2595 = vmatmul.mubr.bf16.vlgmr.msra.gmra.mrb[4].mxu0 %v4939_v52  ;;  %2939 = vmatmul.mubr.bf16.vlgmr.msra.gmra.mrb[4].mxu1 %v4939_v52  ;;  %v1262_v52 = vunpack.c.h.s8.bf16 %v478_v15  ;;  %v510_v15 = vld [vmem:[#allocation5 + $0x968] sm:$0xff] }
 0x3ba   :  { %2606 = vmatpush1.bf16.msra.mxu0 %v1237_v10  ;;  %2950 = vmatpush1.bf16.msra.mxu1 %v1239_v11  ;;  %v1301_v10 = vunpack.c.l.s8.bf16 %v501_v6  ;;  %v1303_v11 = vunpack.c.l.s8.bf16 %v503_v7 }
 0x3bb   :  { %2607 = vmatprep.subr.bf16.mxu0 %v1246_v13  ;;  %2951 = vmatprep.subr.bf16.mxu1 %v1248_v14  ;;  %v1310_v13 = vunpack.c.h.s8.bf16 %v502_v63  ;;  %v1312_v14 = vunpack.c.h.s8.bf16 %v504_v0  ;;  %v534_v63 = vld [vmem:[#allocation5 + $0xa28] sm:$0xff]  ;;  %v536_v0 = vld [vmem:[#allocation5 + $0xa38] sm:$0xff] }
 0x3bc   :  { %2637 = vmatprep.mubr.bf16.mxu0 %v4941_v62  ;;  %2981 = vmatprep.mubr.bf16.mxu1 %v4941_v62  ;;  %v487_v62 = vld [vmem:[#allocation5 + $0x8b0] sm:$0xff] }
 0x3bd   :  { %v1271_v40 = vunpack.c.l.s8.bf16 %v487_v62  ;;  %v1279_v50 = vunpack.c.h.s8.bf16 %v487_v62  ;;  %v519_v62 = vld [vmem:[#allocation5 + $0x9b0] sm:$0xff] }
 0x3be   :  { %2608 = vmatpush1.bf16.msra.mxu0 %v1245_v17  ;;  %2952 = vmatpush1.bf16.msra.mxu1 %v1247_v18  ;;  %v1309_v17 = vunpack.c.h.s8.bf16 %v501_v6  ;;  %v1311_v18 = vunpack.c.h.s8.bf16 %v503_v7  ;;  %v533_v6 = vld [vmem:[#allocation5 + $0xa20] sm:$0xff]  ;;  %v535_v7 = vld [vmem:[#allocation5 + $0xa30] sm:$0xff] }
 0x3bf   :  { %2609 = vmatprep.subr.bf16.mxu0 %v1254_v19  ;;  %2953 = vmatprep.subr.bf16.mxu1 %v1256_v20  ;;  %v1318_v19 = vunpack.c.l.s8.bf16 %v510_v15  ;;  %v1320_v20 = vunpack.c.l.s8.bf16 %v512_v16 }
 0x3c2   :  { %2610 = vmatpush1.bf16.msra.mxu0 %v1253_v24  ;;  %2954 = vmatpush1.bf16.msra.mxu1 %v1255_v25  ;;  %v1317_v24 = vunpack.c.l.s8.bf16 %v509_v22  ;;  %v1319_v25 = vunpack.c.l.s8.bf16 %v511_v23 }
 0x3c3   :  { %2611 = vmatprep.subr.bf16.mxu0 %v1262_v52  ;;  %2955 = vmatprep.subr.bf16.mxu1 %v1264_v26  ;;  %v1326_v52 = vunpack.c.h.s8.bf16 %v510_v15  ;;  %v1328_v26 = vunpack.c.h.s8.bf16 %v512_v16  ;;  %v542_v15 = vld [vmem:[#allocation5 + $0xa68] sm:$0xff]  ;;  %v544_v16 = vld [vmem:[#allocation5 + $0xa78] sm:$0xff] }
 0x3c6   :  { %2612 = vmatpush1.bf16.msra.mxu0 %v1261_v29  ;;  %2956 = vmatpush1.bf16.msra.mxu1 %v1263_v3  ;;  %v1325_v29 = vunpack.c.h.s8.bf16 %v509_v22  ;;  %v1327_v3 = vunpack.c.h.s8.bf16 %v511_v23  ;;  %v541_v22 = vld [vmem:[#allocation5 + $0xa60] sm:$0xff]  ;;  %v543_v23 = vld [vmem:[#allocation5 + $0xa70] sm:$0xff] }
 0x3c7   :  { %2613 = vmatprep.subr.bf16.mxu0 %v1270_v31  ;;  %2957 = vmatprep.subr.bf16.mxu1 %v1272_v33  ;;  %v1334_v31 = vunpack.c.l.s8.bf16 %v518_v27  ;;  %v1336_v33 = vunpack.c.l.s8.bf16 %v520_v28 }
 0x3ca   :  { %2614 = vmatpush1.bf16.msra.mxu0 %v1269_v39  ;;  %2958 = vmatpush1.bf16.msra.mxu1 %v1271_v40  ;;  %v1333_v39 = vunpack.c.l.s8.bf16 %v517_v35  ;;  %v1335_v40 = vunpack.c.l.s8.bf16 %v519_v62 }
 0x3cb   :  { %2615 = vmatprep.subr.bf16.mxu0 %v1278_v12  ;;  %2959 = vmatprep.subr.bf16.mxu1 %v1280_v42  ;;  %v1342_v12 = vunpack.c.h.s8.bf16 %v518_v27  ;;  %v1344_v42 = vunpack.c.h.s8.bf16 %v520_v28  ;;  %v552_v27 = vld [vmem:[#allocation5 + $0xab8] sm:$0xff]  ;;  %v1389_v28 = vunpack.c.h.s8.bf16 %v541_v22 }
 0x3ce   :  { %2616 = vmatpush1.bf16.msra.mxu0 %v1277_v49  ;;  %2960 = vmatpush1.bf16.msra.mxu1 %v1279_v50  ;;  %v1341_v49 = vunpack.c.h.s8.bf16 %v517_v35  ;;  %v1343_v50 = vunpack.c.h.s8.bf16 %v519_v62 }
 0x3cf   :  { %2617 = vmatprep.subr.bf16.mxu0 %v1286_v54  ;;  %2961 = vmatprep.subr.bf16.mxu1 %v1288_v44  ;;  %v1350_v54 = vunpack.c.l.s8.bf16 %v526_v43  ;;  %v1352_v44 = vunpack.c.l.s8.bf16 %v528_v47 }
 0x3d2   :  { %2618 = vmatpush1.bf16.msra.mxu0 %v1285_v58  ;;  %2962 = vmatpush1.bf16.msra.mxu1 %v1287_v59  ;;  %v1349_v58 = vunpack.c.l.s8.bf16 %v525_v57  ;;  %v1351_v59 = vunpack.c.l.s8.bf16 %v527_v30 }
 0x3d3   :  { %2619 = vmatprep.subr.bf16.mxu0 %v1294_v60  ;;  %2963 = vmatprep.subr.bf16.mxu1 %v1296_v61  ;;  %v1358_v60 = vunpack.c.h.s8.bf16 %v526_v43  ;;  %v1360_v61 = vunpack.c.h.s8.bf16 %v528_v47 }
 0x3d6   :  { %2620 = vmatpush1.bf16.msra.mxu0 %v1293_v1  ;;  %2964 = vmatpush1.bf16.msra.mxu1 %v1295_v53  ;;  %v1357_v1 = vunpack.c.h.s8.bf16 %v525_v57  ;;  %v1359_v53 = vunpack.c.h.s8.bf16 %v527_v30 }
 0x3d7   :  { %2621 = vmatprep.subr.bf16.mxu0 %v1302_v5  ;;  %2965 = vmatprep.subr.bf16.mxu1 %v1304_v2  ;;  %v1366_v5 = vunpack.c.l.s8.bf16 %v534_v63  ;;  %v1368_v2 = vunpack.c.l.s8.bf16 %v536_v0 }
 0x3da   :  { %2622 = vmatpush1.bf16.msra.mxu0 %v1301_v10  ;;  %2966 = vmatpush1.bf16.msra.mxu1 %v1303_v11  ;;  %v1365_v10 = vunpack.c.l.s8.bf16 %v533_v6  ;;  %v1367_v11 = vunpack.c.l.s8.bf16 %v535_v7 }
 0x3db   :  { %2623 = vmatprep.subr.bf16.mxu0 %v1310_v13  ;;  %2967 = vmatprep.subr.bf16.mxu1 %v1312_v14  ;;  %v1374_v13 = vunpack.c.h.s8.bf16 %v534_v63  ;;  %v1376_v14 = vunpack.c.h.s8.bf16 %v536_v0 }
 0x3de   :  { %2624 = vmatpush1.bf16.msra.mxu0 %v1309_v17  ;;  %2968 = vmatpush1.bf16.msra.mxu1 %v1311_v18  ;;  %v1373_v17 = vunpack.c.h.s8.bf16 %v533_v6  ;;  %v1375_v18 = vunpack.c.h.s8.bf16 %v535_v7 }
 0x3df   :  { %2625 = vmatprep.subr.bf16.mxu0 %v1318_v19  ;;  %2969 = vmatprep.subr.bf16.mxu1 %v1320_v20  ;;  %v1382_v19 = vunpack.c.l.s8.bf16 %v542_v15  ;;  %v1384_v20 = vunpack.c.l.s8.bf16 %v544_v16 }
 0x3e2   :  { %2626 = vmatpush1.bf16.msra.mxu0 %v1317_v24  ;;  %2970 = vmatpush1.bf16.msra.mxu1 %v1319_v25  ;;  %v1381_v24 = vunpack.c.l.s8.bf16 %v541_v22  ;;  %v1383_v25 = vunpack.c.l.s8.bf16 %v543_v23 }
 0x3e3   :  { %2627 = vmatprep.subr.bf16.mxu0 %v1326_v52  ;;  %2971 = vmatprep.subr.bf16.mxu1 %v1328_v26  ;;  %v1392_v52 = vunpack.c.h.s8.bf16 %v544_v16  ;;  %v550_v26 = vld [vmem:[#allocation5 + $0xaa8] sm:$0xff] }
 0x3e6   :  { %2628 = vmatpush1.bf16.msra.mxu0 %v1325_v29  ;;  %2972 = vmatpush1.bf16.msra.mxu1 %v1327_v3  ;;  %v1391_v29 = vunpack.c.h.s8.bf16 %v543_v23  ;;  %v1398_v3 = vunpack.c.l.s8.bf16 %v550_v26 }
 0x3e7   :  { %2629 = vmatprep.subr.bf16.mxu0 %v1334_v31  ;;  %2973 = vmatprep.subr.bf16.mxu1 %v1336_v33  ;;  %v1400_v31 = vunpack.c.l.s8.bf16 %v552_v27  ;;  %v549_v33 = vld [vmem:[#allocation5 + $0xaa0] sm:$0xff] }
 0x3e8   :  { %v1397_v35 = vunpack.c.l.s8.bf16 %v549_v33  ;;  %v1405_v43 = vunpack.c.h.s8.bf16 %v549_v33 }
 0x3ea   :  { %2630 = vmatpush1.bf16.msra.mxu0 %v1333_v39  ;;  %2974 = vmatpush1.bf16.msra.mxu1 %v1335_v40  ;;  %v1406_v39 = vunpack.c.h.s8.bf16 %v550_v26  ;;  %v1408_v40 = vunpack.c.h.s8.bf16 %v552_v27 }
 0x3eb   :  { %2631 = vmatprep.subr.bf16.mxu0 %v1342_v12  ;;  %2975 = vmatprep.subr.bf16.mxu1 %v1344_v42  ;;  %v558_v12 = vld [vmem:[#allocation5 + $0xae8] sm:$0xff]  ;;  %v560_v42 = vld [vmem:[#allocation5 + $0xaf8] sm:$0xff] }
 0x3ee   :  { %2632 = vmatpush1.bf16.msra.mxu0 %v1341_v49  ;;  %2976 = vmatpush1.bf16.msra.mxu1 %v1343_v50  ;;  %v1414_v49 = vunpack.c.l.s8.bf16 %v558_v12  ;;  %v1416_v50 = vunpack.c.l.s8.bf16 %v560_v42 }
 0x3ef   :  { %2633 = vmatprep.subr.bf16.mxu0 %v1350_v54  ;;  %2977 = vmatprep.subr.bf16.mxu1 %v1352_v44  ;;  %v557_v54 = vld [vmem:[#allocation5 + $0xae0] sm:$0xff]  ;;  %v559_v44 = vld [vmem:[#allocation5 + $0xaf0] sm:$0xff] }
 0x3f0   :  { %v1413_v57 = vunpack.c.l.s8.bf16 %v557_v54  ;;  %v1415_v30 = vunpack.c.l.s8.bf16 %v559_v44  ;;  %v1421_v63 = vunpack.c.h.s8.bf16 %v557_v54  ;;  %v1423_v0 = vunpack.c.h.s8.bf16 %v559_v44 }
 0x3f2   :  { %2634 = vmatpush1.bf16.msra.mxu0 %v1349_v58  ;;  %2978 = vmatpush1.bf16.msra.mxu1 %v1351_v59  ;;  %v1422_v58 = vunpack.c.h.s8.bf16 %v558_v12  ;;  %v1424_v59 = vunpack.c.h.s8.bf16 %v560_v42 }
 0x3f3   :  { %2635 = vmatprep.subr.bf16.mxu0 %v1358_v60  ;;  %2979 = vmatprep.subr.bf16.mxu1 %v1360_v61  ;;  %v566_v60 = vld [vmem:[#allocation5 + $0xb28] sm:$0xff]  ;;  %v568_v61 = vld [vmem:[#allocation5 + $0xb38] sm:$0xff] }
 0x3f6   :  { %2636 = vmatpush1.bf16.msra.mxu0 %v1357_v1  ;;  %2980 = vmatpush1.bf16.msra.mxu1 %v1359_v53  ;;  %v1430_v1 = vunpack.c.l.s8.bf16 %v566_v60  ;;  %v1432_v53 = vunpack.c.l.s8.bf16 %v568_v61 }
 0x3f7   :  { %2648 = vmatprep.subr.bf16.mxu0 %v1366_v5  ;;  %2992 = vmatprep.subr.bf16.mxu1 %v1368_v2  ;;  %v565_v5 = vld [vmem:[#allocation5 + $0xb20] sm:$0xff]  ;;  %v567_v2 = vld [vmem:[#allocation5 + $0xb30] sm:$0xff] }
 0x3f8   :  { %v1429_v6 = vunpack.c.l.s8.bf16 %v565_v5  ;;  %v1431_v7 = vunpack.c.l.s8.bf16 %v567_v2  ;;  %v1439_v16 = vunpack.c.h.s8.bf16 %v567_v2 }
 0x3f9   :  { %2638 = vmatmul.mubr.bf16.vlgmr.msra.gmra.mrb[4].mxu0 %v4947_v41  ;;  %2982 = vmatmul.mubr.bf16.vlgmr.msra.gmra.mrb[4].mxu1 %v4947_v41  ;;  %v1390_v41 = vunpack.c.h.s8.bf16 %v542_v15  ;;  %v1437_v15 = vunpack.c.h.s8.bf16 %v565_v5 }
 0x3fa   :  { %2649 = vmatpush1.bf16.msra.mxu0 %v1365_v10  ;;  %2993 = vmatpush1.bf16.msra.mxu1 %v1367_v11  ;;  %v1438_v10 = vunpack.c.h.s8.bf16 %v566_v60  ;;  %v1440_v11 = vunpack.c.h.s8.bf16 %v568_v61 }
 0x3fb   :  { %2650 = vmatprep.subr.bf16.mxu0 %v1374_v13  ;;  %2994 = vmatprep.subr.bf16.mxu1 %v1376_v14  ;;  %v574_v13 = vld [vmem:[#allocation5 + $0xb68] sm:$0xff]  ;;  %v576_v14 = vld [vmem:[#allocation5 + $0xb78] sm:$0xff] }
 0x3fc   :  { %2680 = vmatprep.mubr.bf16.mxu0 %v4949_v51  ;;  %3024 = vmatprep.mubr.bf16.mxu1 %v4949_v51  ;;  %v551_v51 = vld [vmem:[#allocation5 + $0xab0] sm:$0xff] }
 0x3fd   :  { %v1399_v62 = vunpack.c.l.s8.bf16 %v551_v51  ;;  %v1407_v47 = vunpack.c.h.s8.bf16 %v551_v51 }
 0x3fe   :  { %2651 = vmatpush1.bf16.msra.mxu0 %v1373_v17  ;;  %2995 = vmatpush1.bf16.msra.mxu1 %v1375_v18  ;;  %v1446_v17 = vunpack.c.l.s8.bf16 %v574_v13  ;;  %v1448_v18 = vunpack.c.l.s8.bf16 %v576_v14 }
 0x3ff   :  { %2652 = vmatprep.subr.bf16.mxu0 %v1382_v19  ;;  %2996 = vmatprep.subr.bf16.mxu1 %v1384_v20  ;;  %v573_v19 = vld [vmem:[#allocation5 + $0xb60] sm:$0xff]  ;;  %v575_v20 = vld [vmem:[#allocation5 + $0xb70] sm:$0xff] }
 0x400   :  { %v1445_v22 = vunpack.c.l.s8.bf16 %v573_v19  ;;  %v1447_v23 = vunpack.c.l.s8.bf16 %v575_v20  ;;  %v1453_v26 = vunpack.c.h.s8.bf16 %v573_v19  ;;  %v1455_v27 = vunpack.c.h.s8.bf16 %v575_v20 }
 0x402   :  { %2653 = vmatpush1.bf16.msra.mxu0 %v1381_v24  ;;  %2997 = vmatpush1.bf16.msra.mxu1 %v1383_v25  ;;  %v1454_v24 = vunpack.c.h.s8.bf16 %v574_v13  ;;  %v1456_v25 = vunpack.c.h.s8.bf16 %v576_v14 }
 0x403   :  { %2654 = vmatprep.subr.bf16.mxu0 %v1390_v41  ;;  %2998 = vmatprep.subr.bf16.mxu1 %v1392_v52  ;;  %v582_v41 = vld [vmem:[#allocation5 + $0xba8] sm:$0xff]  ;;  %v584_v52 = vld [vmem:[#allocation5 + $0xbb8] sm:$0xff] }
 0x406   :  { %2655 = vmatpush1.bf16.msra.mxu0 %v1389_v28  ;;  %2999 = vmatpush1.bf16.msra.mxu1 %v1391_v29  ;;  %v1462_v28 = vunpack.c.l.s8.bf16 %v582_v41  ;;  %v1464_v29 = vunpack.c.l.s8.bf16 %v584_v52 }
 0x407   :  { %2656 = vmatprep.subr.bf16.mxu0 %v1398_v3  ;;  %3000 = vmatprep.subr.bf16.mxu1 %v1400_v31  ;;  %v581_v3 = vld [vmem:[#allocation5 + $0xba0] sm:$0xff]  ;;  %v583_v31 = vld [vmem:[#allocation5 + $0xbb0] sm:$0xff] }
 0x408   :  { %v1461_v33 = vunpack.c.l.s8.bf16 %v581_v3  ;;  %v1463_v51 = vunpack.c.l.s8.bf16 %v583_v31  ;;  %v1469_v12 = vunpack.c.h.s8.bf16 %v581_v3  ;;  %v1471_v42 = vunpack.c.h.s8.bf16 %v583_v31 }
 0x40a   :  { %2657 = vmatpush1.bf16.msra.mxu0 %v1397_v35  ;;  %3001 = vmatpush1.bf16.msra.mxu1 %v1399_v62  ;;  %v1470_v35 = vunpack.c.h.s8.bf16 %v582_v41  ;;  %v1472_v62 = vunpack.c.h.s8.bf16 %v584_v52 }
 0x40b   :  { %2658 = vmatprep.subr.bf16.mxu0 %v1406_v39  ;;  %3002 = vmatprep.subr.bf16.mxu1 %v1408_v40  ;;  %v590_v39 = vld [vmem:[#allocation5 + $0xbe8] sm:$0xff]  ;;  %v592_v40 = vld [vmem:[#allocation5 + $0xbf8] sm:$0xff] }
 0x40e   :  { %2659 = vmatpush1.bf16.msra.mxu0 %v1405_v43  ;;  %3003 = vmatpush1.bf16.msra.mxu1 %v1407_v47  ;;  %v1478_v43 = vunpack.c.l.s8.bf16 %v590_v39  ;;  %v1480_v47 = vunpack.c.l.s8.bf16 %v592_v40 }
 0x40f   :  { %2660 = vmatprep.subr.bf16.mxu0 %v1414_v49  ;;  %3004 = vmatprep.subr.bf16.mxu1 %v1416_v50  ;;  %v589_v49 = vld [vmem:[#allocation5 + $0xbe0] sm:$0xff]  ;;  %v591_v50 = vld [vmem:[#allocation5 + $0xbf0] sm:$0xff] }
 0x410   :  { %v1477_v54 = vunpack.c.l.s8.bf16 %v589_v49  ;;  %v1479_v44 = vunpack.c.l.s8.bf16 %v591_v50  ;;  %v1485_v60 = vunpack.c.h.s8.bf16 %v589_v49  ;;  %v1487_v61 = vunpack.c.h.s8.bf16 %v591_v50 }
 0x412   :  { %2661 = vmatpush1.bf16.msra.mxu0 %v1413_v57  ;;  %3005 = vmatpush1.bf16.msra.mxu1 %v1415_v30  ;;  %v1486_v57 = vunpack.c.h.s8.bf16 %v590_v39  ;;  %v1488_v30 = vunpack.c.h.s8.bf16 %v592_v40 }
 0x413   :  { %2662 = vmatprep.subr.bf16.mxu0 %v1422_v58  ;;  %3006 = vmatprep.subr.bf16.mxu1 %v1424_v59  ;;  %v598_v58 = vld [vmem:[#allocation5 + $0xc28] sm:$0xff]  ;;  %v600_v59 = vld [vmem:[#allocation5 + $0xc38] sm:$0xff] }
 0x416   :  { %2663 = vmatpush1.bf16.msra.mxu0 %v1421_v63  ;;  %3007 = vmatpush1.bf16.msra.mxu1 %v1423_v0  ;;  %v1494_v63 = vunpack.c.l.s8.bf16 %v598_v58  ;;  %v1496_v0 = vunpack.c.l.s8.bf16 %v600_v59 }
 0x417   :  { %2664 = vmatprep.subr.bf16.mxu0 %v1430_v1  ;;  %3008 = vmatprep.subr.bf16.mxu1 %v1432_v53  ;;  %v597_v1 = vld [vmem:[#allocation5 + $0xc20] sm:$0xff]  ;;  %v599_v53 = vld [vmem:[#allocation5 + $0xc30] sm:$0xff] }
 0x418   :  { %v1493_v5 = vunpack.c.l.s8.bf16 %v597_v1  ;;  %v1495_v2 = vunpack.c.l.s8.bf16 %v599_v53  ;;  %v1501_v13 = vunpack.c.h.s8.bf16 %v597_v1  ;;  %v1503_v14 = vunpack.c.h.s8.bf16 %v599_v53 }
 0x41a   :  { %2665 = vmatpush1.bf16.msra.mxu0 %v1429_v6  ;;  %3009 = vmatpush1.bf16.msra.mxu1 %v1431_v7  ;;  %v1502_v6 = vunpack.c.h.s8.bf16 %v598_v58  ;;  %v1504_v7 = vunpack.c.h.s8.bf16 %v600_v59 }
 0x41b   :  { %2666 = vmatprep.subr.bf16.mxu0 %v1438_v10  ;;  %3010 = vmatprep.subr.bf16.mxu1 %v1440_v11  ;;  %v606_v10 = vld [vmem:[#allocation5 + $0xc68] sm:$0xff]  ;;  %v608_v11 = vld [vmem:[#allocation5 + $0xc78] sm:$0xff] }
 0x41e   :  { %2667 = vmatpush1.bf16.msra.mxu0 %v1437_v15  ;;  %3011 = vmatpush1.bf16.msra.mxu1 %v1439_v16  ;;  %v1510_v15 = vunpack.c.l.s8.bf16 %v606_v10  ;;  %v1512_v16 = vunpack.c.l.s8.bf16 %v608_v11 }
 0x41f   :  { %2668 = vmatprep.subr.bf16.mxu0 %v1446_v17  ;;  %3012 = vmatprep.subr.bf16.mxu1 %v1448_v18  ;;  %v605_v17 = vld [vmem:[#allocation5 + $0xc60] sm:$0xff]  ;;  %v607_v18 = vld [vmem:[#allocation5 + $0xc70] sm:$0xff] }
 0x420   :  { %v1509_v19 = vunpack.c.l.s8.bf16 %v605_v17  ;;  %v1511_v20 = vunpack.c.l.s8.bf16 %v607_v18  ;;  %v1519_v41 = vunpack.c.h.s8.bf16 %v607_v18 }
 0x422   :  { %2669 = vmatpush1.bf16.msra.mxu0 %v1445_v22  ;;  %3013 = vmatpush1.bf16.msra.mxu1 %v1447_v23  ;;  %v1520_v22 = vunpack.c.h.s8.bf16 %v608_v11  ;;  %v614_v23 = vld [vmem:[#allocation5 + $0xca8] sm:$0xff] }
 0x423   :  { %2670 = vmatprep.subr.bf16.mxu0 %v1454_v24  ;;  %3014 = vmatprep.subr.bf16.mxu1 %v1456_v25  ;;  %v616_v24 = vld [vmem:[#allocation5 + $0xcb8] sm:$0xff]  ;;  %v1517_v25 = vunpack.c.h.s8.bf16 %v605_v17  ;;  %v1526_v52 = vunpack.c.l.s8.bf16 %v614_v23  ;;  %v1534_v3 = vunpack.c.h.s8.bf16 %v614_v23 }
 0x424   :  { %v1536_v31 = vunpack.c.h.s8.bf16 %v616_v24 }
 0x426   :  { %2671 = vmatpush1.bf16.msra.mxu0 %v1453_v26  ;;  %3015 = vmatpush1.bf16.msra.mxu1 %v1455_v27  ;;  %v1528_v26 = vunpack.c.l.s8.bf16 %v616_v24  ;;  %v613_v27 = vld [vmem:[#allocation5 + $0xca0] sm:$0xff] }
 0x427   :  { %2672 = vmatprep.subr.bf16.mxu0 %v1462_v28  ;;  %3016 = vmatprep.subr.bf16.mxu1 %v1464_v29  ;;  %v1525_v28 = vunpack.c.l.s8.bf16 %v613_v27 }
 0x42a   :  { %2673 = vmatpush1.bf16.msra.mxu0 %v1461_v33  ;;  %3017 = vmatpush1.bf16.msra.mxu1 %v1463_v51  ;;  %v622_v33 = vld [vmem:[#allocation5 + $0xce8] sm:$0xff]  ;;  %v624_v51 = vld [vmem:[#allocation5 + $0xcf8] sm:$0xff] }
 0x42b   :  { %2674 = vmatprep.subr.bf16.mxu0 %v1470_v35  ;;  %3018 = vmatprep.subr.bf16.mxu1 %v1472_v62  ;;  %v1533_v35 = vunpack.c.h.s8.bf16 %v613_v27  ;;  %v1542_v39 = vunpack.c.l.s8.bf16 %v622_v33  ;;  %v1544_v40 = vunpack.c.l.s8.bf16 %v624_v51  ;;  %v1550_v49 = vunpack.c.h.s8.bf16 %v622_v33 }
 0x42c   :  { %v1552_v50 = vunpack.c.h.s8.bf16 %v624_v51 }
 0x42e   :  { %2675 = vmatpush1.bf16.msra.mxu0 %v1469_v12  ;;  %3019 = vmatpush1.bf16.msra.mxu1 %v1471_v42  ;;  %v621_v12 = vld [vmem:[#allocation5 + $0xce0] sm:$0xff]  ;;  %v623_v42 = vld [vmem:[#allocation5 + $0xcf0] sm:$0xff] }
 0x42f   :  { %2676 = vmatprep.subr.bf16.mxu0 %v1478_v43  ;;  %3020 = vmatprep.subr.bf16.mxu1 %v1480_v47  ;;  %v1541_v43 = vunpack.c.l.s8.bf16 %v621_v12  ;;  %v1543_v47 = vunpack.c.l.s8.bf16 %v623_v42 }
 0x432   :  { %2677 = vmatpush1.bf16.msra.mxu0 %v1477_v54  ;;  %3021 = vmatpush1.bf16.msra.mxu1 %v1479_v44  ;;  %v630_v54 = vld [vmem:[#allocation5 + $0xd28] sm:$0xff]  ;;  %v632_v44 = vld [vmem:[#allocation5 + $0xd38] sm:$0xff] }
 0x433   :  { %2678 = vmatprep.subr.bf16.mxu0 %v1486_v57  ;;  %3022 = vmatprep.subr.bf16.mxu1 %v1488_v30  ;;  %v1549_v57 = vunpack.c.h.s8.bf16 %v621_v12  ;;  %v1551_v30 = vunpack.c.h.s8.bf16 %v623_v42  ;;  %v1558_v58 = vunpack.c.l.s8.bf16 %v630_v54  ;;  %v1560_v59 = vunpack.c.l.s8.bf16 %v632_v44 }
 0x434   :  { %v1566_v1 = vunpack.c.h.s8.bf16 %v630_v54  ;;  %v1568_v53 = vunpack.c.h.s8.bf16 %v632_v44 }
 0x436   :  { %2679 = vmatpush1.bf16.msra.mxu0 %v1485_v60  ;;  %3023 = vmatpush1.bf16.msra.mxu1 %v1487_v61  ;;  %v629_v60 = vld [vmem:[#allocation5 + $0xd20] sm:$0xff]  ;;  %v631_v61 = vld [vmem:[#allocation5 + $0xd30] sm:$0xff] }
 0x437   :  { %2691 = vmatprep.subr.bf16.mxu0 %v1494_v63  ;;  %3035 = vmatprep.subr.bf16.mxu1 %v1496_v0  ;;  %v1557_v63 = vunpack.c.l.s8.bf16 %v629_v60  ;;  %v1559_v0 = vunpack.c.l.s8.bf16 %v631_v61 }
 0x439   :  { %2681 = vmatmul.mubr.bf16.vlgmr.msra.gmra.mrb[4].mxu0 %v4955_v34  ;;  %3025 = vmatmul.mubr.bf16.vlgmr.msra.gmra.mrb[4].mxu1 %v4955_v34  ;;  %v1518_v34 = vunpack.c.h.s8.bf16 %v606_v10 }
 0x43a   :  { %2692 = vmatpush1.bf16.msra.mxu0 %v1493_v5  ;;  %3036 = vmatpush1.bf16.msra.mxu1 %v1495_v2  ;;  %v638_v5 = vld [vmem:[#allocation5 + $0xd68] sm:$0xff]  ;;  %v640_v2 = vld [vmem:[#allocation5 + $0xd78] sm:$0xff] }
 0x43b   :  { %2693 = vmatprep.subr.bf16.mxu0 %v1502_v6  ;;  %3037 = vmatprep.subr.bf16.mxu1 %v1504_v7  ;;  %v1565_v6 = vunpack.c.h.s8.bf16 %v629_v60  ;;  %v1567_v7 = vunpack.c.h.s8.bf16 %v631_v61  ;;  %v1574_v10 = vunpack.c.l.s8.bf16 %v638_v5  ;;  %v1576_v11 = vunpack.c.l.s8.bf16 %v640_v2 }
 0x43c   :  { %2723 = vmatprep.mubr.bf16.mxu0 %v4957_v46  ;;  %3067 = vmatprep.mubr.bf16.mxu1 %v4957_v46  ;;  %v615_v46 = vld [vmem:[#allocation5 + $0xcb0] sm:$0xff]  ;;  %v1582_v17 = vunpack.c.h.s8.bf16 %v638_v5  ;;  %v1584_v18 = vunpack.c.h.s8.bf16 %v640_v2 }
 0x43d   :  { %v1527_v29 = vunpack.c.l.s8.bf16 %v615_v46  ;;  %v1535_v62 = vunpack.c.h.s8.bf16 %v615_v46 }
 0x43e   :  { %2694 = vmatpush1.bf16.msra.mxu0 %v1501_v13  ;;  %3038 = vmatpush1.bf16.msra.mxu1 %v1503_v14  ;;  %v637_v13 = vld [vmem:[#allocation5 + $0xd60] sm:$0xff]  ;;  %v639_v14 = vld [vmem:[#allocation5 + $0xd70] sm:$0xff] }
 0x43f   :  { %2695 = vmatprep.subr.bf16.mxu0 %v1510_v15  ;;  %3039 = vmatprep.subr.bf16.mxu1 %v1512_v16  ;;  %v1573_v15 = vunpack.c.l.s8.bf16 %v637_v13  ;;  %v1575_v16 = vunpack.c.l.s8.bf16 %v639_v14 }
 0x442   :  { %2696 = vmatpush1.bf16.msra.mxu0 %v1509_v19  ;;  %3040 = vmatpush1.bf16.msra.mxu1 %v1511_v20  ;;  %v646_v19 = vld [vmem:[#allocation5 + $0xda8] sm:$0xff]  ;;  %v648_v20 = vld [vmem:[#allocation5 + $0xdb8] sm:$0xff] }
 0x443   :  { %2697 = vmatprep.subr.bf16.mxu0 %v1518_v34  ;;  %3041 = vmatprep.subr.bf16.mxu1 %v1520_v22  ;;  %v1581_v34 = vunpack.c.h.s8.bf16 %v637_v13  ;;  %v1583_v22 = vunpack.c.h.s8.bf16 %v639_v14  ;;  %v1590_v23 = vunpack.c.l.s8.bf16 %v646_v19  ;;  %v1592_v24 = vunpack.c.l.s8.bf16 %v648_v20  ;;  %v678_v14 = vld [vmem:[#allocation5 + $0xea8] sm:$0xff] }
 0x444   :  { %v1598_v27 = vunpack.c.h.s8.bf16 %v646_v19  ;;  %v1600_v46 = vunpack.c.h.s8.bf16 %v648_v20  ;;  %v677_v20 = vld [vmem:[#allocation5 + $0xea0] sm:$0xff] }
 0x446   :  { %2698 = vmatpush1.bf16.msra.mxu0 %v1517_v25  ;;  %3042 = vmatpush1.bf16.msra.mxu1 %v1519_v41  ;;  %v645_v25 = vld [vmem:[#allocation5 + $0xda0] sm:$0xff]  ;;  %v647_v41 = vld [vmem:[#allocation5 + $0xdb0] sm:$0xff] }
 0x447   :  { %2699 = vmatprep.subr.bf16.mxu0 %v1526_v52  ;;  %3043 = vmatprep.subr.bf16.mxu1 %v1528_v26  ;;  %v1589_v52 = vunpack.c.l.s8.bf16 %v645_v25  ;;  %v1591_v26 = vunpack.c.l.s8.bf16 %v647_v41 }
 0x44a   :  { %2700 = vmatpush1.bf16.msra.mxu0 %v1525_v28  ;;  %3044 = vmatpush1.bf16.msra.mxu1 %v1527_v29  ;;  %v654_v28 = vld [vmem:[#allocation5 + $0xde8] sm:$0xff]  ;;  %v656_v29 = vld [vmem:[#allocation5 + $0xdf8] sm:$0xff] }
 0x44b   :  { %2701 = vmatprep.subr.bf16.mxu0 %v1534_v3  ;;  %3045 = vmatprep.subr.bf16.mxu1 %v1536_v31  ;;  %v1597_v3 = vunpack.c.h.s8.bf16 %v645_v25  ;;  %v1599_v31 = vunpack.c.h.s8.bf16 %v647_v41  ;;  %v1606_v33 = vunpack.c.l.s8.bf16 %v654_v28  ;;  %v1608_v51 = vunpack.c.l.s8.bf16 %v656_v29  ;;  %v686_v25 = vld [vmem:[#allocation5 + $0xee8] sm:$0xff]  ;;  %v688_v41 = vld [vmem:[#allocation5 + $0xef8] sm:$0xff] }
 0x44c   :  { %v1614_v12 = vunpack.c.h.s8.bf16 %v654_v28  ;;  %v1616_v42 = vunpack.c.h.s8.bf16 %v656_v29  ;;  %v685_v28 = vld [vmem:[#allocation5 + $0xee0] sm:$0xff]  ;;  %v687_v29 = vld [vmem:[#allocation5 + $0xef0] sm:$0xff] }
 0x44e   :  { %2702 = vmatpush1.bf16.msra.mxu0 %v1533_v35  ;;  %3046 = vmatpush1.bf16.msra.mxu1 %v1535_v62  ;;  %v653_v35 = vld [vmem:[#allocation5 + $0xde0] sm:$0xff]  ;;  %v655_v62 = vld [vmem:[#allocation5 + $0xdf0] sm:$0xff] }
 0x44f   :  { %2703 = vmatprep.subr.bf16.mxu0 %v1542_v39  ;;  %3047 = vmatprep.subr.bf16.mxu1 %v1544_v40  ;;  %v1605_v39 = vunpack.c.l.s8.bf16 %v653_v35  ;;  %v1607_v40 = vunpack.c.l.s8.bf16 %v655_v62 }
 0x452   :  { %2704 = vmatpush1.bf16.msra.mxu0 %v1541_v43  ;;  %3048 = vmatpush1.bf16.msra.mxu1 %v1543_v47  ;;  %v662_v43 = vld [vmem:[#allocation5 + $0xe28] sm:$0xff]  ;;  %v664_v47 = vld [vmem:[#allocation5 + $0xe38] sm:$0xff] }
 0x453   :  { %2705 = vmatprep.subr.bf16.mxu0 %v1550_v49  ;;  %3049 = vmatprep.subr.bf16.mxu1 %v1552_v50  ;;  %v1613_v49 = vunpack.c.h.s8.bf16 %v653_v35  ;;  %v1615_v50 = vunpack.c.h.s8.bf16 %v655_v62  ;;  %v1622_v54 = vunpack.c.l.s8.bf16 %v662_v43  ;;  %v1624_v44 = vunpack.c.l.s8.bf16 %v664_v47  ;;  %v694_v35 = vld [vmem:[#allocation5 + $0xf28] sm:$0xff]  ;;  %v696_v62 = vld [vmem:[#allocation5 + $0xf38] sm:$0xff] }
 0x454   :  { %v1630_v60 = vunpack.c.h.s8.bf16 %v662_v43  ;;  %v1632_v61 = vunpack.c.h.s8.bf16 %v664_v47  ;;  %v693_v43 = vld [vmem:[#allocation5 + $0xf20] sm:$0xff]  ;;  %v695_v47 = vld [vmem:[#allocation5 + $0xf30] sm:$0xff] }
 0x456   :  { %2706 = vmatpush1.bf16.msra.mxu0 %v1549_v57  ;;  %3050 = vmatpush1.bf16.msra.mxu1 %v1551_v30  ;;  %v661_v57 = vld [vmem:[#allocation5 + $0xe20] sm:$0xff]  ;;  %v663_v30 = vld [vmem:[#allocation5 + $0xe30] sm:$0xff] }
 0x457   :  { %2707 = vmatprep.subr.bf16.mxu0 %v1558_v58  ;;  %3051 = vmatprep.subr.bf16.mxu1 %v1560_v59  ;;  %v1621_v58 = vunpack.c.l.s8.bf16 %v661_v57  ;;  %v1623_v59 = vunpack.c.l.s8.bf16 %v663_v30 }
 0x45a   :  { %2708 = vmatpush1.bf16.msra.mxu0 %v1557_v63  ;;  %3052 = vmatpush1.bf16.msra.mxu1 %v1559_v0  ;;  %v670_v63 = vld [vmem:[#allocation5 + $0xe68] sm:$0xff]  ;;  %v672_v0 = vld [vmem:[#allocation5 + $0xe78] sm:$0xff] }
 0x45b   :  { %2709 = vmatprep.subr.bf16.mxu0 %v1566_v1  ;;  %3053 = vmatprep.subr.bf16.mxu1 %v1568_v53  ;;  %v1629_v1 = vunpack.c.h.s8.bf16 %v661_v57  ;;  %v1631_v53 = vunpack.c.h.s8.bf16 %v663_v30  ;;  %v1638_v5 = vunpack.c.l.s8.bf16 %v670_v63  ;;  %v1640_v2 = vunpack.c.l.s8.bf16 %v672_v0  ;;  %v702_v57 = vld [vmem:[#allocation5 + $0xf68] sm:$0xff]  ;;  %v704_v30 = vld [vmem:[#allocation5 + $0xf78] sm:$0xff] }
 0x45c   :  { %v1648_v13 = vunpack.c.h.s8.bf16 %v672_v0  ;;  %v703_v0 = vld [vmem:[#allocation5 + $0xf70] sm:$0xff] }
 0x45e   :  { %2710 = vmatpush1.bf16.msra.mxu0 %v1565_v6  ;;  %3054 = vmatpush1.bf16.msra.mxu1 %v1567_v7  ;;  %v669_v6 = vld [vmem:[#allocation5 + $0xe60] sm:$0xff]  ;;  %v671_v7 = vld [vmem:[#allocation5 + $0xe70] sm:$0xff] }
 0x45f   :  { %2711 = vmatprep.subr.bf16.mxu0 %v1574_v10  ;;  %3055 = vmatprep.subr.bf16.mxu1 %v1576_v11  ;;  %v1637_v10 = vunpack.c.l.s8.bf16 %v669_v6  ;;  %v1639_v11 = vunpack.c.l.s8.bf16 %v671_v7 }
 0x462   :  { %2712 = vmatpush1.bf16.msra.mxu0 %v1573_v15  ;;  %3056 = vmatpush1.bf16.msra.mxu1 %v1575_v16  ;;  %v680_v15 = vld [vmem:[#allocation5 + $0xeb8] sm:$0xff]  ;;  %v1645_v16 = vunpack.c.h.s8.bf16 %v669_v6  ;;  %v710_v6 = vld [vmem:[#allocation5 + $0xfa8] sm:$0xff] }
 0x463   :  { %2713 = vmatprep.subr.bf16.mxu0 %v1582_v17  ;;  %3057 = vmatprep.subr.bf16.mxu1 %v1584_v18  ;;  %v1647_v17 = vunpack.c.h.s8.bf16 %v671_v7  ;;  %v1654_v18 = vunpack.c.l.s8.bf16 %v678_v14  ;;  %v1656_v19 = vunpack.c.l.s8.bf16 %v680_v15  ;;  %v712_v7 = vld [vmem:[#allocation5 + $0xfb8] sm:$0xff] }
 0x466   :  { %2714 = vmatpush1.bf16.msra.mxu0 %v1581_v34  ;;  %3058 = vmatpush1.bf16.msra.mxu1 %v1583_v22  ;;  %v1653_v34 = vunpack.c.l.s8.bf16 %v677_v20 }
 0x467   :  { %2715 = vmatprep.subr.bf16.mxu0 %v1590_v23  ;;  %3059 = vmatprep.subr.bf16.mxu1 %v1592_v24  ;;  %v1662_v23 = vunpack.c.h.s8.bf16 %v678_v14  ;;  %v1664_v24 = vunpack.c.h.s8.bf16 %v680_v15  ;;  %v709_v14 = vld [vmem:[#allocation5 + $0xfa0] sm:$0xff]  ;;  %v711_v15 = vld [vmem:[#allocation5 + $0xfb0] sm:$0xff] }
 0x46a   :  { %2716 = vmatpush1.bf16.msra.mxu0 %v1589_v52  ;;  %3060 = vmatpush1.bf16.msra.mxu1 %v1591_v26  ;;  %v1661_v52 = vunpack.c.h.s8.bf16 %v677_v20  ;;  %v718_v20 = vld [vmem:[#allocation5 + $0xfe8] sm:$0xff] }
 0x46b   :  { %2717 = vmatprep.subr.bf16.mxu0 %v1598_v27  ;;  %3061 = vmatprep.subr.bf16.mxu1 %v1600_v46  ;;  %v1670_v27 = vunpack.c.l.s8.bf16 %v686_v25  ;;  %v1672_v46 = vunpack.c.l.s8.bf16 %v688_v41 }
 0x46e   :  { %2718 = vmatpush1.bf16.msra.mxu0 %v1597_v3  ;;  %3062 = vmatpush1.bf16.msra.mxu1 %v1599_v31  ;;  %v1669_v3 = vunpack.c.l.s8.bf16 %v685_v28  ;;  %v1671_v31 = vunpack.c.l.s8.bf16 %v687_v29 }
 0x46f   :  { %2719 = vmatprep.subr.bf16.mxu0 %v1606_v33  ;;  %3063 = vmatprep.subr.bf16.mxu1 %v1608_v51  ;;  %v1678_v33 = vunpack.c.h.s8.bf16 %v686_v25  ;;  %v1680_v51 = vunpack.c.h.s8.bf16 %v688_v41  ;;  %v717_v25 = vld [vmem:[#allocation5 + $0xfe0] sm:$0xff]  ;;  %v719_v41 = vld [vmem:[#allocation5 + $0xff0] sm:$0xff] }
 0x472   :  { %2720 = vmatpush1.bf16.msra.mxu0 %v1605_v39  ;;  %3064 = vmatpush1.bf16.msra.mxu1 %v1607_v40  ;;  %v1677_v39 = vunpack.c.h.s8.bf16 %v685_v28  ;;  %v1679_v40 = vunpack.c.h.s8.bf16 %v687_v29  ;;  %v3262_v28 = vld [vmem:[#allocation10 + $0x8] sm:$0xff]  ;;  %v3264_v29 = vld [vmem:[#allocation10 + $0x18] sm:$0xff] }
 0x473   :  { %2721 = vmatprep.subr.bf16.mxu0 %v1614_v12  ;;  %3065 = vmatprep.subr.bf16.mxu1 %v1616_v42  ;;  %v1686_v12 = vunpack.c.l.s8.bf16 %v694_v35  ;;  %v1688_v42 = vunpack.c.l.s8.bf16 %v696_v62 }
 0x476   :  { %2722 = vmatpush1.bf16.msra.mxu0 %v1613_v49  ;;  %3066 = vmatpush1.bf16.msra.mxu1 %v1615_v50  ;;  %v1685_v49 = vunpack.c.l.s8.bf16 %v693_v43  ;;  %v1687_v50 = vunpack.c.l.s8.bf16 %v695_v47 }
 0x477   :  { %2734 = vmatprep.subr.bf16.mxu0 %v1622_v54  ;;  %3078 = vmatprep.subr.bf16.mxu1 %v1624_v44  ;;  %v1694_v54 = vunpack.c.h.s8.bf16 %v694_v35  ;;  %v1696_v44 = vunpack.c.h.s8.bf16 %v696_v62  ;;  %v3261_v35 = vld [vmem:[#allocation10] sm:$0xff]  ;;  %v3263_v62 = vld [vmem:[#allocation10 + $0x10] sm:$0xff] }
 0x479   :  { %2724 = vmatmul.mubr.bf16.vlgmr.msra.gmra.mrb[4].mxu0 %v4963_v32  ;;  %3068 = vmatmul.mubr.bf16.vlgmr.msra.gmra.mrb[4].mxu1 %v4963_v32  ;;  %v1646_v32 = vunpack.c.h.s8.bf16 %v670_v63  ;;  %v701_v63 = vld [vmem:[#allocation5 + $0xf60] sm:$0xff] }
 0x47a   :  { %2735 = vmatpush1.bf16.msra.mxu0 %v1621_v58  ;;  %3079 = vmatpush1.bf16.msra.mxu1 %v1623_v59  ;;  %v1693_v58 = vunpack.c.h.s8.bf16 %v693_v43  ;;  %v1695_v59 = vunpack.c.h.s8.bf16 %v695_v47  ;;  %v3266_v43 = vld [vmem:[#allocation10 + $0x28] sm:$0xff]  ;;  %v3268_v47 = vld [vmem:[#allocation10 + $0x38] sm:$0xff] }
 0x47b   :  { %2736 = vmatprep.subr.bf16.mxu0 %v1630_v60  ;;  %3080 = vmatprep.subr.bf16.mxu1 %v1632_v61  ;;  %v1702_v60 = vunpack.c.l.s8.bf16 %v702_v57  ;;  %v1704_v61 = vunpack.c.l.s8.bf16 %v704_v30 }
 0x47c   :  { %2766 = vmatprep.mubr.bf16.mxu0 %v4965_v45  ;;  %3110 = vmatprep.mubr.bf16.mxu1 %v4965_v45  ;;  %v679_v45 = vld [vmem:[#allocation5 + $0xeb0] sm:$0xff] }
 0x47d   :  { %v1655_v22 = vunpack.c.l.s8.bf16 %v679_v45  ;;  %v1663_v26 = vunpack.c.h.s8.bf16 %v679_v45  ;;  %v720_v45 = vld [vmem:[#allocation5 + $0xff8] sm:$0xff] }
 0x47e   :  { %2737 = vmatpush1.bf16.msra.mxu0 %v1629_v1  ;;  %3081 = vmatpush1.bf16.msra.mxu1 %v1631_v53  ;;  %v1701_v1 = vunpack.c.l.s8.bf16 %v701_v63  ;;  %v1703_v53 = vunpack.c.l.s8.bf16 %v703_v0 }
 0x47f   :  { %2738 = vmatprep.subr.bf16.mxu0 %v1638_v5  ;;  %3082 = vmatprep.subr.bf16.mxu1 %v1640_v2  ;;  %v1710_v5 = vunpack.c.h.s8.bf16 %v702_v57  ;;  %v1712_v2 = vunpack.c.h.s8.bf16 %v704_v30  ;;  %v3400_v57 = vunpack.c.l.s8.bf16 %v3268_v47  ;;  %v3267_v30 = vld [vmem:[#allocation10 + $0x30] sm:$0xff] }
 0x482   :  { %2739 = vmatpush1.bf16.msra.mxu0 %v1637_v10  ;;  %3083 = vmatpush1.bf16.msra.mxu1 %v1639_v11  ;;  %v1709_v10 = vunpack.c.h.s8.bf16 %v701_v63  ;;  %v1711_v11 = vunpack.c.h.s8.bf16 %v703_v0  ;;  %v3272_v63 = vld [vmem:[#allocation10 + $0x58] sm:$0xff] }
 0x483   :  { %2740 = vmatprep.subr.bf16.mxu0 %v1646_v32  ;;  %3084 = vmatprep.subr.bf16.mxu1 %v1648_v13  ;;  %v1718_v32 = vunpack.c.l.s8.bf16 %v710_v6  ;;  %v1720_v13 = vunpack.c.l.s8.bf16 %v712_v7 }
 0x486   :  { %2741 = vmatpush1.bf16.msra.mxu0 %v1645_v16  ;;  %3085 = vmatpush1.bf16.msra.mxu1 %v1647_v17  ;;  %v1717_v16 = vunpack.c.l.s8.bf16 %v709_v14  ;;  %v1719_v17 = vunpack.c.l.s8.bf16 %v711_v15 }
 0x487   :  { %2742 = vmatprep.subr.bf16.mxu0 %v1654_v18  ;;  %3086 = vmatprep.subr.bf16.mxu1 %v1656_v19  ;;  %v1726_v18 = vunpack.c.h.s8.bf16 %v710_v6  ;;  %v1728_v19 = vunpack.c.h.s8.bf16 %v712_v7 }
 0x48a   :  { %2743 = vmatpush1.bf16.msra.mxu0 %v1653_v34  ;;  %3087 = vmatpush1.bf16.msra.mxu1 %v1655_v22  ;;  %v1725_v34 = vunpack.c.h.s8.bf16 %v709_v14  ;;  %v1727_v22 = vunpack.c.h.s8.bf16 %v711_v15 }
 0x48b   :  { %2744 = vmatprep.subr.bf16.mxu0 %v1662_v23  ;;  %3088 = vmatprep.subr.bf16.mxu1 %v1664_v24  ;;  %v1734_v23 = vunpack.c.l.s8.bf16 %v718_v20  ;;  %v1736_v24 = vunpack.c.l.s8.bf16 %v720_v45 }
 0x48e   :  { %2745 = vmatpush1.bf16.msra.mxu0 %v1661_v52  ;;  %3089 = vmatpush1.bf16.msra.mxu1 %v1663_v26  ;;  %v1733_v52 = vunpack.c.l.s8.bf16 %v717_v25  ;;  %v1735_v26 = vunpack.c.l.s8.bf16 %v719_v41 }
 0x48f   :  { %2746 = vmatprep.subr.bf16.mxu0 %v1670_v27  ;;  %3090 = vmatprep.subr.bf16.mxu1 %v1672_v46  ;;  %v1742_v27 = vunpack.c.h.s8.bf16 %v718_v20  ;;  %v1744_v46 = vunpack.c.h.s8.bf16 %v720_v45 }
 0x492   :  { %2747 = vmatpush1.bf16.msra.mxu0 %v1669_v3  ;;  %3091 = vmatpush1.bf16.msra.mxu1 %v1671_v31  ;;  %v1741_v3 = vunpack.c.h.s8.bf16 %v717_v25  ;;  %v1743_v31 = vunpack.c.h.s8.bf16 %v719_v41 }
 0x493   :  { %2748 = vmatprep.subr.bf16.mxu0 %v1678_v33  ;;  %3092 = vmatprep.subr.bf16.mxu1 %v1680_v51  ;;  %v3390_v33 = vunpack.c.l.s8.bf16 %v3262_v28  ;;  %v3392_v51 = vunpack.c.l.s8.bf16 %v3264_v29 }
 0x496   :  { %2749 = vmatpush1.bf16.msra.mxu0 %v1677_v39  ;;  %3093 = vmatpush1.bf16.msra.mxu1 %v1679_v40  ;;  %v3389_v39 = vunpack.c.l.s8.bf16 %v3261_v35  ;;  %v3391_v40 = vunpack.c.l.s8.bf16 %v3263_v62 }
 0x497   :  { %2750 = vmatprep.subr.bf16.mxu0 %v1686_v12  ;;  %3094 = vmatprep.subr.bf16.mxu1 %v1688_v42  ;;  %v3394_v12 = vunpack.c.h.s8.bf16 %v3262_v28  ;;  %v3396_v42 = vunpack.c.h.s8.bf16 %v3264_v29 }
 0x49a   :  { %2751 = vmatpush1.bf16.msra.mxu0 %v1685_v49  ;;  %3095 = vmatpush1.bf16.msra.mxu1 %v1687_v50  ;;  %v3393_v49 = vunpack.c.h.s8.bf16 %v3261_v35  ;;  %v3395_v50 = vunpack.c.h.s8.bf16 %v3263_v62 }
 0x49b   :  { %2752 = vmatprep.subr.bf16.mxu0 %v1694_v54  ;;  %3096 = vmatprep.subr.bf16.mxu1 %v1696_v44  ;;  %v3398_v54 = vunpack.c.l.s8.bf16 %v3266_v43  ;;  %v3265_v44 = vld [vmem:[#allocation10 + $0x20] sm:$0xff] }
 0x49c   :  { %v3401_v0 = vunpack.c.h.s8.bf16 %v3265_v44 }
 0x49e   :  { %2753 = vmatpush1.bf16.msra.mxu0 %v1693_v58  ;;  %3097 = vmatpush1.bf16.msra.mxu1 %v1695_v59  ;;  %v3397_v58 = vunpack.c.l.s8.bf16 %v3265_v44  ;;  %v3402_v59 = vunpack.c.h.s8.bf16 %v3266_v43  ;;  %v3288_v44 = vld [vmem:[#allocation10 + $0xd8] sm:$0xff] }
 0x49f   :  { %2754 = vmatprep.subr.bf16.mxu0 %v1702_v60  ;;  %3098 = vmatprep.subr.bf16.mxu1 %v1704_v61  ;;  %v3404_v60 = vunpack.c.h.s8.bf16 %v3268_v47  ;;  %v3270_v61 = vld [vmem:[#allocation10 + $0x48] sm:$0xff] }
 0x4a2   :  { %2755 = vmatpush1.bf16.msra.mxu0 %v1701_v1  ;;  %3099 = vmatpush1.bf16.msra.mxu1 %v1703_v53  ;;  %v3406_v1 = vunpack.c.l.s8.bf16 %v3270_v61  ;;  %v3269_v53 = vld [vmem:[#allocation10 + $0x40] sm:$0xff] }
 0x4a3   :  { %2756 = vmatprep.subr.bf16.mxu0 %v1710_v5  ;;  %3100 = vmatprep.subr.bf16.mxu1 %v1712_v2  ;;  %v3408_v5 = vunpack.c.l.s8.bf16 %v3272_v63  ;;  %v3271_v2 = vld [vmem:[#allocation10 + $0x50] sm:$0xff]  ;;  %v3405_v6 = vunpack.c.l.s8.bf16 %v3269_v53  ;;  %v3409_v14 = vunpack.c.h.s8.bf16 %v3269_v53  ;;  %v3292_v53 = vld [vmem:[#allocation10 + $0xf8] sm:$0xff] }
 0x4a4   :  { %v3407_v7 = vunpack.c.l.s8.bf16 %v3271_v2  ;;  %v3411_v15 = vunpack.c.h.s8.bf16 %v3271_v2 }
 0x4a6   :  { %2757 = vmatpush1.bf16.msra.mxu0 %v1709_v10  ;;  %3101 = vmatpush1.bf16.msra.mxu1 %v1711_v11  ;;  %v3410_v10 = vunpack.c.h.s8.bf16 %v3270_v61  ;;  %v3412_v11 = vunpack.c.h.s8.bf16 %v3272_v63 }
 0x4a7   :  { %2758 = vmatprep.subr.bf16.mxu0 %v1718_v32  ;;  %3102 = vmatprep.subr.bf16.mxu1 %v1720_v13  ;;  %v3274_v32 = vld [vmem:[#allocation10 + $0x68] sm:$0xff]  ;;  %v3276_v13 = vld [vmem:[#allocation10 + $0x78] sm:$0xff] }
 0x4aa   :  { %2759 = vmatpush1.bf16.msra.mxu0 %v1717_v16  ;;  %3103 = vmatpush1.bf16.msra.mxu1 %v1719_v17  ;;  %v3414_v16 = vunpack.c.l.s8.bf16 %v3274_v32  ;;  %v3273_v17 = vld [vmem:[#allocation10 + $0x60] sm:$0xff] }
 0x4ab   :  { %2760 = vmatprep.subr.bf16.mxu0 %v1726_v18  ;;  %3104 = vmatprep.subr.bf16.mxu1 %v1728_v19  ;;  %v3416_v18 = vunpack.c.l.s8.bf16 %v3276_v13  ;;  %v3275_v19 = vld [vmem:[#allocation10 + $0x70] sm:$0xff]  ;;  %v3413_v20 = vunpack.c.l.s8.bf16 %v3273_v17  ;;  %v3417_v25 = vunpack.c.h.s8.bf16 %v3273_v17  ;;  %v3296_v17 = vld [vmem:[#allocation10 + $0x118] sm:$0xff] }
 0x4ac   :  { %v3415_v45 = vunpack.c.l.s8.bf16 %v3275_v19  ;;  %v3419_v41 = vunpack.c.h.s8.bf16 %v3275_v19 }
 0x4ae   :  { %2761 = vmatpush1.bf16.msra.mxu0 %v1725_v34  ;;  %3105 = vmatpush1.bf16.msra.mxu1 %v1727_v22  ;;  %v3418_v34 = vunpack.c.h.s8.bf16 %v3274_v32  ;;  %v3420_v22 = vunpack.c.h.s8.bf16 %v3276_v13 }
 0x4af   :  { %2762 = vmatprep.subr.bf16.mxu0 %v1734_v23  ;;  %3106 = vmatprep.subr.bf16.mxu1 %v1736_v24  ;;  %v3278_v23 = vld [vmem:[#allocation10 + $0x88] sm:$0xff]  ;;  %v3280_v24 = vld [vmem:[#allocation10 + $0x98] sm:$0xff] }
 0x4b2   :  { %2763 = vmatpush1.bf16.msra.mxu0 %v1733_v52  ;;  %3107 = vmatpush1.bf16.msra.mxu1 %v1735_v26  ;;  %v3422_v52 = vunpack.c.l.s8.bf16 %v3278_v23  ;;  %v3277_v26 = vld [vmem:[#allocation10 + $0x80] sm:$0xff] }
 0x4b3   :  { %2764 = vmatprep.subr.bf16.mxu0 %v1742_v27  ;;  %3108 = vmatprep.subr.bf16.mxu1 %v1744_v46  ;;  %v3424_v27 = vunpack.c.l.s8.bf16 %v3280_v24  ;;  %v3279_v46 = vld [vmem:[#allocation10 + $0x90] sm:$0xff]  ;;  %v3421_v28 = vunpack.c.l.s8.bf16 %v3277_v26  ;;  %v3425_v35 = vunpack.c.h.s8.bf16 %v3277_v26  ;;  %v3300_v26 = vld [vmem:[#allocation10 + $0x138] sm:$0xff] }
 0x4b4   :  { %v3423_v29 = vunpack.c.l.s8.bf16 %v3279_v46  ;;  %v3427_v62 = vunpack.c.h.s8.bf16 %v3279_v46 }
 0x4b6   :  { %2765 = vmatpush1.bf16.msra.mxu0 %v1741_v3  ;;  %3109 = vmatpush1.bf16.msra.mxu1 %v1743_v31  ;;  %v3426_v3 = vunpack.c.h.s8.bf16 %v3278_v23  ;;  %v3428_v31 = vunpack.c.h.s8.bf16 %v3280_v24 }
 0x4b7   :  { %3645 = vmatprep.subr.bf16.mxu0 %v3390_v33  ;;  %3817 = vmatprep.subr.bf16.mxu1 %v3392_v51  ;;  %v3282_v33 = vld [vmem:[#allocation10 + $0xa8] sm:$0xff]  ;;  %v3284_v51 = vld [vmem:[#allocation10 + $0xb8] sm:$0xff] }
 0x4b9   :  { %2767 = vmatmul.mubr.bf16.vlgmr.msra.gmra.mrb[4].mxu0 %v4971_v37  ;;  %3111 = vmatmul.mubr.bf16.vlgmr.msra.gmra.mrb[4].mxu1 %v4971_v37  ;;  %v3399_v37 = vunpack.c.l.s8.bf16 %v3267_v30 }
 0x4ba   :  { %3646 = vmatpush1.bf16.msra.mxu0 %v3389_v39  ;;  %3677 = vmatprep.mubr.bf16.mxu0 %v5027_v8  ;;  %v3430_v39 = vunpack.c.l.s8.bf16 %v3282_v33 }
 0x4bb   :  { %3818 = vmatpush1.bf16.msra.mxu1 %v3391_v40  ;;  %3849 = vmatprep.mubr.bf16.mxu1 %v5027_v8  ;;  %v3403_v8 = vunpack.c.h.s8.bf16 %v3267_v30  ;;  %v3281_v40 = vld [vmem:[#allocation10 + $0xa0] sm:$0xff] }
 0x4bc   :  { %3647 = vmatprep.subr.bf16.mxu0 %v3394_v12  ;;  %3819 = vmatprep.subr.bf16.mxu1 %v3396_v42  ;;  %v3432_v12 = vunpack.c.l.s8.bf16 %v3284_v51  ;;  %v3283_v42 = vld [vmem:[#allocation10 + $0xb0] sm:$0xff]  ;;  %v3429_v43 = vunpack.c.l.s8.bf16 %v3281_v40 }
 0x4bd   :  { %v3431_v47 = vunpack.c.l.s8.bf16 %v3283_v42  ;;  %v3435_v30 = vunpack.c.h.s8.bf16 %v3283_v42  ;;  %v3301_v42 = vld [vmem:[#allocation10 + $0x140] sm:$0xff] }
 0x4be   :  { %3648 = vmatpush1.bf16.msra.mxu0 %v3393_v49  ;;  %v3434_v49 = vunpack.c.h.s8.bf16 %v3282_v33 }
 0x4bf   :  { %3820 = vmatpush1.bf16.msra.mxu1 %v3395_v50  ;;  %3649 = vmatprep.subr.bf16.mxu0 %v3398_v54  ;;  %v3436_v50 = vunpack.c.h.s8.bf16 %v3284_v51  ;;  %v3286_v54 = vld [vmem:[#allocation10 + $0xc8] sm:$0xff] }
 0x4c0   :  { %3821 = vmatprep.subr.bf16.mxu1 %v3400_v57  ;;  %v3433_v57 = vunpack.c.h.s8.bf16 %v3281_v40 }
 0x4c2   :  { %3650 = vmatpush1.bf16.msra.mxu0 %v3397_v58  ;;  %v3438_v58 = vunpack.c.l.s8.bf16 %v3286_v54 }
 0x4c3   :  { %3822 = vmatpush1.bf16.msra.mxu1 %v3399_v37  ;;  %3651 = vmatprep.subr.bf16.mxu0 %v3402_v59  ;;  %v3285_v37 = vld [vmem:[#allocation10 + $0xc0] sm:$0xff]  ;;  %v3440_v59 = vunpack.c.l.s8.bf16 %v3288_v44 }
 0x4c4   :  { %3823 = vmatprep.subr.bf16.mxu1 %v3404_v60  ;;  %v3287_v60 = vld [vmem:[#allocation10 + $0xd0] sm:$0xff]  ;;  %v3437_v61 = vunpack.c.l.s8.bf16 %v3285_v37 }
 0x4c5   :  { %v3439_v63 = vunpack.c.l.s8.bf16 %v3287_v60  ;;  %v3443_v2 = vunpack.c.h.s8.bf16 %v3287_v60  ;;  %v3305_v60 = vld [vmem:[#allocation10 + $0x160] sm:$0xff] }
 0x4c6   :  { %3652 = vmatpush1.bf16.msra.mxu0 %v3401_v0  ;;  %v3442_v0 = vunpack.c.h.s8.bf16 %v3286_v54 }
 0x4c7   :  { %3824 = vmatpush1.bf16.msra.mxu1 %v3403_v8  ;;  %3653 = vmatprep.subr.bf16.mxu0 %v3406_v1  ;;  %v3444_v8 = vunpack.c.h.s8.bf16 %v3288_v44  ;;  %v3290_v1 = vld [vmem:[#allocation10 + $0xe8] sm:$0xff] }
 0x4c8   :  { %3825 = vmatprep.subr.bf16.mxu1 %v3408_v5  ;;  %v3441_v5 = vunpack.c.h.s8.bf16 %v3285_v37 }
 0x4ca   :  { %3654 = vmatpush1.bf16.msra.mxu0 %v3405_v6  ;;  %v3446_v6 = vunpack.c.l.s8.bf16 %v3290_v1 }
 0x4cb   :  { %3826 = vmatpush1.bf16.msra.mxu1 %v3407_v7  ;;  %3655 = vmatprep.subr.bf16.mxu0 %v3410_v10  ;;  %v3289_v7 = vld [vmem:[#allocation10 + $0xe0] sm:$0xff]  ;;  %v3448_v10 = vunpack.c.l.s8.bf16 %v3292_v53 }
 0x4cc   :  { %3827 = vmatprep.subr.bf16.mxu1 %v3412_v11  ;;  %v3291_v11 = vld [vmem:[#allocation10 + $0xf0] sm:$0xff]  ;;  %v3445_v32 = vunpack.c.l.s8.bf16 %v3289_v7 }
 0x4cd   :  { %v3447_v13 = vunpack.c.l.s8.bf16 %v3291_v11  ;;  %v3451_v19 = vunpack.c.h.s8.bf16 %v3291_v11  ;;  %v3309_v11 = vld [vmem:[#allocation10 + $0x180] sm:$0xff] }
 0x4ce   :  { %3656 = vmatpush1.bf16.msra.mxu0 %v3409_v14  ;;  %v3450_v14 = vunpack.c.h.s8.bf16 %v3290_v1 }
 0x4cf   :  { %3828 = vmatpush1.bf16.msra.mxu1 %v3411_v15  ;;  %3657 = vmatprep.subr.bf16.mxu0 %v3414_v16  ;;  %v3452_v15 = vunpack.c.h.s8.bf16 %v3292_v53  ;;  %v3294_v16 = vld [vmem:[#allocation10 + $0x108] sm:$0xff] }
 0x4d0   :  { %3829 = vmatprep.subr.bf16.mxu1 %v3416_v18  ;;  %v3449_v18 = vunpack.c.h.s8.bf16 %v3289_v7 }
 0x4d2   :  { %3658 = vmatpush1.bf16.msra.mxu0 %v3413_v20  ;;  %v3454_v20 = vunpack.c.l.s8.bf16 %v3294_v16 }
 0x4d3   :  { %3830 = vmatpush1.bf16.msra.mxu1 %v3415_v45  ;;  %3659 = vmatprep.subr.bf16.mxu0 %v3418_v34  ;;  %v3293_v45 = vld [vmem:[#allocation10 + $0x100] sm:$0xff]  ;;  %v3456_v34 = vunpack.c.l.s8.bf16 %v3296_v17 }
 0x4d4   :  { %3831 = vmatprep.subr.bf16.mxu1 %v3420_v22  ;;  %v3295_v22 = vld [vmem:[#allocation10 + $0x110] sm:$0xff]  ;;  %v3453_v23 = vunpack.c.l.s8.bf16 %v3293_v45 }
 0x4d5   :  { %v3455_v24 = vunpack.c.l.s8.bf16 %v3295_v22  ;;  %v3459_v46 = vunpack.c.h.s8.bf16 %v3295_v22  ;;  %v3313_v22 = vld [vmem:[#allocation10 + $0x1a0] sm:$0xff] }
 0x4d6   :  { %3660 = vmatpush1.bf16.msra.mxu0 %v3417_v25  ;;  %v3458_v25 = vunpack.c.h.s8.bf16 %v3294_v16 }
 0x4d7   :  { %3832 = vmatpush1.bf16.msra.mxu1 %v3419_v41  ;;  %3661 = vmatprep.subr.bf16.mxu0 %v3422_v52  ;;  %v3298_v41 = vld [vmem:[#allocation10 + $0x128] sm:$0xff]  ;;  %v3460_v52 = vunpack.c.h.s8.bf16 %v3296_v17 }
 0x4d8   :  { %3833 = vmatprep.subr.bf16.mxu1 %v3424_v27  ;;  %v3457_v27 = vunpack.c.h.s8.bf16 %v3293_v45 }
 0x4da   :  { %3662 = vmatpush1.bf16.msra.mxu0 %v3421_v28  ;;  %v3462_v28 = vunpack.c.l.s8.bf16 %v3298_v41 }
 0x4db   :  { %3834 = vmatpush1.bf16.msra.mxu1 %v3423_v29  ;;  %3663 = vmatprep.subr.bf16.mxu0 %v3426_v3  ;;  %v3297_v29 = vld [vmem:[#allocation10 + $0x120] sm:$0xff]  ;;  %v3464_v3 = vunpack.c.l.s8.bf16 %v3300_v26 }
 0x4dc   :  { %3835 = vmatprep.subr.bf16.mxu1 %v3428_v31  ;;  %v3299_v31 = vld [vmem:[#allocation10 + $0x130] sm:$0xff]  ;;  %v3461_v33 = vunpack.c.l.s8.bf16 %v3297_v29  ;;  %v3465_v40 = vunpack.c.h.s8.bf16 %v3297_v29 }
 0x4dd   :  { %v3463_v51 = vunpack.c.l.s8.bf16 %v3299_v31 }
 0x4de   :  { %3664 = vmatpush1.bf16.msra.mxu0 %v3425_v35  ;;  %v3468_v35 = vunpack.c.h.s8.bf16 %v3300_v26 }
 0x4df   :  { %3836 = vmatpush1.bf16.msra.mxu1 %v3427_v62  ;;  %3665 = vmatprep.subr.bf16.mxu0 %v3430_v39  ;;  %v3302_v62 = vld [vmem:[#allocation10 + $0x148] sm:$0xff]  ;;  %v3304_v39 = vld [vmem:[#allocation10 + $0x158] sm:$0xff] }
 0x4e0   :  { %3837 = vmatprep.subr.bf16.mxu1 %v3432_v12  ;;  %v3467_v12 = vunpack.c.h.s8.bf16 %v3299_v31  ;;  %v3474_v54 = vunpack.c.h.s8.bf16 %v3302_v62  ;;  %v3476_v44 = vunpack.c.h.s8.bf16 %v3304_v39  ;;  %v3317_v31 = vld [vmem:[#allocation10 + $0x1c0] sm:$0xff] }
 0x4e2   :  { %3666 = vmatpush1.bf16.msra.mxu0 %v3429_v43  ;;  %v3472_v43 = vunpack.c.l.s8.bf16 %v3304_v39 }
 0x4e3   :  { %3838 = vmatpush1.bf16.msra.mxu1 %v3431_v47  ;;  %3667 = vmatprep.subr.bf16.mxu0 %v3434_v49  ;;  %v3303_v47 = vld [vmem:[#allocation10 + $0x150] sm:$0xff]  ;;  %v3469_v49 = vunpack.c.l.s8.bf16 %v3301_v42 }
 0x4e4   :  { %3839 = vmatprep.subr.bf16.mxu1 %v3436_v50  ;;  %v3471_v50 = vunpack.c.l.s8.bf16 %v3303_v47  ;;  %v3475_v37 = vunpack.c.h.s8.bf16 %v3303_v47  ;;  %v3321_v47 = vld [vmem:[#allocation10 + $0x1e0] sm:$0xff] }
 0x4e6   :  { %3668 = vmatpush1.bf16.msra.mxu0 %v3433_v57  ;;  %v3306_v57 = vld [vmem:[#allocation10 + $0x168] sm:$0xff] }
 0x4e7   :  { %3840 = vmatpush1.bf16.msra.mxu1 %v3435_v30  ;;  %3669 = vmatprep.subr.bf16.mxu0 %v3438_v58  ;;  %v3308_v30 = vld [vmem:[#allocation10 + $0x178] sm:$0xff]  ;;  %v3473_v58 = vunpack.c.h.s8.bf16 %v3301_v42  ;;  %v3482_v1 = vunpack.c.h.s8.bf16 %v3306_v57 }
 0x4e8   :  { %3841 = vmatprep.subr.bf16.mxu1 %v3440_v59  ;;  %v3478_v59 = vunpack.c.l.s8.bf16 %v3306_v57  ;;  %v3484_v53 = vunpack.c.h.s8.bf16 %v3308_v30 }
 0x4ea   :  { %3670 = vmatpush1.bf16.msra.mxu0 %v3437_v61  ;;  %v3480_v61 = vunpack.c.l.s8.bf16 %v3308_v30 }
 0x4eb   :  { %3842 = vmatpush1.bf16.msra.mxu1 %v3439_v63  ;;  %3671 = vmatprep.subr.bf16.mxu0 %v3442_v0  ;;  %v3307_v63 = vld [vmem:[#allocation10 + $0x170] sm:$0xff]  ;;  %v3477_v0 = vunpack.c.l.s8.bf16 %v3305_v60 }
 0x4ec   :  { %3843 = vmatprep.subr.bf16.mxu1 %v3444_v8  ;;  %v3479_v8 = vunpack.c.l.s8.bf16 %v3307_v63  ;;  %v3483_v7 = vunpack.c.h.s8.bf16 %v3307_v63  ;;  %v3325_v63 = vld [vmem:[#allocation10 + $0x200] sm:$0xff] }
 0x4ee   :  { %3672 = vmatpush1.bf16.msra.mxu0 %v3441_v5  ;;  %v3310_v5 = vld [vmem:[#allocation10 + $0x188] sm:$0xff] }
 0x4ef   :  { %3844 = vmatpush1.bf16.msra.mxu1 %v3443_v2  ;;  %3673 = vmatprep.subr.bf16.mxu0 %v3446_v6  ;;  %v3312_v2 = vld [vmem:[#allocation10 + $0x198] sm:$0xff]  ;;  %v3481_v6 = vunpack.c.h.s8.bf16 %v3305_v60  ;;  %v3490_v16 = vunpack.c.h.s8.bf16 %v3310_v5 }
 0x4f0   :  { %3845 = vmatprep.subr.bf16.mxu1 %v3448_v10  ;;  %v3486_v10 = vunpack.c.l.s8.bf16 %v3310_v5  ;;  %v3492_v17 = vunpack.c.h.s8.bf16 %v3312_v2 }
 0x4f2   :  { %3674 = vmatpush1.bf16.msra.mxu0 %v3445_v32  ;;  %v3488_v32 = vunpack.c.l.s8.bf16 %v3312_v2 }
 0x4f3   :  { %3846 = vmatpush1.bf16.msra.mxu1 %v3447_v13  ;;  %3675 = vmatprep.subr.bf16.mxu0 %v3450_v14  ;;  %v3311_v13 = vld [vmem:[#allocation10 + $0x190] sm:$0xff]  ;;  %v3485_v14 = vunpack.c.l.s8.bf16 %v3309_v11 }
 0x4f4   :  { %3847 = vmatprep.subr.bf16.mxu1 %v3452_v15  ;;  %v3487_v15 = vunpack.c.l.s8.bf16 %v3311_v13  ;;  %v3491_v45 = vunpack.c.h.s8.bf16 %v3311_v13  ;;  %v3329_v13 = vld [vmem:[#allocation10 + $0x220] sm:$0xff] }
 0x4f6   :  { %3676 = vmatpush1.bf16.msra.mxu0 %v3449_v18  ;;  %v3314_v18 = vld [vmem:[#allocation10 + $0x1a8] sm:$0xff] }
 0x4f7   :  { %3848 = vmatpush1.bf16.msra.mxu1 %v3451_v19  ;;  %3688 = vmatprep.subr.bf16.mxu0 %v3454_v20  ;;  %v3316_v19 = vld [vmem:[#allocation10 + $0x1b8] sm:$0xff]  ;;  %v3489_v20 = vunpack.c.h.s8.bf16 %v3309_v11 }
 0x4f8   :  { %3860 = vmatprep.subr.bf16.mxu1 %v3456_v34  ;;  %v3494_v34 = vunpack.c.l.s8.bf16 %v3314_v18  ;;  %v3500_v26 = vunpack.c.h.s8.bf16 %v3316_v19 }
 0x4f9   :  { %3678 = vmatmul.mubr.bf16.vlgmr.msra.gmra.mrb[8].mxu0 %v5023_v36 }
 0x4fa   :  { %3850 = vmatmul.mubr.bf16.vlgmr.msra.gmra.mrb[8].mxu1 %v5023_v36  ;;  %3689 = vmatpush1.bf16.msra.mxu0 %v3453_v23  ;;  %v3466_v36 = vunpack.c.h.s8.bf16 %v3298_v41  ;;  %v3496_v23 = vunpack.c.l.s8.bf16 %v3316_v19 }
 0x4fb   :  { %3720 = vmatprep.mubr.bf16.mxu0 %v5029_v9  ;;  %3861 = vmatpush1.bf16.msra.mxu1 %v3455_v24  ;;  %v3315_v24 = vld [vmem:[#allocation10 + $0x1b0] sm:$0xff] }
 0x4fc   :  { %3892 = vmatprep.mubr.bf16.mxu1 %v5029_v9  ;;  %3690 = vmatprep.subr.bf16.mxu0 %v3458_v25  ;;  %v3470_v9 = vunpack.c.l.s8.bf16 %v3302_v62  ;;  %v3493_v25 = vunpack.c.l.s8.bf16 %v3313_v22  ;;  %v3495_v41 = vunpack.c.l.s8.bf16 %v3315_v24  ;;  %v3499_v29 = vunpack.c.h.s8.bf16 %v3315_v24 }
 0x4fd   :  { %3862 = vmatprep.subr.bf16.mxu1 %v3460_v52  ;;  %v3498_v52 = vunpack.c.h.s8.bf16 %v3314_v18 }
 0x4fe   :  { %3691 = vmatpush1.bf16.msra.mxu0 %v3457_v27  ;;  %v3318_v27 = vld [vmem:[#allocation10 + $0x1c8] sm:$0xff] }
 0x4ff   :  { %3863 = vmatpush1.bf16.msra.mxu1 %v3459_v46  ;;  %3692 = vmatprep.subr.bf16.mxu0 %v3462_v28  ;;  %v3320_v46 = vld [vmem:[#allocation10 + $0x1d8] sm:$0xff]  ;;  %v3497_v28 = vunpack.c.h.s8.bf16 %v3313_v22  ;;  %v3506_v62 = vunpack.c.h.s8.bf16 %v3318_v27 }
 0x500   :  { %3864 = vmatprep.subr.bf16.mxu1 %v3464_v3  ;;  %v3502_v3 = vunpack.c.l.s8.bf16 %v3318_v27  ;;  %v3508_v39 = vunpack.c.h.s8.bf16 %v3320_v46 }
 0x502   :  { %3693 = vmatpush1.bf16.msra.mxu0 %v3461_v33  ;;  %v3504_v33 = vunpack.c.l.s8.bf16 %v3320_v46  ;;  %v3338_v46 = vld [vmem:[#allocation10 + $0x268] sm:$0xff] }
 0x503   :  { %3865 = vmatpush1.bf16.msra.mxu1 %v3463_v51  ;;  %3694 = vmatprep.subr.bf16.mxu0 %v3466_v36  ;;  %v3319_v51 = vld [vmem:[#allocation10 + $0x1d0] sm:$0xff]  ;;  %v3501_v36 = vunpack.c.l.s8.bf16 %v3317_v31 }
 0x504   :  { %3866 = vmatprep.subr.bf16.mxu1 %v3468_v35  ;;  %v3503_v35 = vunpack.c.l.s8.bf16 %v3319_v51  ;;  %v3507_v42 = vunpack.c.h.s8.bf16 %v3319_v51 }
 0x506   :  { %3695 = vmatpush1.bf16.msra.mxu0 %v3465_v40  ;;  %v3322_v40 = vld [vmem:[#allocation10 + $0x1e8] sm:$0xff] }
 0x507   :  { %3867 = vmatpush1.bf16.msra.mxu1 %v3467_v12  ;;  %3696 = vmatprep.subr.bf16.mxu0 %v3470_v9  ;;  %v3324_v12 = vld [vmem:[#allocation10 + $0x1f8] sm:$0xff]  ;;  %v3505_v9 = vunpack.c.h.s8.bf16 %v3317_v31  ;;  %v3514_v57 = vunpack.c.h.s8.bf16 %v3322_v40  ;;  %v3542_v31 = vunpack.c.l.s8.bf16 %v3338_v46 }
 0x508   :  { %3868 = vmatprep.subr.bf16.mxu1 %v3472_v43  ;;  %v3510_v43 = vunpack.c.l.s8.bf16 %v3322_v40  ;;  %v3516_v30 = vunpack.c.h.s8.bf16 %v3324_v12 }
 0x50a   :  { %3697 = vmatpush1.bf16.msra.mxu0 %v3469_v49  ;;  %v3512_v49 = vunpack.c.l.s8.bf16 %v3324_v12  ;;  %v3342_v12 = vld [vmem:[#allocation10 + $0x288] sm:$0xff] }
 0x50b   :  { %3869 = vmatpush1.bf16.msra.mxu1 %v3471_v50  ;;  %3698 = vmatprep.subr.bf16.mxu0 %v3474_v54  ;;  %v3323_v50 = vld [vmem:[#allocation10 + $0x1f0] sm:$0xff]  ;;  %v3509_v54 = vunpack.c.l.s8.bf16 %v3321_v47 }
 0x50c   :  { %3870 = vmatprep.subr.bf16.mxu1 %v3476_v44  ;;  %v3511_v44 = vunpack.c.l.s8.bf16 %v3323_v50  ;;  %v3515_v60 = vunpack.c.h.s8.bf16 %v3323_v50 }
 0x50e   :  { %3699 = vmatpush1.bf16.msra.mxu0 %v3473_v58  ;;  %v3326_v58 = vld [vmem:[#allocation10 + $0x208] sm:$0xff] }
 0x50f   :  { %3871 = vmatpush1.bf16.msra.mxu1 %v3475_v37  ;;  %3700 = vmatprep.subr.bf16.mxu0 %v3478_v59  ;;  %v3328_v37 = vld [vmem:[#allocation10 + $0x218] sm:$0xff]  ;;  %v3513_v59 = vunpack.c.h.s8.bf16 %v3321_v47  ;;  %v3522_v5 = vunpack.c.h.s8.bf16 %v3326_v58  ;;  %v3550_v47 = vunpack.c.l.s8.bf16 %v3342_v12 }
 0x510   :  { %3872 = vmatprep.subr.bf16.mxu1 %v3480_v61  ;;  %v3518_v61 = vunpack.c.l.s8.bf16 %v3326_v58  ;;  %v3524_v2 = vunpack.c.h.s8.bf16 %v3328_v37 }
 0x512   :  { %3701 = vmatpush1.bf16.msra.mxu0 %v3477_v0  ;;  %v3520_v0 = vunpack.c.l.s8.bf16 %v3328_v37  ;;  %v3346_v37 = vld [vmem:[#allocation10 + $0x2a8] sm:$0xff] }
 0x513   :  { %3873 = vmatpush1.bf16.msra.mxu1 %v3479_v8  ;;  %3702 = vmatprep.subr.bf16.mxu0 %v3482_v1  ;;  %v3327_v8 = vld [vmem:[#allocation10 + $0x210] sm:$0xff]  ;;  %v3517_v1 = vunpack.c.l.s8.bf16 %v3325_v63 }
 0x514   :  { %3874 = vmatprep.subr.bf16.mxu1 %v3484_v53  ;;  %v3519_v53 = vunpack.c.l.s8.bf16 %v3327_v8  ;;  %v3523_v11 = vunpack.c.h.s8.bf16 %v3327_v8 }
 0x516   :  { %3703 = vmatpush1.bf16.msra.mxu0 %v3481_v6  ;;  %v3330_v6 = vld [vmem:[#allocation10 + $0x228] sm:$0xff] }
 0x517   :  { %3875 = vmatpush1.bf16.msra.mxu1 %v3483_v7  ;;  %3704 = vmatprep.subr.bf16.mxu0 %v3486_v10  ;;  %v3332_v7 = vld [vmem:[#allocation10 + $0x238] sm:$0xff]  ;;  %v3521_v10 = vunpack.c.h.s8.bf16 %v3325_v63  ;;  %v3530_v18 = vunpack.c.h.s8.bf16 %v3330_v6  ;;  %v3558_v63 = vunpack.c.l.s8.bf16 %v3346_v37 }
 0x518   :  { %3876 = vmatprep.subr.bf16.mxu1 %v3488_v32  ;;  %v3526_v32 = vunpack.c.l.s8.bf16 %v3330_v6  ;;  %v3532_v19 = vunpack.c.h.s8.bf16 %v3332_v7 }
 0x51a   :  { %3705 = vmatpush1.bf16.msra.mxu0 %v3485_v14  ;;  %v3528_v14 = vunpack.c.l.s8.bf16 %v3332_v7  ;;  %v3350_v7 = vld [vmem:[#allocation10 + $0x2c8] sm:$0xff] }
 0x51b   :  { %3877 = vmatpush1.bf16.msra.mxu1 %v3487_v15  ;;  %3706 = vmatprep.subr.bf16.mxu0 %v3490_v16  ;;  %v3331_v15 = vld [vmem:[#allocation10 + $0x230] sm:$0xff]  ;;  %v3525_v16 = vunpack.c.l.s8.bf16 %v3329_v13 }
 0x51c   :  { %3878 = vmatprep.subr.bf16.mxu1 %v3492_v17  ;;  %v3527_v17 = vunpack.c.l.s8.bf16 %v3331_v15 }
 0x51e   :  { %3707 = vmatpush1.bf16.msra.mxu0 %v3489_v20  ;;  %v3334_v20 = vld [vmem:[#allocation10 + $0x248] sm:$0xff] }
 0x51f   :  { %3879 = vmatpush1.bf16.msra.mxu1 %v3491_v45  ;;  %3708 = vmatprep.subr.bf16.mxu0 %v3494_v34  ;;  %v3529_v45 = vunpack.c.h.s8.bf16 %v3329_v13  ;;  %v3531_v34 = vunpack.c.h.s8.bf16 %v3331_v15  ;;  %v3534_v22 = vunpack.c.l.s8.bf16 %v3334_v20  ;;  %v3566_v13 = vunpack.c.l.s8.bf16 %v3350_v7 }
 0x520   :  { %3880 = vmatprep.subr.bf16.mxu1 %v3496_v23  ;;  %v3333_v23 = vld [vmem:[#allocation10 + $0x240] sm:$0xff] }
 0x522   :  { %3709 = vmatpush1.bf16.msra.mxu0 %v3493_v25  ;;  %v3335_v25 = vld [vmem:[#allocation10 + $0x250] sm:$0xff] }
 0x523   :  { %3881 = vmatpush1.bf16.msra.mxu1 %v3495_v41  ;;  %3710 = vmatprep.subr.bf16.mxu0 %v3498_v52  ;;  %v3533_v41 = vunpack.c.l.s8.bf16 %v3333_v23  ;;  %v3535_v52 = vunpack.c.l.s8.bf16 %v3335_v25 }
 0x524   :  { %3882 = vmatprep.subr.bf16.mxu1 %v3500_v26  ;;  %v3538_v26 = vunpack.c.h.s8.bf16 %v3334_v20 }
 0x526   :  { %3711 = vmatpush1.bf16.msra.mxu0 %v3497_v28  ;;  %v3340_v28 = vld [vmem:[#allocation10 + $0x278] sm:$0xff] }
 0x527   :  { %3883 = vmatpush1.bf16.msra.mxu1 %v3499_v29  ;;  %3712 = vmatprep.subr.bf16.mxu0 %v3502_v3  ;;  %v3537_v29 = vunpack.c.h.s8.bf16 %v3333_v23  ;;  %v3539_v3 = vunpack.c.h.s8.bf16 %v3335_v25  ;;  %v3544_v51 = vunpack.c.l.s8.bf16 %v3340_v28  ;;  %v3548_v40 = vunpack.c.h.s8.bf16 %v3340_v28  ;;  %v5057_v28 = vld [vmem:[#allocation10 + $0x308] sm:$0xff] }
 0x528   :  { %3884 = vmatprep.subr.bf16.mxu1 %v3504_v33  ;;  %v3337_v33 = vld [vmem:[#allocation10 + $0x260] sm:$0xff] }
 0x52a   :  { %3713 = vmatpush1.bf16.msra.mxu0 %v3501_v36  ;;  %v3339_v36 = vld [vmem:[#allocation10 + $0x270] sm:$0xff] }
 0x52b   :  { %3885 = vmatpush1.bf16.msra.mxu1 %v3503_v35  ;;  %3714 = vmatprep.subr.bf16.mxu0 %v3506_v62  ;;  %v3541_v35 = vunpack.c.l.s8.bf16 %v3337_v33  ;;  %v3543_v62 = vunpack.c.l.s8.bf16 %v3339_v36 }
 0x52c   :  { %3886 = vmatprep.subr.bf16.mxu1 %v3508_v39  ;;  %v3546_v39 = vunpack.c.h.s8.bf16 %v3338_v46 }
 0x52e   :  { %3715 = vmatpush1.bf16.msra.mxu0 %v3505_v9  ;;  %v3344_v9 = vld [vmem:[#allocation10 + $0x298] sm:$0xff] }
 0x52f   :  { %3887 = vmatpush1.bf16.msra.mxu1 %v3507_v42  ;;  %3716 = vmatprep.subr.bf16.mxu0 %v3510_v43  ;;  %v3545_v42 = vunpack.c.h.s8.bf16 %v3337_v33  ;;  %v3547_v43 = vunpack.c.h.s8.bf16 %v3339_v36  ;;  %v3552_v50 = vunpack.c.l.s8.bf16 %v3344_v9  ;;  %v3556_v58 = vunpack.c.h.s8.bf16 %v3344_v9 }
 0x530   :  { %3888 = vmatprep.subr.bf16.mxu1 %v3512_v49  ;;  %v3341_v49 = vld [vmem:[#allocation10 + $0x280] sm:$0xff]  ;;  %v3582_v33 = vunpack.c.l.s8.bf16 %v5057_v28  ;;  %v3141_v36 = vsub.s32 4, %v4989_v38 }
 0x532   :  { %3717 = vmatpush1.bf16.msra.mxu0 %v3509_v54  ;;  %v3343_v54 = vld [vmem:[#allocation10 + $0x290] sm:$0xff] }
 0x533   :  { %3889 = vmatpush1.bf16.msra.mxu1 %v3511_v44  ;;  %3718 = vmatprep.subr.bf16.mxu0 %v3514_v57  ;;  %v3549_v44 = vunpack.c.l.s8.bf16 %v3341_v49  ;;  %v3551_v57 = vunpack.c.l.s8.bf16 %v3343_v54 }
 0x534   :  { %3890 = vmatprep.subr.bf16.mxu1 %v3516_v30  ;;  %v3554_v30 = vunpack.c.h.s8.bf16 %v3342_v12 }
 0x536   :  { %3719 = vmatpush1.bf16.msra.mxu0 %v3513_v59  ;;  %v3348_v59 = vld [vmem:[#allocation10 + $0x2b8] sm:$0xff] }
 0x537   :  { %3891 = vmatpush1.bf16.msra.mxu1 %v3515_v60  ;;  %3731 = vmatprep.subr.bf16.mxu0 %v3518_v61  ;;  %v3553_v60 = vunpack.c.h.s8.bf16 %v3341_v49  ;;  %v3555_v61 = vunpack.c.h.s8.bf16 %v3343_v54  ;;  %v3560_v8 = vunpack.c.l.s8.bf16 %v3348_v59  ;;  %v3564_v6 = vunpack.c.h.s8.bf16 %v3348_v59 }
 0x538   :  { %3903 = vmatprep.subr.bf16.mxu1 %v3520_v0  ;;  %v3345_v0 = vld [vmem:[#allocation10 + $0x2a0] sm:$0xff] }
 0x539   :  { %3721 = vmatmul.mubr.bf16.vlgmr.msra.gmra.mrb[8].mxu0 %v5025_v4 }
 0x53a   :  { %3893 = vmatmul.mubr.bf16.vlgmr.msra.gmra.mrb[8].mxu1 %v5025_v4  ;;  %3732 = vmatpush1.bf16.msra.mxu0 %v3517_v1  ;;  %v3336_v4 = vld [vmem:[#allocation10 + $0x258] sm:$0xff]  ;;  %v3347_v1 = vld [vmem:[#allocation10 + $0x2b0] sm:$0xff] }
 0x53b   :  { %3904 = vmatpush1.bf16.msra.mxu1 %v3519_v53  ;;  %3733 = vmatprep.subr.bf16.mxu0 %v3522_v5  ;;  %v3536_v24 = vunpack.c.l.s8.bf16 %v3336_v4  ;;  %v3540_v27 = vunpack.c.h.s8.bf16 %v3336_v4  ;;  %v3557_v53 = vunpack.c.l.s8.bf16 %v3345_v0  ;;  %v3559_v5 = vunpack.c.l.s8.bf16 %v3347_v1  ;;  %v3354_v4 = vld [vmem:[#allocation10 + $0x2e8] sm:$0xff] }
 0x53c   :  { %3905 = vmatprep.subr.bf16.mxu1 %v3524_v2  ;;  %v3562_v2 = vunpack.c.h.s8.bf16 %v3346_v37  ;;  %v3574_v23 = vunpack.c.l.s8.bf16 %v3354_v4 }
 0x53e   :  { %3734 = vmatpush1.bf16.msra.mxu0 %v3521_v10  ;;  %v3352_v10 = vld [vmem:[#allocation10 + $0x2d8] sm:$0xff] }
 0x53f   :  { %3906 = vmatpush1.bf16.msra.mxu1 %v3523_v11  ;;  %3735 = vmatprep.subr.bf16.mxu0 %v3526_v32  ;;  %v3561_v11 = vunpack.c.h.s8.bf16 %v3345_v0  ;;  %v3563_v32 = vunpack.c.h.s8.bf16 %v3347_v1  ;;  %v3568_v15 = vunpack.c.l.s8.bf16 %v3352_v10  ;;  %v3572_v20 = vunpack.c.h.s8.bf16 %v3352_v10 }
 0x540   :  { %3907 = vmatprep.subr.bf16.mxu1 %v3528_v14  ;;  %v3349_v14 = vld [vmem:[#allocation10 + $0x2c0] sm:$0xff] }
 0x542   :  { %3736 = vmatpush1.bf16.msra.mxu0 %v3525_v16  ;;  %v3351_v16 = vld [vmem:[#allocation10 + $0x2d0] sm:$0xff] }
 0x543   :  { %3908 = vmatpush1.bf16.msra.mxu1 %v3527_v17  ;;  %3737 = vmatprep.subr.bf16.mxu0 %v3530_v18  ;;  %v3565_v17 = vunpack.c.l.s8.bf16 %v3349_v14  ;;  %v3567_v18 = vunpack.c.l.s8.bf16 %v3351_v16 }
 0x544   :  { %3909 = vmatprep.subr.bf16.mxu1 %v3532_v19  ;;  %v3570_v19 = vunpack.c.h.s8.bf16 %v3350_v7 }
 0x546   :  { %3738 = vmatpush1.bf16.msra.mxu0 %v3529_v45  ;;  %v3356_v45 = vld [vmem:[#allocation10 + $0x2f8] sm:$0xff] }
 0x547   :  { %3910 = vmatpush1.bf16.msra.mxu1 %v3531_v34  ;;  %3739 = vmatprep.subr.bf16.mxu0 %v3534_v22  ;;  %v3569_v34 = vunpack.c.h.s8.bf16 %v3349_v14  ;;  %v3571_v22 = vunpack.c.h.s8.bf16 %v3351_v16  ;;  %v3576_v25 = vunpack.c.l.s8.bf16 %v3356_v45  ;;  %v3580_v46 = vunpack.c.h.s8.bf16 %v3356_v45  ;;  %v3359_v45 = vld [vmem:[#allocation10 + $0x310] sm:$0xff] }
 0x548   :  { %3911 = vmatprep.subr.bf16.mxu1 %v3536_v24  ;;  %v3353_v24 = vld [vmem:[#allocation10 + $0x2e0] sm:$0xff] }
 0x54a   :  { %3740 = vmatpush1.bf16.msra.mxu0 %v3533_v41  ;;  %v3355_v41 = vld [vmem:[#allocation10 + $0x2f0] sm:$0xff] }
 0x54b   :  { %3912 = vmatpush1.bf16.msra.mxu1 %v3535_v52  ;;  %3741 = vmatprep.subr.bf16.mxu0 %v3538_v26  ;;  %v3573_v52 = vunpack.c.l.s8.bf16 %v3353_v24  ;;  %v3575_v26 = vunpack.c.l.s8.bf16 %v3355_v41 }
 0x54c   :  { %3913 = vmatprep.subr.bf16.mxu1 %v3540_v27  ;;  %v3578_v27 = vunpack.c.h.s8.bf16 %v3354_v4  ;;  %v3357_v4 = vld [vmem:[#allocation10 + $0x300] sm:$0xff] }
 0x54e   :  { %3742 = vmatpush1.bf16.msra.mxu0 %v3537_v29  ;;  %v5059_v29 = vld [vmem:[#allocation10 + $0x318] sm:$0xff] }
 0x54f   :  { %3914 = vmatpush1.bf16.msra.mxu1 %v3539_v3  ;;  %3743 = vmatprep.subr.bf16.mxu0 %v3542_v31  ;;  %v3577_v3 = vunpack.c.h.s8.bf16 %v3353_v24  ;;  %v3579_v31 = vunpack.c.h.s8.bf16 %v3355_v41 }
 0x550   :  { %3915 = vmatprep.subr.bf16.mxu1 %v3544_v51  ;;  %v3584_v51 = vunpack.c.l.s8.bf16 %v5059_v29 }
 0x552   :  { %3744 = vmatpush1.bf16.msra.mxu0 %v3541_v35  ;;  %v3149_v35 = vsub.s32 6, %v4989_v38 }
 0x553   :  { %3916 = vmatpush1.bf16.msra.mxu1 %v3543_v62  ;;  %3745 = vmatprep.subr.bf16.mxu0 %v3546_v39  ;;  %v3145_v62 = vsub.s32 5, %v4989_v38  ;;  %v3153_v39 = vsub.s32 7, %v4989_v38 }
 0x554   :  { %3917 = vmatprep.subr.bf16.mxu1 %v3548_v40  ;;  %v4451_v40 = vld [vmem:[#allocation7] sm:$0xff] }
 0x555   :  { %v3142_v12 = vrot.slane %v4451_v40, %v3141_v36  ;;  %v3150_v9 = vrot.slane %v4451_v40, %v3149_v35 }
 0x556   :  { %3746 = vmatpush1.bf16.msra.mxu0 %v3545_v42  ;;  %v3146_v42 = vrot.slane %v4451_v40, %v3145_v62 }
 0x557   :  { %3918 = vmatpush1.bf16.msra.mxu1 %v3547_v43  ;;  %3747 = vmatprep.subr.bf16.mxu0 %v3550_v47  ;;  %v3154_v43 = vrot.slane %v4451_v40, %v3153_v39  ;;  %v4452_v47 = vld [vmem:[#allocation8] sm:$0xff]  ;;  %v3361_v40 = vld [vmem:[#allocation10 + $0x320] sm:$0xff] }
 0x558   :  { %3919 = vmatprep.subr.bf16.mxu1 %v3552_v50  ;;  %v3200_v49 = vrot.slane %v4452_v47, %v3141_v36  ;;  %v3208_v50 = vrot.slane %v4452_v47, %v3149_v35  ;;  %v3585_v36 = vunpack.c.h.s8.bf16 %v3357_v4  ;;  %v3587_v35 = vunpack.c.h.s8.bf16 %v3359_v45 }
 0x55a   :  { %3748 = vmatpush1.bf16.msra.mxu0 %v3549_v44 }
 0x55b   :  { %3920 = vmatpush1.bf16.msra.mxu1 %v3551_v57  ;;  %3749 = vmatprep.subr.bf16.mxu0 %v3554_v30  ;;  %v3204_v57 = vrot.slane %v4452_v47, %v3145_v62  ;;  %v3212_v30 = vrot.slane %v4452_v47, %v3153_v39  ;;  %v3368_v47 = vld [vmem:[#allocation10 + $0x358] sm:$0xff] }
 0x55c   :  { %3921 = vmatprep.subr.bf16.mxu1 %v3556_v58 }
 0x55e   :  { %3750 = vmatpush1.bf16.msra.mxu0 %v3553_v60 }
 0x55f   :  { %3922 = vmatpush1.bf16.msra.mxu1 %v3555_v61  ;;  %3751 = vmatprep.subr.bf16.mxu0 %v3558_v63 }
 0x560   :  { %3923 = vmatprep.subr.bf16.mxu1 %v3560_v8 }
 0x562   :  { %3752 = vmatpush1.bf16.msra.mxu0 %v3557_v53 }
 0x563   :  { %3924 = vmatpush1.bf16.msra.mxu1 %v3559_v5  ;;  %3753 = vmatprep.subr.bf16.mxu0 %v3562_v2 }
 0x564   :  { %3925 = vmatprep.subr.bf16.mxu1 %v3564_v6 }
 0x566   :  { %3754 = vmatpush1.bf16.msra.mxu0 %v3561_v11 }
 0x567   :  { %3926 = vmatpush1.bf16.msra.mxu1 %v3563_v32  ;;  %3755 = vmatprep.subr.bf16.mxu0 %v3566_v13 }
 0x568   :  { %3927 = vmatprep.subr.bf16.mxu1 %v3568_v15 }
 0x56a   :  { %3756 = vmatpush1.bf16.msra.mxu0 %v3565_v17 }
 0x56b   :  { %3928 = vmatpush1.bf16.msra.mxu1 %v3567_v18  ;;  %3757 = vmatprep.subr.bf16.mxu0 %v3570_v19 }
 0x56c   :  { %3929 = vmatprep.subr.bf16.mxu1 %v3572_v20 }
 0x56e   :  { %3758 = vmatpush1.bf16.msra.mxu0 %v3569_v34 }
 0x56f   :  { %3930 = vmatpush1.bf16.msra.mxu1 %v3571_v22  ;;  %3759 = vmatprep.subr.bf16.mxu0 %v3574_v23 }
 0x570   :  { %3931 = vmatprep.subr.bf16.mxu1 %v3576_v25 }
 0x572   :  { %3760 = vmatpush1.bf16.msra.mxu0 %v3573_v52 }
 0x573   :  { %3932 = vmatpush1.bf16.msra.mxu1 %v3575_v26  ;;  %3761 = vmatprep.subr.bf16.mxu0 %v3578_v27  ;;  %v3581_v26 = vunpack.c.l.s8.bf16 %v3357_v4  ;;  %v3583_v27 = vunpack.c.l.s8.bf16 %v3359_v45 }
 0x574   :  { %3933 = vmatprep.subr.bf16.mxu1 %v3580_v46 }
 0x576   :  { %3762 = vmatpush1.bf16.msra.mxu0 %v3577_v3  ;;  %v3586_v3 = vunpack.c.h.s8.bf16 %v5057_v28  ;;  %v3589_v28 = vunpack.c.l.s8.bf16 %v3361_v40 }
 0x577   :  { %3934 = vmatpush1.bf16.msra.mxu1 %v3579_v31  ;;  %3774 = vmatprep.subr.bf16.mxu0 %v3582_v33  ;;  %v3588_v31 = vunpack.c.h.s8.bf16 %v5059_v29  ;;  %v3362_v33 = vld [vmem:[#allocation10 + $0x328] sm:$0xff] }
 0x578   :  { %3946 = vmatprep.subr.bf16.mxu1 %v3584_v51  ;;  %v3364_v51 = vld [vmem:[#allocation10 + $0x338] sm:$0xff]  ;;  %v3590_v62 = vunpack.c.l.s8.bf16 %v3362_v33 }
 0x579   :  { %v3592_v39 = vunpack.c.l.s8.bf16 %v3364_v51 }
 0x58c   :  { %v2768_v54 = vpop.f32.mrb[4].mxu0  ;;  %v3112_v44 = vpop.f32.mrb[4].mxu1 }
 0x58d   :  { %v3167_v58 = vmul.f32 %v3142_v12, %v2768_v54  ;;  %v3169_v37 = vmul.f32 %v3150_v9, %v3112_v44  ;;  %v2770_v59 = vpop.f32.mrb[5].mxu0  ;;  %v3114_v60 = vpop.f32.mrb[5].mxu1  ;;  %v3600_v44 = vunpack.c.l.s8.bf16 %v3368_v47 }
 0x58e   :  { %v3168_v61 = vmul.f32 %v3146_v42, %v2770_v59  ;;  %v3170_v63 = vmul.f32 %v3154_v43, %v3114_v60  ;;  %v2772_v0 = vpop.f32.mrb[6].mxu0  ;;  %v3116_v38 = vpop.f32.mrb[6].mxu1  ;;  %v3604_v60 = vunpack.c.h.s8.bf16 %v3368_v47  ;;  %v3386_v47 = vld [vmem:[#allocation10 + $0x3e8] sm:$0xff] }
 0x58f   :  { %v3225_v8 = vadd.f32 %v3200_v49, %v3167_v58  ;;  %v3227_v1 = vadd.f32 %v3208_v50, %v3169_v37  ;;  %v3175_v53 = vmul.f32 %v3142_v12, %v2772_v0  ;;  %v3177_v5 = vmul.f32 %v3150_v9, %v3116_v38  ;;  %v2774_v2 = vpop.f32.mrb[7].mxu0  ;;  %v3118_v6 = vpop.f32.mrb[7].mxu1  ;;  %v3363_v12 = vld [vmem:[#allocation10 + $0x330] sm:$0xff] }
 0x590   :  { %v3226_v7 = vadd.f32 %v3204_v57, %v3168_v61  ;;  %v3228_v10 = vadd.f32 %v3212_v30, %v3170_v63  ;;  %v3176_v11 = vmul.f32 %v3146_v42, %v2774_v2  ;;  %v3178_v32 = vmul.f32 %v3154_v43, %v3118_v6  ;;  %v3366_v43 = vld [vmem:[#allocation10 + $0x348] sm:$0xff]  ;;  %v3372_v63 = vld [vmem:[#allocation10 + $0x378] sm:$0xff] }
 0x591   :  { %v3233_v13 = vadd.f32 %v3200_v49, %v3175_v53  ;;  %v3235_v14 = vadd.f32 %v3208_v50, %v3177_v5  ;;  %v3241_v17 = vmax.f32 %v3225_v8, 0.0  ;;  %v3243_v18 = vmax.f32 %v3227_v1, 0.0  ;;  %v3370_v61 = vld [vmem:[#allocation10 + $0x368] sm:$0xff]  ;;  %v3369_v53 = vld [vmem:[#allocation10 + $0x360] sm:$0xff]  ;;  %v3371_v5 = vld [vmem:[#allocation10 + $0x370] sm:$0xff] }
 0x592   :  { %v3234_v15 = vadd.f32 %v3204_v57, %v3176_v11  ;;  %v3236_v16 = vadd.f32 %v3212_v30, %v3178_v32  ;;  %v3242_v34 = vmax.f32 %v3226_v7, 0.0  ;;  %v3244_v22 = vmax.f32 %v3228_v10, 0.0  ;;  %v3365_v57 = vld [vmem:[#allocation10 + $0x340] sm:$0xff]  ;;  %v3367_v30 = vld [vmem:[#allocation10 + $0x350] sm:$0xff]  ;;  %v3374_v11 = vld [vmem:[#allocation10 + $0x388] sm:$0xff] }
 0x593   :  { %v3249_v19 = vmax.f32 %v3233_v13, 0.0  ;;  %v3251_v20 = vmax.f32 %v3235_v14, 0.0  ;;  %v3591_v29 = vunpack.c.l.s8.bf16 %v3363_v12  ;;  %v3594_v9 = vunpack.c.h.s8.bf16 %v3362_v33  ;;  %v3376_v32 = vld [vmem:[#allocation10 + $0x398] sm:$0xff] }
 0x594   :  { %v3250_v23 = vmax.f32 %v3234_v15, 0.0  ;;  %v3252_v24 = vmax.f32 %v3236_v16, 0.0  ;;  %v3596_v42 = vunpack.c.h.s8.bf16 %v3364_v51  ;;  %v3593_v49 = vunpack.c.h.s8.bf16 %v3361_v40  ;;  %v3382_v51 = vld [vmem:[#allocation10 + $0x3c8] sm:$0xff] }
 0x595   :  { %v3257_v25 = vpack.c.bf16 %v3249_v19, %v3241_v17  ;;  %v5067_v41 = vpack.c.bf16 %v3251_v20, %v3243_v18  ;;  %v3595_v50 = vunpack.c.h.s8.bf16 %v3363_v12  ;;  %v3598_v54 = vunpack.c.l.s8.bf16 %v3366_v43  ;;  %v3373_v17 = vld [vmem:[#allocation10 + $0x380] sm:$0xff]  ;;  %v3375_v18 = vld [vmem:[#allocation10 + $0x390] sm:$0xff] }
 0x596   :  { %v3258_v52 = vpack.c.bf16 %v3250_v23, %v3242_v34  ;;  %v3260_v46 = vpack.c.bf16 %v3252_v24, %v3244_v22  ;;  %v3597_v58 = vunpack.c.l.s8.bf16 %v3365_v57  ;;  %v3599_v37 = vunpack.c.l.s8.bf16 %v3367_v30  ;;  %v3378_v34 = vld [vmem:[#allocation10 + $0x3a8] sm:$0xff]  ;;  %v3380_v22 = vld [vmem:[#allocation10 + $0x3b8] sm:$0xff]  ;;  %v3381_v12 = vld [vmem:[#allocation10 + $0x3c0] sm:$0xff] }
 0x597   :  { %v3602_v59 = vunpack.c.h.s8.bf16 %v3366_v43  ;;  %v3601_v0 = vunpack.c.h.s8.bf16 %v3365_v57  ;;  %v3603_v38 = vunpack.c.h.s8.bf16 %v3367_v30  ;;  %v3606_v8 = vunpack.c.l.s8.bf16 %v3370_v61  ;;  %v3385_v30 = vld [vmem:[#allocation10 + $0x3e0] sm:$0xff] }
 0x598   :  { %3763 = vmatprep.mubr.bf16.mxu0 %v3258_v52  ;;  %3935 = vmatprep.mubr.bf16.mxu1 %v3258_v52  ;;  %v3608_v1 = vunpack.c.l.s8.bf16 %v3372_v63  ;;  %v3605_v2 = vunpack.c.l.s8.bf16 %v3369_v53  ;;  %v3607_v6 = vunpack.c.l.s8.bf16 %v3371_v5  ;;  %v3610_v7 = vunpack.c.h.s8.bf16 %v3370_v61 }
 0x599   :  { %3764 = vmatmul.mubr.bf16.vlgmr.msra.gmra.mrb[8].mxu0 %v3257_v25  ;;  %3936 = vmatmul.mubr.bf16.vlgmr.msra.gmra.mrb[8].mxu1 %v3257_v25  ;;  %v3612_v10 = vunpack.c.h.s8.bf16 %v3372_v63  ;;  %v3609_v13 = vunpack.c.h.s8.bf16 %v3369_v53  ;;  %v3611_v14 = vunpack.c.h.s8.bf16 %v3371_v5  ;;  %v3614_v15 = vunpack.c.l.s8.bf16 %v3374_v11  ;;  %v4065_v63 = vld [vmem:[#allocation14 + $0x20] sm:$0xff] }
 0x59a   :  { %3775 = vmatpush1.bf16.msra.mxu0 %v3581_v26  ;;  %3947 = vmatpush1.bf16.msra.mxu1 %v3583_v27  ;;  %v3616_v16 = vunpack.c.l.s8.bf16 %v3376_v32  ;;  %v3613_v19 = vunpack.c.l.s8.bf16 %v3373_v17  ;;  %v3615_v20 = vunpack.c.l.s8.bf16 %v3375_v18  ;;  %v3618_v4 = vunpack.c.h.s8.bf16 %v3374_v11  ;;  %v3377_v26 = vld [vmem:[#allocation10 + $0x3a0] sm:$0xff]  ;;  %v3379_v27 = vld [vmem:[#allocation10 + $0x3b0] sm:$0xff]  ;;  %v4061_v5 = vld [vmem:[#allocation14] sm:$0xff] }
 0x59b   :  { %3806 = vmatprep.mubr.bf16.mxu0 %v3260_v46  ;;  %3978 = vmatprep.mubr.bf16.mxu1 %v3260_v46  ;;  %v3620_v45 = vunpack.c.h.s8.bf16 %v3376_v32  ;;  %v3617_v23 = vunpack.c.h.s8.bf16 %v3373_v17  ;;  %v3619_v24 = vunpack.c.h.s8.bf16 %v3375_v18  ;;  %v3622_v25 = vunpack.c.l.s8.bf16 %v3378_v34  ;;  %v4066_v32 = vld [vmem:[#allocation14 + $0x28] sm:$0xff] }
 0x59c   :  { %3776 = vmatprep.subr.bf16.mxu0 %v3586_v3  ;;  %3948 = vmatprep.subr.bf16.mxu1 %v3588_v31  ;;  %v3624_v52 = vunpack.c.l.s8.bf16 %v3380_v22  ;;  %v3621_v46 = vunpack.c.l.s8.bf16 %v3377_v26  ;;  %v3623_v3 = vunpack.c.l.s8.bf16 %v3379_v27  ;;  %v3626_v31 = vunpack.c.h.s8.bf16 %v3378_v34  ;;  %v4062_v18 = vld [vmem:[#allocation14 + $0x8] sm:$0xff] }
 0x59d   :  { %v3628_v33 = vunpack.c.h.s8.bf16 %v3380_v22  ;;  %v4067_v22 = vld [vmem:[#allocation14 + $0x30] sm:$0xff] }
 0x59e   :  { %3777 = vmatpush1.bf16.msra.mxu0 %v3585_v36  ;;  %3949 = vmatpush1.bf16.msra.mxu1 %v3587_v35  ;;  %v3384_v36 = vld [vmem:[#allocation10 + $0x3d8] sm:$0xff]  ;;  %v3625_v35 = vunpack.c.h.s8.bf16 %v3377_v26 }
 0x59f   :  { %3778 = vmatprep.subr.bf16.mxu0 %v3590_v62  ;;  %3950 = vmatprep.subr.bf16.mxu1 %v3592_v39  ;;  %v3627_v62 = vunpack.c.h.s8.bf16 %v3379_v27  ;;  %v3630_v39 = vunpack.c.l.s8.bf16 %v3382_v51  ;;  %v3632_v40 = vunpack.c.l.s8.bf16 %v3384_v36  ;;  %v3636_v43 = vunpack.c.h.s8.bf16 %v3384_v36  ;;  %v4063_v26 = vld [vmem:[#allocation14 + $0x10] sm:$0xff] }
 0x5a0   :  { %v4071_v27 = vld [vmem:[#allocation14 + $0x50] sm:$0xff] }
 0x5a1   :  { %v4098_v36 = vunpack.c.h.s8.bf16 %v4071_v27 }
 0x5a2   :  { %3779 = vmatpush1.bf16.msra.mxu0 %v3589_v28  ;;  %3951 = vmatpush1.bf16.msra.mxu1 %v3591_v29  ;;  %v3383_v28 = vld [vmem:[#allocation10 + $0x3d0] sm:$0xff]  ;;  %v3629_v29 = vunpack.c.l.s8.bf16 %v3381_v12 }
 0x5a3   :  { %3780 = vmatprep.subr.bf16.mxu0 %v3594_v9  ;;  %3952 = vmatprep.subr.bf16.mxu1 %v3596_v42  ;;  %v3631_v9 = vunpack.c.l.s8.bf16 %v3383_v28  ;;  %v3634_v42 = vunpack.c.h.s8.bf16 %v3382_v51  ;;  %v4082_v51 = vunpack.c.h.s8.bf16 %v4063_v26 }
 0x5a6   :  { %3781 = vmatpush1.bf16.msra.mxu0 %v3593_v49  ;;  %3953 = vmatpush1.bf16.msra.mxu1 %v3595_v50  ;;  %v3388_v49 = vld [vmem:[#allocation10 + $0x3f8] sm:$0xff]  ;;  %v3633_v50 = vunpack.c.h.s8.bf16 %v3381_v12  ;;  %v4064_v12 = vld [vmem:[#allocation14 + $0x18] sm:$0xff] }
 0x5a7   :  { %3782 = vmatprep.subr.bf16.mxu0 %v3598_v54  ;;  %3954 = vmatprep.subr.bf16.mxu1 %v3600_v44  ;;  %v3635_v54 = vunpack.c.h.s8.bf16 %v3383_v28  ;;  %v3638_v44 = vunpack.c.l.s8.bf16 %v3386_v47  ;;  %v3640_v57 = vunpack.c.l.s8.bf16 %v3388_v49  ;;  %v3644_v61 = vunpack.c.h.s8.bf16 %v3388_v49  ;;  %v4072_v28 = vld [vmem:[#allocation14 + $0x58] sm:$0xff] }
 0x5a8   :  { %v4100_v49 = vunpack.c.h.s8.bf16 %v4072_v28 }
 0x5aa   :  { %3783 = vmatpush1.bf16.msra.mxu0 %v3597_v58  ;;  %3955 = vmatpush1.bf16.msra.mxu1 %v3599_v37  ;;  %v3387_v58 = vld [vmem:[#allocation10 + $0x3f0] sm:$0xff]  ;;  %v3637_v37 = vunpack.c.l.s8.bf16 %v3385_v30 }
 0x5ab   :  { %3784 = vmatprep.subr.bf16.mxu0 %v3602_v59  ;;  %3956 = vmatprep.subr.bf16.mxu1 %v3604_v60  ;;  %v3639_v59 = vunpack.c.l.s8.bf16 %v3387_v58  ;;  %v3642_v60 = vunpack.c.h.s8.bf16 %v3386_v47  ;;  %v4084_v47 = vunpack.c.h.s8.bf16 %v4064_v12 }
 0x5ae   :  { %3785 = vmatpush1.bf16.msra.mxu0 %v3601_v0  ;;  %3957 = vmatpush1.bf16.msra.mxu1 %v3603_v38  ;;  %v4073_v0 = vld [vmem:[#allocation14 + $0x60] sm:$0xff]  ;;  %v3641_v38 = vunpack.c.h.s8.bf16 %v3385_v30 }
 0x5af   :  { %3786 = vmatprep.subr.bf16.mxu0 %v3606_v8  ;;  %3958 = vmatprep.subr.bf16.mxu1 %v3608_v1  ;;  %v3643_v8 = vunpack.c.h.s8.bf16 %v3387_v58  ;;  %v4085_v1 = vunpack.c.l.s8.bf16 %v4065_v63  ;;  %v4101_v53 = vunpack.c.l.s8.bf16 %v4073_v0  ;;  %v4102_v11 = vunpack.c.h.s8.bf16 %v4073_v0 }
 0x5b2   :  { %3787 = vmatpush1.bf16.msra.mxu0 %v3605_v2  ;;  %3959 = vmatpush1.bf16.msra.mxu1 %v3607_v6  ;;  %v4069_v2 = vld [vmem:[#allocation14 + $0x40] sm:$0xff]  ;;  %v4077_v6 = vunpack.c.l.s8.bf16 %v4061_v5 }
 0x5b3   :  { %3788 = vmatprep.subr.bf16.mxu0 %v3610_v7  ;;  %3960 = vmatprep.subr.bf16.mxu1 %v3612_v10  ;;  %v4093_v7 = vunpack.c.l.s8.bf16 %v4069_v2  ;;  %v4086_v10 = vunpack.c.h.s8.bf16 %v4065_v63 }
 0x5b6   :  { %3789 = vmatpush1.bf16.msra.mxu0 %v3609_v13  ;;  %3961 = vmatpush1.bf16.msra.mxu1 %v3611_v14  ;;  %v4074_v13 = vld [vmem:[#allocation14 + $0x68] sm:$0xff]  ;;  %v4078_v14 = vunpack.c.h.s8.bf16 %v4061_v5 }
 0x5b7   :  { %3790 = vmatprep.subr.bf16.mxu0 %v3614_v15  ;;  %3962 = vmatprep.subr.bf16.mxu1 %v3616_v16  ;;  %v4094_v15 = vunpack.c.h.s8.bf16 %v4069_v2  ;;  %v4087_v16 = vunpack.c.l.s8.bf16 %v4066_v32  ;;  %v4103_v17 = vunpack.c.l.s8.bf16 %v4074_v13  ;;  %v4104_v34 = vunpack.c.h.s8.bf16 %v4074_v13 }
 0x5ba   :  { %3791 = vmatpush1.bf16.msra.mxu0 %v3613_v19  ;;  %3963 = vmatpush1.bf16.msra.mxu1 %v3615_v20  ;;  %v4070_v19 = vld [vmem:[#allocation14 + $0x48] sm:$0xff]  ;;  %v4079_v20 = vunpack.c.l.s8.bf16 %v4062_v18 }
 0x5bb   :  { %3792 = vmatprep.subr.bf16.mxu0 %v3618_v4  ;;  %3964 = vmatprep.subr.bf16.mxu1 %v3620_v45  ;;  %v4095_v4 = vunpack.c.l.s8.bf16 %v4070_v19  ;;  %v4088_v45 = vunpack.c.h.s8.bf16 %v4066_v32 }
 0x5be   :  { %3793 = vmatpush1.bf16.msra.mxu0 %v3617_v23  ;;  %3965 = vmatpush1.bf16.msra.mxu1 %v3619_v24  ;;  %v4080_v23 = vunpack.c.h.s8.bf16 %v4062_v18  ;;  %v4096_v24 = vunpack.c.h.s8.bf16 %v4070_v19 }
 0x5bf   :  { %3794 = vmatprep.subr.bf16.mxu0 %v3622_v25  ;;  %3966 = vmatprep.subr.bf16.mxu1 %v3624_v52  ;;  %v4089_v25 = vunpack.c.l.s8.bf16 %v4067_v22 }
 0x5c2   :  { %3795 = vmatpush1.bf16.msra.mxu0 %v3621_v46  ;;  %3967 = vmatpush1.bf16.msra.mxu1 %v3623_v3  ;;  %v4081_v46 = vunpack.c.l.s8.bf16 %v4063_v26  ;;  %v4097_v3 = vunpack.c.l.s8.bf16 %v4071_v27 }
 0x5c3   :  { %3796 = vmatprep.subr.bf16.mxu0 %v3626_v31  ;;  %3968 = vmatprep.subr.bf16.mxu1 %v3628_v33  ;;  %v4090_v31 = vunpack.c.h.s8.bf16 %v4067_v22 }
 0x5c6   :  { %3797 = vmatpush1.bf16.msra.mxu0 %v3625_v35  ;;  %3969 = vmatpush1.bf16.msra.mxu1 %v3627_v62  ;;  %v4068_v35 = vld [vmem:[#allocation14 + $0x38] sm:$0xff] }
 0x5c7   :  { %3798 = vmatprep.subr.bf16.mxu0 %v3630_v39  ;;  %3970 = vmatprep.subr.bf16.mxu1 %v3632_v40  ;;  %v4076_v62 = vld [vmem:[#allocation14 + $0x78] sm:$0xff]  ;;  %v4091_v39 = vunpack.c.l.s8.bf16 %v4068_v35 }
 0x5c8   :  { %v4107_v40 = vunpack.c.l.s8.bf16 %v4076_v62 }
 0x5ca   :  { %3799 = vmatpush1.bf16.msra.mxu0 %v3629_v29  ;;  %3971 = vmatpush1.bf16.msra.mxu1 %v3631_v9  ;;  %v4083_v29 = vunpack.c.l.s8.bf16 %v4064_v12  ;;  %v4099_v9 = vunpack.c.l.s8.bf16 %v4072_v28 }
 0x5cb   :  { %3800 = vmatprep.subr.bf16.mxu0 %v3634_v42  ;;  %3972 = vmatprep.subr.bf16.mxu1 %v3636_v43  ;;  %v4092_v42 = vunpack.c.h.s8.bf16 %v4068_v35  ;;  %v4108_v43 = vunpack.c.h.s8.bf16 %v4076_v62 }
 0x5ce   :  { %3801 = vmatpush1.bf16.msra.mxu0 %v3633_v50  ;;  %3973 = vmatpush1.bf16.msra.mxu1 %v3635_v54  ;;  %v3989_v50 = vld [vmem:[#allocation11] sm:$0xf]  ;;  %v4019_v54 = vld [vmem:[#allocation13] sm:$0xf] }
 0x5cf   :  { %3802 = vmatprep.subr.bf16.mxu0 %v3638_v44  ;;  %3974 = vmatprep.subr.bf16.mxu1 %v3640_v57  ;;  %v3994_v44 = vrot.slane %v3989_v50, %v4992_v21  ;;  %v4002_v57 = vrot.slane %v3989_v50, %v4995_v48  ;;  %v3998_v30 = vrot.slane %v3989_v50, %v4998_v55 }
 0x5d0   :  { %v4006_v58 = vrot.slane %v3989_v50, %v5001_v56  ;;  %v4028_v63 = vrot.slane %v4019_v54, %v4998_v55  ;;  %v4036_v0 = vrot.slane %v4019_v54, %v5001_v56 }
 0x5d2   :  { %3803 = vmatpush1.bf16.msra.mxu0 %v3637_v37  ;;  %3975 = vmatpush1.bf16.msra.mxu1 %v3639_v59  ;;  %v4024_v37 = vrot.slane %v4019_v54, %v4992_v21  ;;  %v4032_v59 = vrot.slane %v4019_v54, %v4995_v48 }
 0x5d3   :  { %3804 = vmatprep.subr.bf16.mxu0 %v3642_v60  ;;  %3976 = vmatprep.subr.bf16.mxu1 %v3644_v61 }
 0x5d6   :  { %3805 = vmatpush1.bf16.msra.mxu0 %v3641_v38  ;;  %3977 = vmatpush1.bf16.msra.mxu1 %v3643_v8 }
 0x5d7   :  { %4252 = vmatprep.subr.bf16.mxu0 %v4085_v1  ;;  %4274 = vmatprep.subr.bf16.mxu1 %v4101_v53 }
 0x5d9   :  { %3807 = vmatmul.mubr.bf16.vlgmr.msra.gmra.mrb[8].mxu0 %v5067_v41  ;;  %3979 = vmatmul.mubr.bf16.vlgmr.msra.gmra.mrb[8].mxu1 %v5067_v41  ;;  %v4075_v41 = vld [vmem:[#allocation14 + $0x70] sm:$0xff] }
 0x5da   :  { %4253 = vmatpush3.bf16.msra.mxu0 %v4077_v6  ;;  %4275 = vmatpush3.bf16.msra.mxu1 %v4093_v7  ;;  %v4105_v52 = vunpack.c.l.s8.bf16 %v4075_v41  ;;  %v4106_v33 = vunpack.c.h.s8.bf16 %v4075_v41 }
 0x5db   :  { %4254 = vmatprep.subr.bf16.mxu0 %v4086_v10  ;;  %4276 = vmatprep.subr.bf16.mxu1 %v4102_v11 }
 0x5de   :  { %4255 = vmatpush3.bf16.msra.mxu0 %v4078_v14  ;;  %4277 = vmatpush3.bf16.msra.mxu1 %v4094_v15 }
 0x5df   :  { %4256 = vmatprep.subr.bf16.mxu0 %v4087_v16  ;;  %4278 = vmatprep.subr.bf16.mxu1 %v4103_v17 }
 0x5e2   :  { %4257 = vmatpush3.bf16.msra.mxu0 %v4079_v20  ;;  %4279 = vmatpush3.bf16.msra.mxu1 %v4095_v4 }
 0x5e3   :  { %4258 = vmatprep.subr.bf16.mxu0 %v4088_v45  ;;  %4280 = vmatprep.subr.bf16.mxu1 %v4104_v34 }
 0x5e6   :  { %4259 = vmatpush3.bf16.msra.mxu0 %v4080_v23  ;;  %4281 = vmatpush3.bf16.msra.mxu1 %v4096_v24 }
 0x5e7   :  { %4260 = vmatprep.subr.bf16.mxu0 %v4089_v25  ;;  %4282 = vmatprep.subr.bf16.mxu1 %v4105_v52 }
 0x5ea   :  { %4261 = vmatpush3.bf16.msra.mxu0 %v4081_v46  ;;  %4283 = vmatpush3.bf16.msra.mxu1 %v4097_v3 }
 0x5eb   :  { %4262 = vmatprep.subr.bf16.mxu0 %v4090_v31  ;;  %4284 = vmatprep.subr.bf16.mxu1 %v4106_v33 }
 0x5ee   :  { %4263 = vmatpush3.bf16.msra.mxu0 %v4082_v51  ;;  %4285 = vmatpush3.bf16.msra.mxu1 %v4098_v36 }
 0x5ef   :  { %4264 = vmatprep.subr.bf16.mxu0 %v4091_v39  ;;  %4286 = vmatprep.subr.bf16.mxu1 %v4107_v40  ;;  %v4241_v39 = vld [vmem:[#allocation16] ss:$0 sm:$0xff] }
 0x5f2   :  { %4265 = vmatpush3.bf16.msra.mxu0 %v4083_v29  ;;  %4287 = vmatpush3.bf16.msra.mxu1 %v4099_v9 }
 0x5f3   :  { %4266 = vmatprep.subr.bf16.mxu0 %v4092_v42  ;;  %4288 = vmatprep.subr.bf16.mxu1 %v4108_v43 }
 0x5f6   :  { %4267 = vmatpush3.bf16.msra.mxu0 %v4084_v47  ;;  %4289 = vmatpush3.bf16.msra.mxu1 %v4100_v49  ;;  %v4242_v47 = vld [vmem:[#allocation17] ss:$0 sm:$0xff] }
 0x6ac   :  { %v3808_v60 = vpop.f32.mrb[8].mxu0  ;;  %v3980_v61 = vpop.f32.mrb[8].mxu1 }
 0x6ad   :  { %v4011_v38 = vmul.f32 %v3994_v44, %v3808_v60  ;;  %v4013_v8 = vmul.f32 %v4002_v57, %v3980_v61  ;;  %v3810_v1 = vpop.f32.mrb[9].mxu0  ;;  %v3982_v53 = vpop.f32.mrb[9].mxu1 }
 0x6ae   :  { %v4012_v5 = vmul.f32 %v3998_v30, %v3810_v1  ;;  %v4014_v2 = vmul.f32 %v4006_v58, %v3982_v53  ;;  %v3812_v6 = vpop.f32.mrb[10].mxu0  ;;  %v3984_v7 = vpop.f32.mrb[10].mxu1 }
 0x6af   :  { %v4041_v10 = vadd.f32 %v4024_v37, %v4011_v38  ;;  %v4043_v11 = vadd.f32 %v4032_v59, %v4013_v8  ;;  %v4015_v32 = vmul.f32 %v3994_v44, %v3812_v6  ;;  %v4017_v21 = vmul.f32 %v4002_v57, %v3984_v7  ;;  %v3814_v13 = vpop.f32.mrb[11].mxu0  ;;  %v3986_v48 = vpop.f32.mrb[11].mxu1 }
 0x6b0   :  { %v4042_v14 = vadd.f32 %v4028_v63, %v4012_v5  ;;  %v4044_v15 = vadd.f32 %v4036_v0, %v4014_v2  ;;  %v4016_v16 = vmul.f32 %v3998_v30, %v3814_v13  ;;  %v4018_v55 = vmul.f32 %v4006_v58, %v3986_v48 }
 0x6b1   :  { %v4045_v17 = vadd.f32 %v4024_v37, %v4015_v32  ;;  %v4047_v56 = vadd.f32 %v4032_v59, %v4017_v21  ;;  %v4049_v20 = vmax.f32 %v4041_v10, 0.0  ;;  %v4051_v4 = vmax.f32 %v4043_v11, 0.0 }
 0x6b2   :  { %v4046_v18 = vadd.f32 %v4028_v63, %v4016_v16  ;;  %v4048_v19 = vadd.f32 %v4036_v0, %v4018_v55  ;;  %v4050_v22 = vmax.f32 %v4042_v14, 0.0  ;;  %v4052_v41 = vmax.f32 %v4044_v15, 0.0 }
 0x6b3   :  { %v4053_v45 = vmax.f32 %v4045_v17, 0.0  ;;  %v4055_v34 = vmax.f32 %v4047_v56, 0.0 }
 0x6b4   :  { %v4054_v23 = vmax.f32 %v4046_v18, 0.0  ;;  %v4056_v24 = vmax.f32 %v4048_v19, 0.0 }
 0x6b5   :  { %v4057_v25 = vpack.c.bf16 %v4053_v45, %v4049_v20  ;;  %v4059_v52 = vpack.c.bf16 %v4055_v34, %v4051_v4 }
 0x6b6   :  { %v4058_v26 = vpack.c.bf16 %v4054_v23, %v4050_v22  ;;  %v4060_v27 = vpack.c.bf16 %v4056_v24, %v4052_v41 }
 0x6b8   :  { %4141 = vmatprep.mubr.bf16.mxu0 %v4058_v26  ;;  %4182 = vmatprep.mubr.bf16.mxu1 %v4060_v27 }
 0x6b9   :  { %4142 = vmatmul.mubr.bf16.vlgmr.msra.gmra.mrb[12].mxu0 %v4057_v25  ;;  %4183 = vmatmul.mubr.bf16.vlgmr.msra.gmra.mrb[12].mxu1 %v4059_v52 }
 0x78c   :  { %v4268_v46 = vpop.f32.mrb[12].mxu0  ;;  %v4290_v3 = vpop.f32.mrb[12].mxu1 }
 0x78d   :  { %v4269_v31 = vpop.f32.mrb[13].mxu0  ;;  %v4291_v33 = vpop.f32.mrb[13].mxu1 }
 0x78e   :  { %v4270_v51 = vadd.f32 %v4269_v31, %v4268_v46  ;;  %v4292_v36 = vadd.f32 %v4291_v33, %v4290_v3  ;;  %v4271_v35 = vpop.f32.mrb[14].mxu0  ;;  %v4293_v62 = vpop.f32.mrb[14].mxu1 }
 0x78f   :  { %v4272_v40 = vpop.f32.mrb[15].mxu0  ;;  %v4294_v12 = vpop.f32.mrb[15].mxu1 }
 0x790   :  { %v4185_v28 = vadd.f32 %v4292_v36, %v4270_v51  ;;  %v4273_v29 = vadd.f32 %v4272_v40, %v4271_v35  ;;  %v4295_v9 = vadd.f32 %v4294_v12, %v4293_v62 }
 0x792   :  { %v4198_v42 = vmul.f32 %v4241_v39, %v4185_v28  ;;  %v4188_v43 = vadd.f32 %v4295_v9, %v4273_v29 }
 0x794   :  { %v4199_v49 = vmul.f32 %v4241_v39, %v4188_v43  ;;  %v4207_v50 = vadd.f32 %v4242_v47, %v4198_v42 }
 0x796   :  { %v4208_v54 = vadd.f32 %v4242_v47, %v4199_v49 }
 0x798   :  { %v4250_v44 = vpack.c.bf16 %v4208_v54, %v4207_v50 }
 0x79a   :  { %4251 = vst [vmem:[#allocation19] sm:$0xff] %v4250_v44  }
 0x79b   :  { %4684 = shalt.err (!%p4681_p0)
}
 0x79c   :  { %s4685_s26 = scalar_lea.hbm %s5105_s10, 128 }
 0x79d   :  { %p4686_p1 = scmp.ne.s32.totalorder %s5105_s10, %s4685_s26  ;;  %p4689_p2 = scmp.lt.u32.totalorder %s4685_s26, %s5105_s10 }
 0x79f   :  { %p4691_p3 = pnand %p4689_p2, %p4686_p1 }
 0x7a1   :  { %4694 = shalt.err (!%p4691_p3)
}
 0x7a2   :  { %s4727_s11 = smov 4  }
 0x7a3   :  { %4230 = dma.vmem_to_hbm [thread:$0]  %s4225_s15, 128, %s5105_s10, [#allocation4], %s4711_s24, %s4711_s24, %s4727_s11  }
 0x7a4   :  { %4707 = dma.done.wait [#allocation4], 128  }
 0x7a5   :  { %4708 = vsyncadd [#allocation4], 4294967168 }
 0x7a6   :  { %4234 = vsyncpa [#allocation3], 1 }
 0x7a7   :  { %4235 = vsyncpa [#allocation6], 1 }
 0x7a8   :  { %4236 = vsyncpa [#allocation9], 1 }
 0x7a9   :  { %4237 = vsyncpa [#allocation12], 1 }
 0x7aa   :  { %4238 = vsyncpa [#allocation15], 1 }
 0x7ab   :  { %4239 = vsyncpa [#allocation18], 1 }
 0x7ac   :  { %4240 = vsyncpa [#allocation4], 1 }

</bundles_post_ra>
